<compile_context>
chip_gen: v6e
topology: v6e:2x2x1
jax: 0.10.0
libtpu: 0.0.40
codegen_flags: <defaults>
</compile_context>

<pallas_src>
import jax
import jax.numpy as jnp
from jax.experimental import pallas as pl
from jax.experimental.pallas import tpu as pltpu

EPS = 1e-5  # PyTorch GroupNorm default eps


def _gn1_stats(y):
    """GroupNorm(num_groups=1) statistics for one (C, N) sample.

    Single reduction pass (sum and sum-of-squares together); the variance is clamped
    at zero because E[x^2] - E[x]^2 can cancel to a tiny negative number.
    Returns (mean, inv_std) scalars.
    """
    n = y.shape[0] * y.shape[1]
    s1 = jnp.sum(y)
    s2 = jnp.sum(y * y)
    mean = s1 / n
    var = jnp.maximum(s2 / n - mean * mean, 0.0)
    return mean, jax.lax.rsqrt(var + EPS)


def conv1d_aggre_kernel(x_ref,
                        w1_ref, g1_ref, b1_ref,
                        w2a_ref, w2bs_ref, g2_ref, b2_ref,
                        w3_ref, g3_ref, b3_ref,
                        out_ref):
    bblk = x_ref.shape[0]

    w1 = w1_ref[...]          # (C, C) bf16
    w2a = w2a_ref[...]        # (C, C) bf16
    w3 = w3_ref[...]          # (C, C) bf16
    w2bs = w2bs_ref[...]      # (C, 1) f32  (row-sum of W2's second half)
    g1, b1 = g1_ref[...], b1_ref[...]
    g2, b2 = g2_ref[...], b2_ref[...]
    g3, b3 = g3_ref[...], b3_ref[...]

    # Static (unrolled) per-sample loop: GroupNorm(1) needs full per-sample stats, and
    # unrolling lets the scheduler interleave sample i's matmuls with sample i-1's
    # reductions / elementwise work.
    for b in range(bblk):
        xb = x_ref[b]                                                    # (C, N) bf16

        # ---- conv_1: pointwise conv (no bias) + GN(1) + ReLU (fused scale/shift) ----
        h1 = jnp.dot(w1, xb, preferred_element_type=jnp.float32)        # (C, N) f32
        mean, inv = _gn1_stats(h1)
        s = g1 * inv                                                     # (C, 1)
        h1 = jnp.maximum(h1 * s + (b1 - mean * s), 0.0)                  # f32 (for max-pool)

        # ---- channel-wise max pooling (sublane reduce on XLU) -----------------------
        mp = jnp.max(h1, axis=0, keepdims=True)                          # (1, N)

        # ---- conv_2 on cat([h1, mp.repeat(C)], ch):
        #      W2a @ h1  +  rowsum(W2b) * mp  (repeated rows collapse to a column sum)
        h2 = jnp.dot(w2a, h1.astype(jnp.bfloat16),
                     preferred_element_type=jnp.float32)                 # (C, N) f32
        h2 = h2 + w2bs * mp
        mean, inv = _gn1_stats(h2)
        s = g2 * inv
        h2 = jnp.maximum(h2 * s + (b2 - mean * s), 0.0).astype(jnp.bfloat16)

        # ---- dropout(p=0) is identity; conv_3 (no act) + residual + ReLU ------------
        h3 = jnp.dot(w3, h2, preferred_element_type=jnp.float32)         # (C, N) f32
        mean, inv = _gn1_stats(h3)
        s = g3 * inv
        res = x_ref[b].astype(jnp.float32)     # re-read residual late: keeps live state low
        out_ref[b] = jnp.maximum(h3 * s + (b3 - mean * s) + res, 0.0)


def _vmem_budget_bytes():
    """Per-generation VMEM budget (v5e/v6e: 128 MiB, v7x: 64 MiB), with headroom."""
    try:
        cap = pltpu.get_tpu_info().vmem_capacity_bytes
    except Exception:
        cap = 64 * 1024 * 1024                 # conservative (v7x-sized) fallback
    return int(cap) * 3 // 4                   # leave room for compiler temps


def _pick_batch_block(B, C, N, vmem_budget):
    """Largest Bblk that divides B, keeps >= min(B, 4) grid steps (so both v7x
    TensorCores get >= 2 pipelined steps), and fits the per-step VMEM footprint."""
    def footprint(bblk):
        io = 2 * (bblk * C * N * 2) + 2 * (bblk * C * N * 4)   # dbl-buffered bf16 in / f32 out
        work = 8 * C * N * 4                                   # per-sample live f32 slabs
        weights = 2 * (3 * C * C * 2 + 8 * C * 4)              # dbl-buffered weights / vectors
        return io + work + weights + (2 << 20)

    if footprint(1) > vmem_budget:
        # TODO(synk): add an N-tiled two-pass GroupNorm path for very large C*N on v7x.
        raise ValueError(
            f"Single-sample working set ({footprint(1)} B) exceeds the VMEM budget "
            f"({vmem_budget} B); an N-tiled two-pass GroupNorm path is required.")

    target = min(max(1, B // 4), 8)            # keep >=4 grid steps; >8 has diminishing returns
    bblk = 1
    for cand in range(1, target + 1):
        if B % cand == 0 and footprint(cand) <= vmem_budget:
            bblk = cand
    return bblk, footprint(bblk)


def prepare_params(params):
    """One-time weight preprocessing; keep it out of the per-call hot path.
    (A PyTorch Conv1d weight of shape (out, in, 1) maps here via w[..., 0].)"""
    C = params["w1"].shape[0]
    w2 = jnp.asarray(params["w2"], jnp.float32)

    def col(v):
        return jnp.asarray(v, jnp.float32).reshape(C, 1)

    return dict(
        w1=jnp.asarray(params["w1"], jnp.float32).astype(jnp.bfloat16),
        w2a=w2[:, :C].astype(jnp.bfloat16),
        # channel-max is repeated over channels -> its matmul collapses to a row-sum of
        # W2's second half times mp; keep the row-sum exact in f32.
        w2bs=jnp.sum(w2[:, C:], axis=1, keepdims=True),
        w3=jnp.asarray(params["w3"], jnp.float32).astype(jnp.bfloat16),
        g1=col(params["g1"]), b1=col(params["b1"]),
        g2=col(params["g2"]), b2=col(params["b2"]),
        g3=col(params["g3"]), b3=col(params["b3"]),
    )


@jax.jit
def conv1d_aggre_block(feats, prep):
    """feats: (B, C, N) float. Returns (B, C, N) float32."""
    B, C, N = feats.shape

    vmem_budget = _vmem_budget_bytes()
    bblk, step_bytes = _pick_batch_block(B, C, N, vmem_budget)
    vmem_limit = int(min(max(step_bytes, 32 * 1024 * 1024), vmem_budget))

    x_bf = feats.astype(jnp.bfloat16)          # halve input HBM DMA bytes

    batch_spec = pl.BlockSpec((bblk, C, N), lambda i: (i, 0, 0))
    mat_spec = pl.BlockSpec((C, C), lambda i: (0, 0))   # weights: constant index, fetched once
    vec_spec = pl.BlockSpec((C, 1), lambda i: (0, 0))   # gamma/beta/row-sum columns

    return pl.pallas_call(
        conv1d_aggre_kernel,
        out_shape=jax.ShapeDtypeStruct((B, C, N), jnp.float32),
        grid=(B // bblk,),
        in_specs=[batch_spec,
                  mat_spec, vec_spec, vec_spec,
                  mat_spec, vec_spec, vec_spec, vec_spec,
                  mat_spec, vec_spec, vec_spec],
        out_specs=batch_spec,
        compiler_params=pltpu.CompilerParams(
            dimension_semantics=("parallel",),
            vmem_limit_bytes=vmem_limit),
    )(x_bf,
      prep["w1"], prep["g1"], prep["b1"],
      prep["w2a"], prep["w2bs"], prep["g2"], prep["b2"],
      prep["w3"], prep["g3"], prep["b3"])


def reference_forward(feats, params):
    """Pure-JAX (f32) reference matching the PyTorch module."""
    def gn(y, g, b):
        m = jnp.mean(y, axis=(1, 2), keepdims=True)
        v = jnp.mean(jnp.square(y - m), axis=(1, 2), keepdims=True)
        return (y - m) * jax.lax.rsqrt(v + EPS) * g[None, :, None] + b[None, :, None]

    def pconv(y, w):                       # pointwise conv: (B, Cin, N) x (Cout, Cin)
        return jnp.einsum("oc,bcn->bon", w, y)

    h1 = jax.nn.relu(gn(pconv(feats, params["w1"]), params["g1"], params["b1"]))
    mp = jnp.broadcast_to(jnp.max(h1, axis=1, keepdims=True), h1.shape)
    cat = jnp.concatenate([h1, mp], axis=1)
    h2 = jax.nn.relu(gn(pconv(cat, params["w2"]), params["g2"], params["b2"]))
    h3 = gn(pconv(h2, params["w3"]), params["g3"], params["b3"])   # dropout p=0 = identity
    return jax.nn.relu(h3 + feats)


if __name__ == "__main__":
    # (batch, n_feat, sequence); N is a multiple of 128 for lane-dense stores,
    # n_feat a multiple of 8 for sublane alignment.  B=8 -> Bblk=2, grid of 4 steps.
    B, C, N = 8, 64, 256

    key = jax.random.PRNGKey(0)
    ks = jax.random.split(key, 12)

    feats = jax.random.normal(ks[0], (B, C, N), jnp.float32)

    def gamma_beta(kg, kb, n):
        return (1.0 + 0.05 * jax.random.normal(kg, (n,), jnp.float32),
                0.05 * jax.random.normal(kb, (n,), jnp.float32))

    g1, b1 = gamma_beta(ks[2], ks[3], C)
    g2, b2 = gamma_beta(ks[5], ks[6], C)
    g3, b3 = gamma_beta(ks[8], ks[9], C)
    params = {
        "w1": jax.random.normal(ks[1], (C, C), jnp.float32) / jnp.sqrt(C),
        "g1": g1, "b1": b1,
        "w2": jax.random.normal(ks[4], (C, 2 * C), jnp.float32) / jnp.sqrt(2 * C),
        "g2": g2, "b2": b2,
        "w3": jax.random.normal(ks[7], (C, C), jnp.float32) / jnp.sqrt(C),
        "g3": g3, "b3": b3,
    }

    prep = prepare_params(params)               # one-time, off the hot path
    out = conv1d_aggre_block(feats, prep)
    out = jax.block_until_ready(out)

    ref = reference_forward(feats, params)
    assert out.shape == (B, C, N) and out.dtype == jnp.float32
    max_diff = float(jnp.max(jnp.abs(out - ref)))
    # bf16 HBM input + bf16 MXU operands (f32 accumulation, GN re-normalizes) vs a
    # pure-f32 reference -> loosened tolerance.
    assert jnp.allclose(out, ref, atol=1e-1, rtol=1e-1), f"max abs diff {max_diff}"

    print("KERNEL_OK")
</pallas_src>

<mosaic_0001>
module attributes {stable_mosaic.version = 11 : i64} {
  func.func @conv1d_aggre_kernel(%arg0: i32, %arg1: memref<2x64x256xbf16, #tpu.memory_space<vmem>>, %arg2: memref<64x64xbf16, #tpu.memory_space<vmem>>, %arg3: memref<64x1xf32, #tpu.memory_space<vmem>>, %arg4: memref<64x1xf32, #tpu.memory_space<vmem>>, %arg5: memref<64x64xbf16, #tpu.memory_space<vmem>>, %arg6: memref<64x1xf32, #tpu.memory_space<vmem>>, %arg7: memref<64x1xf32, #tpu.memory_space<vmem>>, %arg8: memref<64x1xf32, #tpu.memory_space<vmem>>, %arg9: memref<64x64xbf16, #tpu.memory_space<vmem>>, %arg10: memref<64x1xf32, #tpu.memory_space<vmem>>, %arg11: memref<64x1xf32, #tpu.memory_space<vmem>>, %arg12: memref<2x64x256xf32, #tpu.memory_space<vmem>>) attributes {dimension_semantics = [#tpu.dimension_semantics<parallel>], iteration_bounds = array<i64: 4>, scalar_prefetch = 0 : i64, scratch_operands = 0 : i64, tpu.core_type = #tpu.core_type<tc>, window_params = [{transform_indices = @transform_0, window_bounds = array<i64: 2, 64, 256>}, {pipeline_mode = #tpu.pipeline_mode<synchronous>, transform_indices = @transform_1, window_bounds = array<i64: 64, 64>}, {pipeline_mode = #tpu.pipeline_mode<synchronous>, transform_indices = @transform_2, window_bounds = array<i64: 64, 1>}, {pipeline_mode = #tpu.pipeline_mode<synchronous>, transform_indices = @transform_3, window_bounds = array<i64: 64, 1>}, {pipeline_mode = #tpu.pipeline_mode<synchronous>, transform_indices = @transform_4, window_bounds = array<i64: 64, 64>}, {pipeline_mode = #tpu.pipeline_mode<synchronous>, transform_indices = @transform_5, window_bounds = array<i64: 64, 1>}, {pipeline_mode = #tpu.pipeline_mode<synchronous>, transform_indices = @transform_6, window_bounds = array<i64: 64, 1>}, {pipeline_mode = #tpu.pipeline_mode<synchronous>, transform_indices = @transform_7, window_bounds = array<i64: 64, 1>}, {pipeline_mode = #tpu.pipeline_mode<synchronous>, transform_indices = @transform_8, window_bounds = array<i64: 64, 64>}, {pipeline_mode = #tpu.pipeline_mode<synchronous>, transform_indices = @transform_9, window_bounds = array<i64: 64, 1>}, {pipeline_mode = #tpu.pipeline_mode<synchronous>, transform_indices = @transform_10, window_bounds = array<i64: 64, 1>}, {transform_indices = @transform_11, window_bounds = array<i64: 2, 64, 256>}]} {
    %c0 = arith.constant 0 : index
    %c0_0 = arith.constant 0 : index
    %0 = vector.load %arg2[%c0, %c0_0] : memref<64x64xbf16, #tpu.memory_space<vmem>>, vector<64x64xbf16>
    %c0_1 = arith.constant 0 : index
    %c0_2 = arith.constant 0 : index
    %1 = vector.load %arg5[%c0_1, %c0_2] : memref<64x64xbf16, #tpu.memory_space<vmem>>, vector<64x64xbf16>
    %c0_3 = arith.constant 0 : index
    %c0_4 = arith.constant 0 : index
    %2 = vector.load %arg9[%c0_3, %c0_4] : memref<64x64xbf16, #tpu.memory_space<vmem>>, vector<64x64xbf16>
    %c0_5 = arith.constant 0 : index
    %c0_6 = arith.constant 0 : index
    %3 = vector.load %arg6[%c0_5, %c0_6] : memref<64x1xf32, #tpu.memory_space<vmem>>, vector<64x1xf32>
    %c0_7 = arith.constant 0 : index
    %c0_8 = arith.constant 0 : index
    %4 = vector.load %arg3[%c0_7, %c0_8] : memref<64x1xf32, #tpu.memory_space<vmem>>, vector<64x1xf32>
    %c0_9 = arith.constant 0 : index
    %c0_10 = arith.constant 0 : index
    %5 = vector.load %arg4[%c0_9, %c0_10] : memref<64x1xf32, #tpu.memory_space<vmem>>, vector<64x1xf32>
    %c0_11 = arith.constant 0 : index
    %c0_12 = arith.constant 0 : index
    %6 = vector.load %arg7[%c0_11, %c0_12] : memref<64x1xf32, #tpu.memory_space<vmem>>, vector<64x1xf32>
    %c0_13 = arith.constant 0 : index
    %c0_14 = arith.constant 0 : index
    %7 = vector.load %arg8[%c0_13, %c0_14] : memref<64x1xf32, #tpu.memory_space<vmem>>, vector<64x1xf32>
    %c0_15 = arith.constant 0 : index
    %c0_16 = arith.constant 0 : index
    %8 = vector.load %arg10[%c0_15, %c0_16] : memref<64x1xf32, #tpu.memory_space<vmem>>, vector<64x1xf32>
    %c0_17 = arith.constant 0 : index
    %c0_18 = arith.constant 0 : index
    %9 = vector.load %arg11[%c0_17, %c0_18] : memref<64x1xf32, #tpu.memory_space<vmem>>, vector<64x1xf32>
    %c0_19 = arith.constant 0 : index
    %c0_20 = arith.constant 0 : index
    %c0_21 = arith.constant 0 : index
    %10 = vector.load %arg1[%c0_19, %c0_20, %c0_21] : memref<2x64x256xbf16, #tpu.memory_space<vmem>>, vector<1x64x256xbf16>
    %11 = vector.shape_cast %10 : vector<1x64x256xbf16> to vector<64x256xbf16>
    %cst = arith.constant dense<0.000000e+00> : vector<64x256xf32>
    %12 = tpu.matmul %0, %11, %cst {dimension_numbers = #tpu.dot_dimension_numbers<[1], [0], [0], [1], [0, 0, 1, 1], [], []>} : vector<64x64xbf16>, vector<64x256xbf16>, vector<64x256xf32> -> vector<64x256xf32>
    %13 = vector.shape_cast %12 : vector<64x256xf32> to vector<1x64x256xf32>
    %cst_22 = arith.constant dense<0.000000e+00> : vector<1xf32>
    %14 = vector.multi_reduction <add>, %13, %cst_22 [1, 2] : vector<1x64x256xf32> to vector<1xf32>
    %15 = vector.shape_cast %14 : vector<1xf32> to vector<1x1x1xf32>
    %16 = vector.extract %15[0, 0, 0] : f32 from vector<1x1x1xf32>
    %17 = arith.mulf %12, %12 : vector<64x256xf32>
    %18 = vector.shape_cast %17 : vector<64x256xf32> to vector<1x64x256xf32>
    %cst_23 = arith.constant dense<0.000000e+00> : vector<1xf32>
    %19 = vector.multi_reduction <add>, %18, %cst_23 [1, 2] : vector<1x64x256xf32> to vector<1xf32>
    %20 = vector.shape_cast %19 : vector<1xf32> to vector<1x1x1xf32>
    %21 = vector.extract %20[0, 0, 0] : f32 from vector<1x1x1xf32>
    %cst_24 = arith.constant 1.638400e+04 : f32
    %22 = arith.divf %16, %cst_24 : f32
    %cst_25 = arith.constant 1.638400e+04 : f32
    %23 = arith.divf %21, %cst_25 : f32
    %24 = arith.mulf %22, %22 : f32
    %25 = arith.subf %23, %24 : f32
    %cst_26 = arith.constant 0.000000e+00 : f32
    %26 = arith.maximumf %25, %cst_26 : f32
    %cst_27 = arith.constant 9.99999974E-6 : f32
    %27 = arith.addf %26, %cst_27 : f32
    %28 = math.rsqrt %27 : f32
    %29 = vector.broadcast %28 : f32 to vector<64x1xf32>
    %30 = arith.mulf %4, %29 : vector<64x1xf32>
    %31 = vector.broadcast %30 : vector<64x1xf32> to vector<64x256xf32>
    %32 = arith.mulf %12, %31 : vector<64x256xf32>
    %33 = vector.broadcast %22 : f32 to vector<64x1xf32>
    %34 = arith.mulf %33, %30 : vector<64x1xf32>
    %35 = arith.subf %5, %34 : vector<64x1xf32>
    %36 = vector.broadcast %35 : vector<64x1xf32> to vector<64x256xf32>
    %37 = arith.addf %32, %36 : vector<64x256xf32>
    %cst_28 = arith.constant 0.000000e+00 : f32
    %38 = vector.broadcast %cst_28 : f32 to vector<64x256xf32>
    %39 = arith.maximumf %37, %38 : vector<64x256xf32>
    %cst_29 = arith.constant dense<0xFF800000> : vector<256xf32>
    %40 = vector.multi_reduction <maximumf>, %39, %cst_29 [0] : vector<64x256xf32> to vector<256xf32>
    %41 = vector.shape_cast %40 : vector<256xf32> to vector<1x256xf32>
    %42 = arith.truncf %39 : vector<64x256xf32> to vector<64x256xbf16>
    %cst_30 = arith.constant dense<0.000000e+00> : vector<64x256xf32>
    %43 = tpu.matmul %1, %42, %cst_30 {dimension_numbers = #tpu.dot_dimension_numbers<[1], [0], [0], [1], [0, 0, 1, 1], [], []>} : vector<64x64xbf16>, vector<64x256xbf16>, vector<64x256xf32> -> vector<64x256xf32>
    %44 = vector.broadcast %3 : vector<64x1xf32> to vector<64x256xf32>
    %45 = vector.broadcast %41 : vector<1x256xf32> to vector<64x256xf32>
    %46 = arith.mulf %44, %45 : vector<64x256xf32>
    %47 = arith.addf %43, %46 : vector<64x256xf32>
    %48 = vector.shape_cast %47 : vector<64x256xf32> to vector<1x64x256xf32>
    %cst_31 = arith.constant dense<0.000000e+00> : vector<1xf32>
    %49 = vector.multi_reduction <add>, %48, %cst_31 [1, 2] : vector<1x64x256xf32> to vector<1xf32>
    %50 = vector.shape_cast %49 : vector<1xf32> to vector<1x1x1xf32>
    %51 = vector.extract %50[0, 0, 0] : f32 from vector<1x1x1xf32>
    %52 = arith.mulf %47, %47 : vector<64x256xf32>
    %53 = vector.shape_cast %52 : vector<64x256xf32> to vector<1x64x256xf32>
    %cst_32 = arith.constant dense<0.000000e+00> : vector<1xf32>
    %54 = vector.multi_reduction <add>, %53, %cst_32 [1, 2] : vector<1x64x256xf32> to vector<1xf32>
    %55 = vector.shape_cast %54 : vector<1xf32> to vector<1x1x1xf32>
    %56 = vector.extract %55[0, 0, 0] : f32 from vector<1x1x1xf32>
    %cst_33 = arith.constant 1.638400e+04 : f32
    %57 = arith.divf %51, %cst_33 : f32
    %cst_34 = arith.constant 1.638400e+04 : f32
    %58 = arith.divf %56, %cst_34 : f32
    %59 = arith.mulf %57, %57 : f32
    %60 = arith.subf %58, %59 : f32
    %cst_35 = arith.constant 0.000000e+00 : f32
    %61 = arith.maximumf %60, %cst_35 : f32
    %cst_36 = arith.constant 9.99999974E-6 : f32
    %62 = arith.addf %61, %cst_36 : f32
    %63 = math.rsqrt %62 : f32
    %64 = vector.broadcast %63 : f32 to vector<64x1xf32>
    %65 = arith.mulf %6, %64 : vector<64x1xf32>
    %66 = vector.broadcast %65 : vector<64x1xf32> to vector<64x256xf32>
    %67 = arith.mulf %47, %66 : vector<64x256xf32>
    %68 = vector.broadcast %57 : f32 to vector<64x1xf32>
    %69 = arith.mulf %68, %65 : vector<64x1xf32>
    %70 = arith.subf %7, %69 : vector<64x1xf32>
    %71 = vector.broadcast %70 : vector<64x1xf32> to vector<64x256xf32>
    %72 = arith.addf %67, %71 : vector<64x256xf32>
    %cst_37 = arith.constant 0.000000e+00 : f32
    %73 = vector.broadcast %cst_37 : f32 to vector<64x256xf32>
    %74 = arith.maximumf %72, %73 : vector<64x256xf32>
    %75 = arith.truncf %74 : vector<64x256xf32> to vector<64x256xbf16>
    %cst_38 = arith.constant dense<0.000000e+00> : vector<64x256xf32>
    %76 = tpu.matmul %2, %75, %cst_38 {dimension_numbers = #tpu.dot_dimension_numbers<[1], [0], [0], [1], [0, 0, 1, 1], [], []>} : vector<64x64xbf16>, vector<64x256xbf16>, vector<64x256xf32> -> vector<64x256xf32>
    %77 = vector.shape_cast %76 : vector<64x256xf32> to vector<1x64x256xf32>
    %cst_39 = arith.constant dense<0.000000e+00> : vector<1xf32>
    %78 = vector.multi_reduction <add>, %77, %cst_39 [1, 2] : vector<1x64x256xf32> to vector<1xf32>
    %79 = vector.shape_cast %78 : vector<1xf32> to vector<1x1x1xf32>
    %80 = vector.extract %79[0, 0, 0] : f32 from vector<1x1x1xf32>
    %81 = arith.mulf %76, %76 : vector<64x256xf32>
    %82 = vector.shape_cast %81 : vector<64x256xf32> to vector<1x64x256xf32>
    %cst_40 = arith.constant dense<0.000000e+00> : vector<1xf32>
    %83 = vector.multi_reduction <add>, %82, %cst_40 [1, 2] : vector<1x64x256xf32> to vector<1xf32>
    %84 = vector.shape_cast %83 : vector<1xf32> to vector<1x1x1xf32>
    %85 = vector.extract %84[0, 0, 0] : f32 from vector<1x1x1xf32>
    %cst_41 = arith.constant 1.638400e+04 : f32
    %86 = arith.divf %80, %cst_41 : f32
    %cst_42 = arith.constant 1.638400e+04 : f32
    %87 = arith.divf %85, %cst_42 : f32
    %88 = arith.mulf %86, %86 : f32
    %89 = arith.subf %87, %88 : f32
    %cst_43 = arith.constant 0.000000e+00 : f32
    %90 = arith.maximumf %89, %cst_43 : f32
    %cst_44 = arith.constant 9.99999974E-6 : f32
    %91 = arith.addf %90, %cst_44 : f32
    %92 = math.rsqrt %91 : f32
    %93 = vector.broadcast %92 : f32 to vector<64x1xf32>
    %94 = arith.mulf %8, %93 : vector<64x1xf32>
    %c0_45 = arith.constant 0 : index
    %c0_46 = arith.constant 0 : index
    %c0_47 = arith.constant 0 : index
    %95 = vector.load %arg1[%c0_45, %c0_46, %c0_47] : memref<2x64x256xbf16, #tpu.memory_space<vmem>>, vector<1x64x256xbf16>
    %96 = vector.shape_cast %95 : vector<1x64x256xbf16> to vector<64x256xbf16>
    %97 = arith.extf %96 : vector<64x256xbf16> to vector<64x256xf32>
    %98 = vector.broadcast %94 : vector<64x1xf32> to vector<64x256xf32>
    %99 = arith.mulf %76, %98 : vector<64x256xf32>
    %100 = vector.broadcast %86 : f32 to vector<64x1xf32>
    %101 = arith.mulf %100, %94 : vector<64x1xf32>
    %102 = arith.subf %9, %101 : vector<64x1xf32>
    %103 = vector.broadcast %102 : vector<64x1xf32> to vector<64x256xf32>
    %104 = arith.addf %99, %103 : vector<64x256xf32>
    %105 = arith.addf %104, %97 : vector<64x256xf32>
    %cst_48 = arith.constant 0.000000e+00 : f32
    %106 = vector.broadcast %cst_48 : f32 to vector<64x256xf32>
    %107 = arith.maximumf %105, %106 : vector<64x256xf32>
    %c0_49 = arith.constant 0 : index
    %c0_50 = arith.constant 0 : index
    %c0_51 = arith.constant 0 : index
    %108 = vector.load %arg12[%c0_49, %c0_50, %c0_51] : memref<2x64x256xf32, #tpu.memory_space<vmem>>, vector<1x64x256xf32>
    %109 = vector.shape_cast %108 : vector<1x64x256xf32> to vector<64x256xf32>
    %110 = vector.shape_cast %107 : vector<64x256xf32> to vector<1x64x256xf32>
    tpu.vector_store %arg12[%c0_49, %c0_50, %c0_51], %110 {strides = array<i32>} : memref<2x64x256xf32, #tpu.memory_space<vmem>>, vector<1x64x256xf32>,
    %c1 = arith.constant 1 : index
    %c0_52 = arith.constant 0 : index
    %c0_53 = arith.constant 0 : index
    %111 = vector.load %arg1[%c1, %c0_52, %c0_53] : memref<2x64x256xbf16, #tpu.memory_space<vmem>>, vector<1x64x256xbf16>
    %112 = vector.shape_cast %111 : vector<1x64x256xbf16> to vector<64x256xbf16>
    %cst_54 = arith.constant dense<0.000000e+00> : vector<64x256xf32>
    %113 = tpu.matmul %0, %112, %cst_54 {dimension_numbers = #tpu.dot_dimension_numbers<[1], [0], [0], [1], [0, 0, 1, 1], [], []>} : vector<64x64xbf16>, vector<64x256xbf16>, vector<64x256xf32> -> vector<64x256xf32>
    %114 = vector.shape_cast %113 : vector<64x256xf32> to vector<1x64x256xf32>
    %cst_55 = arith.constant dense<0.000000e+00> : vector<1xf32>
    %115 = vector.multi_reduction <add>, %114, %cst_55 [1, 2] : vector<1x64x256xf32> to vector<1xf32>
    %116 = vector.shape_cast %115 : vector<1xf32> to vector<1x1x1xf32>
    %117 = vector.extract %116[0, 0, 0] : f32 from vector<1x1x1xf32>
    %118 = arith.mulf %113, %113 : vector<64x256xf32>
    %119 = vector.shape_cast %118 : vector<64x256xf32> to vector<1x64x256xf32>
    %cst_56 = arith.constant dense<0.000000e+00> : vector<1xf32>
    %120 = vector.multi_reduction <add>, %119, %cst_56 [1, 2] : vector<1x64x256xf32> to vector<1xf32>
    %121 = vector.shape_cast %120 : vector<1xf32> to vector<1x1x1xf32>
    %122 = vector.extract %121[0, 0, 0] : f32 from vector<1x1x1xf32>
    %cst_57 = arith.constant 1.638400e+04 : f32
    %123 = arith.divf %117, %cst_57 : f32
    %cst_58 = arith.constant 1.638400e+04 : f32
    %124 = arith.divf %122, %cst_58 : f32
    %125 = arith.mulf %123, %123 : f32
    %126 = arith.subf %124, %125 : f32
    %cst_59 = arith.constant 0.000000e+00 : f32
    %127 = arith.maximumf %126, %cst_59 : f32
    %cst_60 = arith.constant 9.99999974E-6 : f32
    %128 = arith.addf %127, %cst_60 : f32
    %129 = math.rsqrt %128 : f32
    %130 = vector.broadcast %129 : f32 to vector<64x1xf32>
    %131 = arith.mulf %4, %130 : vector<64x1xf32>
    %132 = vector.broadcast %131 : vector<64x1xf32> to vector<64x256xf32>
    %133 = arith.mulf %113, %132 : vector<64x256xf32>
    %134 = vector.broadcast %123 : f32 to vector<64x1xf32>
    %135 = arith.mulf %134, %131 : vector<64x1xf32>
    %136 = arith.subf %5, %135 : vector<64x1xf32>
    %137 = vector.broadcast %136 : vector<64x1xf32> to vector<64x256xf32>
    %138 = arith.addf %133, %137 : vector<64x256xf32>
    %cst_61 = arith.constant 0.000000e+00 : f32
    %139 = vector.broadcast %cst_61 : f32 to vector<64x256xf32>
    %140 = arith.maximumf %138, %139 : vector<64x256xf32>
    %cst_62 = arith.constant dense<0xFF800000> : vector<256xf32>
    %141 = vector.multi_reduction <maximumf>, %140, %cst_62 [0] : vector<64x256xf32> to vector<256xf32>
    %142 = vector.shape_cast %141 : vector<256xf32> to vector<1x256xf32>
    %143 = arith.truncf %140 : vector<64x256xf32> to vector<64x256xbf16>
    %cst_63 = arith.constant dense<0.000000e+00> : vector<64x256xf32>
    %144 = tpu.matmul %1, %143, %cst_63 {dimension_numbers = #tpu.dot_dimension_numbers<[1], [0], [0], [1], [0, 0, 1, 1], [], []>} : vector<64x64xbf16>, vector<64x256xbf16>, vector<64x256xf32> -> vector<64x256xf32>
    %145 = vector.broadcast %3 : vector<64x1xf32> to vector<64x256xf32>
    %146 = vector.broadcast %142 : vector<1x256xf32> to vector<64x256xf32>
    %147 = arith.mulf %145, %146 : vector<64x256xf32>
    %148 = arith.addf %144, %147 : vector<64x256xf32>
    %149 = vector.shape_cast %148 : vector<64x256xf32> to vector<1x64x256xf32>
    %cst_64 = arith.constant dense<0.000000e+00> : vector<1xf32>
    %150 = vector.multi_reduction <add>, %149, %cst_64 [1, 2] : vector<1x64x256xf32> to vector<1xf32>
    %151 = vector.shape_cast %150 : vector<1xf32> to vector<1x1x1xf32>
    %152 = vector.extract %151[0, 0, 0] : f32 from vector<1x1x1xf32>
    %153 = arith.mulf %148, %148 : vector<64x256xf32>
    %154 = vector.shape_cast %153 : vector<64x256xf32> to vector<1x64x256xf32>
    %cst_65 = arith.constant dense<0.000000e+00> : vector<1xf32>
    %155 = vector.multi_reduction <add>, %154, %cst_65 [1, 2] : vector<1x64x256xf32> to vector<1xf32>
    %156 = vector.shape_cast %155 : vector<1xf32> to vector<1x1x1xf32>
    %157 = vector.extract %156[0, 0, 0] : f32 from vector<1x1x1xf32>
    %cst_66 = arith.constant 1.638400e+04 : f32
    %158 = arith.divf %152, %cst_66 : f32
    %cst_67 = arith.constant 1.638400e+04 : f32
    %159 = arith.divf %157, %cst_67 : f32
    %160 = arith.mulf %158, %158 : f32
    %161 = arith.subf %159, %160 : f32
    %cst_68 = arith.constant 0.000000e+00 : f32
    %162 = arith.maximumf %161, %cst_68 : f32
    %cst_69 = arith.constant 9.99999974E-6 : f32
    %163 = arith.addf %162, %cst_69 : f32
    %164 = math.rsqrt %163 : f32
    %165 = vector.broadcast %164 : f32 to vector<64x1xf32>
    %166 = arith.mulf %6, %165 : vector<64x1xf32>
    %167 = vector.broadcast %166 : vector<64x1xf32> to vector<64x256xf32>
    %168 = arith.mulf %148, %167 : vector<64x256xf32>
    %169 = vector.broadcast %158 : f32 to vector<64x1xf32>
    %170 = arith.mulf %169, %166 : vector<64x1xf32>
    %171 = arith.subf %7, %170 : vector<64x1xf32>
    %172 = vector.broadcast %171 : vector<64x1xf32> to vector<64x256xf32>
    %173 = arith.addf %168, %172 : vector<64x256xf32>
    %cst_70 = arith.constant 0.000000e+00 : f32
    %174 = vector.broadcast %cst_70 : f32 to vector<64x256xf32>
    %175 = arith.maximumf %173, %174 : vector<64x256xf32>
    %176 = arith.truncf %175 : vector<64x256xf32> to vector<64x256xbf16>
    %cst_71 = arith.constant dense<0.000000e+00> : vector<64x256xf32>
    %177 = tpu.matmul %2, %176, %cst_71 {dimension_numbers = #tpu.dot_dimension_numbers<[1], [0], [0], [1], [0, 0, 1, 1], [], []>} : vector<64x64xbf16>, vector<64x256xbf16>, vector<64x256xf32> -> vector<64x256xf32>
    %178 = vector.shape_cast %177 : vector<64x256xf32> to vector<1x64x256xf32>
    %cst_72 = arith.constant dense<0.000000e+00> : vector<1xf32>
    %179 = vector.multi_reduction <add>, %178, %cst_72 [1, 2] : vector<1x64x256xf32> to vector<1xf32>
    %180 = vector.shape_cast %179 : vector<1xf32> to vector<1x1x1xf32>
    %181 = vector.extract %180[0, 0, 0] : f32 from vector<1x1x1xf32>
    %182 = arith.mulf %177, %177 : vector<64x256xf32>
    %183 = vector.shape_cast %182 : vector<64x256xf32> to vector<1x64x256xf32>
    %cst_73 = arith.constant dense<0.000000e+00> : vector<1xf32>
    %184 = vector.multi_reduction <add>, %183, %cst_73 [1, 2] : vector<1x64x256xf32> to vector<1xf32>
    %185 = vector.shape_cast %184 : vector<1xf32> to vector<1x1x1xf32>
    %186 = vector.extract %185[0, 0, 0] : f32 from vector<1x1x1xf32>
    %cst_74 = arith.constant 1.638400e+04 : f32
    %187 = arith.divf %181, %cst_74 : f32
    %cst_75 = arith.constant 1.638400e+04 : f32
    %188 = arith.divf %186, %cst_75 : f32
    %189 = arith.mulf %187, %187 : f32
    %190 = arith.subf %188, %189 : f32
    %cst_76 = arith.constant 0.000000e+00 : f32
    %191 = arith.maximumf %190, %cst_76 : f32
    %cst_77 = arith.constant 9.99999974E-6 : f32
    %192 = arith.addf %191, %cst_77 : f32
    %193 = math.rsqrt %192 : f32
    %194 = vector.broadcast %193 : f32 to vector<64x1xf32>
    %195 = arith.mulf %8, %194 : vector<64x1xf32>
    %c1_78 = arith.constant 1 : index
    %c0_79 = arith.constant 0 : index
    %c0_80 = arith.constant 0 : index
    %196 = vector.load %arg1[%c1_78, %c0_79, %c0_80] : memref<2x64x256xbf16, #tpu.memory_space<vmem>>, vector<1x64x256xbf16>
    %197 = vector.shape_cast %196 : vector<1x64x256xbf16> to vector<64x256xbf16>
    %198 = arith.extf %197 : vector<64x256xbf16> to vector<64x256xf32>
    %199 = vector.broadcast %195 : vector<64x1xf32> to vector<64x256xf32>
    %200 = arith.mulf %177, %199 : vector<64x256xf32>
    %201 = vector.broadcast %187 : f32 to vector<64x1xf32>
    %202 = arith.mulf %201, %195 : vector<64x1xf32>
    %203 = arith.subf %9, %202 : vector<64x1xf32>
    %204 = vector.broadcast %203 : vector<64x1xf32> to vector<64x256xf32>
    %205 = arith.addf %200, %204 : vector<64x256xf32>
    %206 = arith.addf %205, %198 : vector<64x256xf32>
    %cst_81 = arith.constant 0.000000e+00 : f32
    %207 = vector.broadcast %cst_81 : f32 to vector<64x256xf32>
    %208 = arith.maximumf %206, %207 : vector<64x256xf32>
    %c1_82 = arith.constant 1 : index
    %c0_83 = arith.constant 0 : index
    %c0_84 = arith.constant 0 : index
    %209 = vector.load %arg12[%c1_82, %c0_83, %c0_84] : memref<2x64x256xf32, #tpu.memory_space<vmem>>, vector<1x64x256xf32>
    %210 = vector.shape_cast %209 : vector<1x64x256xf32> to vector<64x256xf32>
    %211 = vector.shape_cast %208 : vector<64x256xf32> to vector<1x64x256xf32>
    tpu.vector_store %arg12[%c1_82, %c0_83, %c0_84], %211 {strides = array<i32>} : memref<2x64x256xf32, #tpu.memory_space<vmem>>, vector<1x64x256xf32>,
    return
  }
  func.func @transform_0(%arg0: i32) -> (i32, i32, i32) {
    %c0_i32 = arith.constant 0 : i32
    %c0_i32_0 = arith.constant 0 : i32
    %c0_i32_1 = arith.constant 0 : i32
    return %arg0, %c0_i32, %c0_i32_0 : i32, i32, i32
  }
  func.func @transform_1(%arg0: i32) -> (i32, i32) {
    %c0_i32 = arith.constant 0 : i32
    %c0_i32_0 = arith.constant 0 : i32
    %c0_i32_1 = arith.constant 0 : i32
    return %c0_i32, %c0_i32_0 : i32, i32
  }
  func.func @transform_2(%arg0: i32) -> (i32, i32) {
    %c0_i32 = arith.constant 0 : i32
    %c0_i32_0 = arith.constant 0 : i32
    %c0_i32_1 = arith.constant 0 : i32
    return %c0_i32, %c0_i32_0 : i32, i32
  }
  func.func @transform_3(%arg0: i32) -> (i32, i32) {
    %c0_i32 = arith.constant 0 : i32
    %c0_i32_0 = arith.constant 0 : i32
    %c0_i32_1 = arith.constant 0 : i32
    return %c0_i32, %c0_i32_0 : i32, i32
  }
  func.func @transform_4(%arg0: i32) -> (i32, i32) {
    %c0_i32 = arith.constant 0 : i32
    %c0_i32_0 = arith.constant 0 : i32
    %c0_i32_1 = arith.constant 0 : i32
    return %c0_i32, %c0_i32_0 : i32, i32
  }
  func.func @transform_5(%arg0: i32) -> (i32, i32) {
    %c0_i32 = arith.constant 0 : i32
    %c0_i32_0 = arith.constant 0 : i32
    %c0_i32_1 = arith.constant 0 : i32
    return %c0_i32, %c0_i32_0 : i32, i32
  }
  func.func @transform_6(%arg0: i32) -> (i32, i32) {
    %c0_i32 = arith.constant 0 : i32
    %c0_i32_0 = arith.constant 0 : i32
    %c0_i32_1 = arith.constant 0 : i32
    return %c0_i32, %c0_i32_0 : i32, i32
  }
  func.func @transform_7(%arg0: i32) -> (i32, i32) {
    %c0_i32 = arith.constant 0 : i32
    %c0_i32_0 = arith.constant 0 : i32
    %c0_i32_1 = arith.constant 0 : i32
    return %c0_i32, %c0_i32_0 : i32, i32
  }
  func.func @transform_8(%arg0: i32) -> (i32, i32) {
    %c0_i32 = arith.constant 0 : i32
    %c0_i32_0 = arith.constant 0 : i32
    %c0_i32_1 = arith.constant 0 : i32
    return %c0_i32, %c0_i32_0 : i32, i32
  }
  func.func @transform_9(%arg0: i32) -> (i32, i32) {
    %c0_i32 = arith.constant 0 : i32
    %c0_i32_0 = arith.constant 0 : i32
    %c0_i32_1 = arith.constant 0 : i32
    return %c0_i32, %c0_i32_0 : i32, i32
  }
  func.func @transform_10(%arg0: i32) -> (i32, i32) {
    %c0_i32 = arith.constant 0 : i32
    %c0_i32_0 = arith.constant 0 : i32
    %c0_i32_1 = arith.constant 0 : i32
    return %c0_i32, %c0_i32_0 : i32, i32
  }
  func.func @transform_11(%arg0: i32) -> (i32, i32, i32) {
    %c0_i32 = arith.constant 0 : i32
    %c0_i32_0 = arith.constant 0 : i32
    %c0_i32_1 = arith.constant 0 : i32
    return %arg0, %c0_i32, %c0_i32_0 : i32, i32, i32
  }
}

</mosaic_0001>

<bundles_post_ra>
// kernel: conv1d_aggre_block.1
= control target key start
LH: loop header
LB: loop body
LE: loop exit
PB: predicated region body
PF: predicated region fallthrough
CT: control target
= control target key end

     0   :  { %s4680_s0 = inlined_call_operand.vmem [shape: bf16[8,64,256], index: 0, kind: input, shape index: {}]   ;;  %s4681_s1 = inlined_call_operand.vmem [shape: bf16[64,64], index: 1, kind: input, shape index: {}]   ;;  %s4682_s2 = inlined_call_operand.vmem [shape: f32[64,1], index: 2, kind: input, shape index: {}]   ;;  %s4683_s3 = inlined_call_operand.vmem [shape: f32[64,1], index: 3, kind: input, shape index: {}]   ;;  %s4684_s4 = inlined_call_operand.vmem [shape: bf16[64,64], index: 4, kind: input, shape index: {}]   ;;  %s4685_s5 = inlined_call_operand.vmem [shape: f32[64,1], index: 5, kind: input, shape index: {}]   ;;  %s4686_s6 = inlined_call_operand.vmem [shape: f32[64,1], index: 6, kind: input, shape index: {}]   ;;  %s4687_s7 = inlined_call_operand.vmem [shape: f32[64,1], index: 7, kind: input, shape index: {}]   ;;  %s4688_s8 = inlined_call_operand.vmem [shape: bf16[64,64], index: 8, kind: input, shape index: {}]   ;;  %s4689_s9 = inlined_call_operand.vmem [shape: f32[64,1], index: 9, kind: input, shape index: {}]   ;;  %s4690_s10 = inlined_call_operand.vmem [shape: f32[64,1], index: 10, kind: input, shape index: {}]   ;;  %s4691_s11 = inlined_call_operand.hbm [shape: f32[8,64,256], index: 11, kind: output, shape index: {}]  }
   0x1   :  { %4720 = sst [smem:[#allocation28_spill]] %s4680_s0 }
   0x2   :  { %4721 = sst [smem:[#allocation29_spill]] %s4681_s1 }
   0x3   :  { %16 = vsyncpa [#allocation3], 0 }
   0x4   :  { %18 = vsyncpa [#allocation3 + $0x1], 0  ;;  %s3227_s17 = smov 0   ;;  %s3229_s18 = smov 0  }
   0x5   :  { %s3231_s19 = smov 0   ;;  %s3233_s20 = smov 0  }
   0x6 LB: > { %4722 = sst [smem:[#allocation5_spill]] %s3156_s19  ;;  %s3248_s21 = sadd.s32 4294967295, %s3160_s20   ;;  %s3160_s20 = sphi %s3233_s20, %s4778_s20   ;;  %s3156_s19 = sphi %s3231_s19, %s4780_s19   ;;  %s3152_s18 = sphi %s3229_s18, %s4782_s18   ;;  %s3148_s17 = sphi %s3227_s17, %s4781_s17  }
   0x7   : > { %s2820_s22 = sadd.s32 4294967294, %s3160_s20   ;;  %s3252_s23 = sadd.s32 1, %s3160_s20  }
   0x8   : > { %4723 = sst [smem:[#allocation6_spill]] %s3252_s23  ;;  %s267_s24 = sadd.s32 1, %s3156_s19 }
   0x9   : > { %s264_s25 = ssub.s32 %s3160_s20, %s3252_s23  ;;  %p277_p0 = scmp.ne.s32.totalorder %s3156_s19, %s3152_s18 }
   0xa   : > { %p265_p1 = scmp.eq.s32.totalorder %s264_s25, 0  ;;  %p278_p2 = scmp.eq.s32.totalorder %s3248_s21, 3 }
   0xb   : > { %p283_p3 = scmp.ne.s32.totalorder %s3152_s18, %s3148_s17  ;;  %p284_p4 = scmp.eq.s32.totalorder %s2820_s22, 3 }
   0xc   : > { %s3263_s26 = scalar_select %p265_p1, %s3156_s19, %s267_s24  }
   0xd   : > { %p3265_p5 = por %p278_p2, %p277_p0  ;;  %p3269_p6 = por %p284_p4, %p283_p3 }
   0xe   : > { %4724 = sst [smem:[#allocation7_spill]] %s3263_s26  ;;  %p2823_p7 = scmp.ge.s32.totalorder %s3160_s20, 1 }
   0xf   : > { %p342_p8 = scmp.lt.s32.totalorder %s3160_s20, 5 }
  0x11   : > { %p343_p9 = pnand %p2823_p7, %p342_p8 }
  0x13   : > { %346 = sbr.rel (%p343_p9) target bundleno = 3499 (0xdab), region = 64 }
  0x18   : > { %s2825_s29 = sshll.u32 %s3248_s21, 1  ;;  %v4697_v0 = vmov 0   ;;  %s4727_s0 = sld [smem:[#allocation28_spill]]  ;;  %vm540_vm0 = vcmask 523264  }
  0x19   : > { %p384_p10 = scmp.lt.s32.totalorder %s2825_s29, 7  ;;  %585 = vmatprep.mubr.bf16.mxu0 %v4697_v0  ;;  %2992 = vset.pattern.permute.xlu1 %v4697_v0  ;;  %s4728_s1 = sld [smem:[#allocation29_spill]] }
  0x1a   : > { %2993 = vset.pattern.permute.xlu0 %v4697_v0  ;;  %1011 = vmatprep.mubr.bf16.mxu1 %v4697_v0 }
  0x1b   : > { %s4784_s29 = smov (!%p384_p10, %s2825_s29), 7 }
  0x1c   : > { %s2910_s30 = sshll.u32 %s4784_s29, 6  ;;  %s4695_s29 = smov 0.0  }
  0x1e   : > { %s3283_s14 = scalar_lea.vmem %s4727_s0, %s2910_s30 }
  0x1f   : > { %v478_v1 = vld [vmem:[%s3283_s14 + $0x30] sm:$0xff]  ;;  %v479_v2 = vld [vmem:[%s3283_s14 + $0x38] sm:$0xff]  ;;  %v476_v3 = vld [vmem:[%s3283_s14 + $0x20] sm:$0xff] }
  0x20   : > { %v2839_v4 = vcombine.high %v478_v1, %v479_v2  ;;  %v2838_v5 = vcombine.low %v478_v1, %v479_v2  ;;  %v477_v6 = vld [vmem:[%s3283_s14 + $0x28] sm:$0xff]  ;;  %v474_v8 = vld [vmem:[%s3283_s14 + $0x10] sm:$0xff]  ;;  %v475_v9 = vld [vmem:[%s3283_s14 + $0x18] sm:$0xff] }
  0x21   : > { %v2837_v7 = vcombine.high %v476_v3, %v477_v6  ;;  %v2836_v10 = vcombine.low %v476_v3, %v477_v6  ;;  %v2835_v11 = vcombine.high %v474_v8, %v475_v9  ;;  %v472_v12 = vld [vmem:[%s3283_s14] sm:$0xff]  ;;  %v473_v13 = vld [vmem:[%s3283_s14 + $0x8] sm:$0xff]  ;;  %v2834_v14 = vcombine.low %v474_v8, %v475_v9  ;;  %v3306_v19 = vld [vmem:[%s4728_s1 + $0x10] sm:$0xff]  }
  0x22   : > { %561 = vmatprep.subr.bf16.mxu0 %v2839_v4  ;;  %v2833_v15 = vcombine.high %v472_v12, %v473_v13  ;;  %v2832_v16 = vcombine.low %v472_v12, %v473_v13  ;;  %v3002_v17 = vld [vmem:[%s4728_s1] sm:$0xff]   ;;  %v3003_v18 = vld [vmem:[%s4728_s1 + $0x8] sm:$0xff]   ;;  %v3314_v20 = vld [vmem:[%s4728_s1 + $0x18] sm:$0xff]  }
  0x23   : > { %562 = vmatpush1.bf16.msra.mxu0 %v2838_v5 }
  0x24   : > { %563 = vmatprep.subr.bf16.mxu0 %v2837_v7 }
  0x27   : > { %564 = vmatpush1.bf16.msra.mxu0 %v2836_v10 }
  0x28   : > { %565 = vmatprep.subr.bf16.mxu0 %v2835_v11 }
  0x2b   : > { %566 = vmatpush1.bf16.msra.mxu0 %v2834_v14 }
  0x2c   : > { %567 = vmatprep.subr.bf16.mxu0 %v2833_v15 }
  0x2f   : > { %568 = vmatpush1.bf16.msra.mxu0 %v2832_v16 }
  0x32   : > { %2840 = vmatmul.mubr.msk.bf16.vlgmr.msra.gmra.mxu0 %vm540_vm0, %v3002_v17 }
  0x33   : > { %595 = vmatprep.mubr.bf16.mxu0 %v4697_v0 }
  0x3a   : > { %2841 = vmatmul.mubr.msk.bf16.gmra.mxu0 %vm540_vm0, %v3003_v18 }
  0x3b   : > { %605 = vmatprep.mubr.bf16.mxu0 %v4697_v0 }
  0x42   : > { %2842 = vmatmul.mubr.msk.bf16.gmra.mxu0 %vm540_vm0, %v3306_v19 }
  0x43   : > { %615 = vmatprep.mubr.bf16.mxu0 %v4697_v0 }
  0x4a   : > { %2843 = vmatmul.mubr.msk.bf16.gmra.mxu0 %vm540_vm0, %v3314_v20 }
  0x4b   : > { %1355 = vmatprep.mubr.bf16.mxu0 %v4697_v0 }
  0xf2   : > { %v3319_v21 = vpop.f32.mrf.mxu0 }
  0xf3   : > { %v650_v23 = vmul.f32 %v3319_v21, %v3319_v21 }
  0xf4   : > { %v3321_v22 = vpop.f32.mrf.mxu0 }
  0xf5   : > { %v626_v24 = vadd.f32 %v3321_v22, %v3319_v21  ;;  %v651_v25 = vmul.f32 %v3321_v22, %v3321_v22 }
  0xf6   : > { %v3329_v26 = vpop.f32.mrf.mxu0 }
  0xf7   : > { %v666_v27 = vadd.f32 %v651_v25, %v650_v23  ;;  %v627_v28 = vadd.f32 %v626_v24, %v3329_v26  ;;  %v652_v29 = vmul.f32 %v3329_v26, %v3329_v26 }
  0xf8   : > { %v3334_v30 = vpop.f32.mrf.mxu0 }
  0xf9   : > { %v667_v31 = vadd.f32 %v666_v27, %v652_v29  ;;  %v628_v32 = vadd.f32 %v627_v28, %v3334_v30  ;;  %v653_v33 = vmul.f32 %v3334_v30, %v3334_v30 }
  0xfa   : > { %v3339_v34 = vpop.f32.mrf.mxu0 }
  0xfb   : > { %v668_v35 = vadd.f32 %v667_v31, %v653_v33  ;;  %v629_v36 = vadd.f32 %v628_v32, %v3339_v34  ;;  %v654_v37 = vmul.f32 %v3339_v34, %v3339_v34 }
  0xfc   : > { %v3344_v38 = vpop.f32.mrf.mxu0 }
  0xfd   : > { %v669_v39 = vadd.f32 %v668_v35, %v654_v37  ;;  %v630_v40 = vadd.f32 %v629_v36, %v3344_v38  ;;  %v655_v41 = vmul.f32 %v3344_v38, %v3344_v38 }
  0xfe   : > { %v3349_v42 = vpop.f32.mrf.mxu0 }
  0xff   : > { %v670_v43 = vadd.f32 %v669_v39, %v655_v41  ;;  %v631_v44 = vadd.f32 %v630_v40, %v3349_v42  ;;  %v656_v45 = vmul.f32 %v3349_v42, %v3349_v42 }
 0x100   : > { %v3354_v46 = vpop.f32.mrf.mxu0 }
 0x101   : > { %v671_v47 = vadd.f32 %v670_v43, %v656_v45  ;;  %v632_v48 = vadd.f32 %v631_v44, %v3354_v46  ;;  %v657_v49 = vmul.f32 %v3354_v46, %v3354_v46  ;;  %v430_v45 = vld [vmem:[%s4682_s2 + $0x30] sm:$0xff] }
 0x102   : > { %v3359_v50 = vpop.f32.mrf.mxu0 }
 0x103   : > { %v672_v51 = vadd.f32 %v671_v47, %v657_v49  ;;  %v633_v52 = vadd.f32 %v632_v48, %v3359_v50  ;;  %v658_v53 = vmul.f32 %v3359_v50, %v3359_v50  ;;  %v424_v47 = vld [vmem:[%s4682_s2] sm:$0xff] }
 0x104   : > { %v3364_v54 = vpop.f32.mrf.mxu0 }
 0x105   : > { %v673_v55 = vadd.f32 %v672_v51, %v658_v53  ;;  %v634_v56 = vadd.f32 %v633_v52, %v3364_v54  ;;  %v659_v57 = vmul.f32 %v3364_v54, %v3364_v54  ;;  %v431_v53 = vld [vmem:[%s4682_s2 + $0x38] sm:$0xff] }
 0x106   : > { %v3369_v58 = vpop.f32.mrf.mxu0 }
 0x107   : > { %v674_v59 = vadd.f32 %v673_v55, %v659_v57  ;;  %v635_v60 = vadd.f32 %v634_v56, %v3369_v58  ;;  %v660_v61 = vmul.f32 %v3369_v58, %v3369_v58  ;;  %v438_v55 = vld [vmem:[%s4683_s3 + $0x30] sm:$0xff] }
 0x108   : > { %v3374_v62 = vpop.f32.mrf.mxu0 }
 0x109   : > { %v675_v63 = vadd.f32 %v674_v59, %v660_v61  ;;  %v636_v1 = vadd.f32 %v635_v60, %v3374_v62  ;;  %v661_v2 = vmul.f32 %v3374_v62, %v3374_v62  ;;  %v428_v61 = vld [vmem:[%s4682_s2 + $0x20] sm:$0xff] }
 0x10a   : > { %v3379_v3 = vpop.f32.mrf.mxu0 }
 0x10b   : > { %v676_v4 = vadd.f32 %v675_v63, %v661_v2  ;;  %v637_v5 = vadd.f32 %v636_v1, %v3379_v3  ;;  %v662_v6 = vmul.f32 %v3379_v3, %v3379_v3  ;;  %v432_v63 = vld [vmem:[%s4683_s3] sm:$0xff] }
 0x10c   : > { %v3384_v7 = vpop.f32.mrf.mxu0 }
 0x10d   : > { %v677_v8 = vadd.f32 %v676_v4, %v662_v6  ;;  %v638_v9 = vadd.f32 %v637_v5, %v3384_v7  ;;  %v663_v10 = vmul.f32 %v3384_v7, %v3384_v7  ;;  %v429_v4 = vld [vmem:[%s4682_s2 + $0x28] sm:$0xff]  ;;  %v416_v5 = vld [vmem:[%s4685_s5] sm:$0xff] }
 0x10e   : > { %v3389_v11 = vpop.f32.mrf.mxu0 }
 0x10f   : > { %v664_v12 = vmul.f32 %v3389_v11, %v3389_v11  ;;  %v639_v13 = vadd.f32 %v638_v9, %v3389_v11  ;;  %v678_v14 = vadd.f32 %v677_v8, %v663_v10  ;;  %v426_v8 = vld [vmem:[%s4682_s2 + $0x10] sm:$0xff] }
 0x110   : > { %v3394_v15 = vpop.f32.mrf.mxu0  ;;  %v418_v9 = vld [vmem:[%s4685_s5 + $0x10] sm:$0xff] }
 0x111   : > { %v640_v16 = vadd.f32 %v639_v13, %v3394_v15  ;;  %v665_v17 = vmul.f32 %v3394_v15, %v3394_v15  ;;  %v679_v18 = vadd.f32 %v678_v14, %v664_v12  ;;  %v427_v12 = vld [vmem:[%s4682_s2 + $0x18] sm:$0xff]  ;;  %v420_v13 = vld [vmem:[%s4685_s5 + $0x20] sm:$0xff] }
 0x113   : > { %641 = vadd.xlane.f32.xlu0 %v640_v16  ;;  %v680_v23 = vadd.f32 %v679_v18, %v665_v17  ;;  %v422_v16 = vld [vmem:[%s4685_s5 + $0x30] sm:$0xff]  ;;  %v425_v17 = vld [vmem:[%s4682_s2 + $0x8] sm:$0xff] }
 0x117   : > { %681 = vadd.xlane.f32.xlu0 %v680_v23 }
 0x19c   : > { %v642_v24 = vpop.xlane.xlu0 %641 }
 0x19d   : > { %v643_v25 = vrot.slane %v642_v24, 4 }
 0x19f   : > { %v644_v27 = vadd.f32 %v643_v25, %v642_v24  ;;  %v439_v24 = vld [vmem:[%s4683_s3 + $0x38] sm:$0xff] }
 0x1a0   : > { %v682_v28 = vpop.xlane.xlu0 %681 }
 0x1a1   : > { %v683_v29 = vrot.slane %v682_v28, 4  ;;  %v645_v31 = vrot.slane %v644_v27, 2 }
 0x1a3   : > { %v684_v32 = vadd.f32 %v683_v29, %v682_v28  ;;  %v646_v33 = vadd.f32 %v645_v31, %v644_v27  ;;  %v436_v28 = vld [vmem:[%s4683_s3 + $0x20] sm:$0xff] }
 0x1a5   : > { %v647_v35 = vrot.slane %v646_v33, 1  ;;  %v685_v36 = vrot.slane %v684_v32, 2 }
 0x1a7   : > { %v648_v37 = vadd.f32 %v647_v35, %v646_v33  ;;  %v686_v39 = vadd.f32 %v685_v36, %v684_v32  ;;  %v437_v32 = vld [vmem:[%s4683_s3 + $0x28] sm:$0xff]  ;;  %v434_v36 = vld [vmem:[%s4683_s3 + $0x10] sm:$0xff] }
 0x1a9   : > { %2913 = vpush %v648_v37  ;;  %v687_v40 = vrot.slane %v686_v39, 1 }
 0x1ab   : > { %v688_v41 = vadd.f32 %v687_v40, %v686_v39  ;;  %v435_v40 = vld [vmem:[%s4683_s3 + $0x18] sm:$0xff] }
 0x1ad   : > { %2915 = vpush %v688_v41 }
 0x1da   : > { %s2914_s13 = spop %2913 }
 0x1db   : > { %s692_s15 = smul.f32 6.1035156e-05, %s2914_s13 }
 0x1dd   : > { %s696_s16 = smul.f32 %s692_s15, %s692_s15  ;;  %v768_v52 = vstv %s692_s15 }
 0x1de   : > { %s2916_s22 = spop %2915 }
 0x1df   : > { %s695_s24 = smul.f32 6.1035156e-05, %s2916_s22 }
 0x1e1   : > { %s697_s25 = ssub.f32 %s695_s24, %s696_s16 }
 0x1e3   : > { %s698_s30 = smax.f32 %s4695_s29, %s697_s25 }
 0x1e4   : > { %s699_s12 = sadd.f32 1e-05, %s698_s30 }
 0x1e6   : > { %v700_v43 = vstv %s699_s12 }
 0x1e7   : > { %3022 = vrsqrt.f32 %v700_v43 }
 0x1f4   : > { %v3023_v44 = vpop.eup %3022 }
 0x1f5   : > { %2917 = vpush %v3023_v44  ;;  %v433_v44 = vld [vmem:[%s4683_s3 + $0x8] sm:$0xff] }
 0x226   : > { %s2918_s13 = spop %2917 }
 0x227   : > { %v703_v48 = vstv %s2918_s13 }
 0x228   : > { %v710_v49 = vmul.f32 %v703_v48, %v430_v45  ;;  %v704_v51 = vmul.f32 %v703_v48, %v424_v47  ;;  %v711_v57 = vmul.f32 %v703_v48, %v431_v53  ;;  %v708_v1 = vmul.f32 %v703_v48, %v428_v61  ;;  %v417_v47 = vld [vmem:[%s4685_s5 + $0x8] sm:$0xff] }
 0x229   : > { %v709_v6 = vmul.f32 %v703_v48, %v429_v4  ;;  %v706_v10 = vmul.f32 %v703_v48, %v426_v8  ;;  %v707_v14 = vmul.f32 %v703_v48, %v427_v12  ;;  %v705_v18 = vmul.f32 %v703_v48, %v425_v17  ;;  %v419_v48 = vld [vmem:[%s4685_s5 + $0x18] sm:$0xff] }
 0x22a   : > { %744 = vperm.xlu1 %2992, %v710_v49   ;;  %v775_v56 = vmul.f32 %v768_v52, %v710_v49  ;;  %v769_v60 = vmul.f32 %v768_v52, %v704_v51  ;;  %v776_v23 = vmul.f32 %v768_v52, %v711_v57  ;;  %v773_v27 = vmul.f32 %v768_v52, %v708_v1  ;;  %v421_v49 = vld [vmem:[%s4685_s5 + $0x28] sm:$0xff] }
 0x22b   : > { %v774_v31 = vmul.f32 %v768_v52, %v709_v6  ;;  %v771_v35 = vmul.f32 %v768_v52, %v706_v10  ;;  %v772_v39 = vmul.f32 %v768_v52, %v707_v14  ;;  %v770_v43 = vmul.f32 %v768_v52, %v705_v18 }
 0x22c   : > { %v783_v59 = vsub.f32 %v438_v55, %v775_v56  ;;  %v777_v2 = vsub.f32 %v432_v63, %v769_v60  ;;  %v784_v25 = vsub.f32 %v439_v24, %v776_v23  ;;  %v781_v29 = vsub.f32 %v436_v28, %v773_v27 }
 0x22d   : > { %v782_v33 = vsub.f32 %v437_v32, %v774_v31  ;;  %v779_v37 = vsub.f32 %v434_v36, %v771_v35  ;;  %v780_v41 = vsub.f32 %v435_v40, %v772_v39  ;;  %v778_v45 = vsub.f32 %v433_v44, %v770_v43 }
 0x22e   : > { %749 = vperm.xlu1 %2992, %v711_v57   ;;  %817 = vperm.xlu0 %2993, %v783_v59  }
 0x232   : > { %734 = vperm.xlu1 %2992, %v708_v1   ;;  %787 = vperm.xlu0 %2993, %v777_v2  }
 0x236   : > { %739 = vperm.xlu1 %2992, %v709_v6   ;;  %893 = vperm.xlu0 %2993, %v416_v5  }
 0x23a   : > { %724 = vperm.xlu1 %2992, %v706_v10   ;;  %903 = vperm.xlu0 %2993, %v418_v9  }
 0x23e   : > { %729 = vperm.xlu1 %2992, %v707_v14   ;;  %913 = vperm.xlu0 %2993, %v420_v13  }
 0x242   : > { %714 = vperm.xlu1 %2992, %v704_v51   ;;  %923 = vperm.xlu0 %2993, %v422_v16   ;;  %v423_v51 = vld [vmem:[%s4685_s5 + $0x38] sm:$0xff] }
 0x246   : > { %719 = vperm.xlu1 %2992, %v705_v18  }
 0x24a   : > { %822 = vperm.xlu1 %2992, %v784_v25  }
 0x24e   : > { %807 = vperm.xlu1 %2992, %v781_v29  }
 0x252   : > { %812 = vperm.xlu1 %2992, %v782_v33  }
 0x256   : > { %797 = vperm.xlu1 %2992, %v779_v37  }
 0x25a   : > { %802 = vperm.xlu1 %2992, %v780_v41  }
 0x25e   : > { %792 = vperm.xlu1 %2992, %v778_v45  }
 0x262   : > { %898 = vperm.xlu1 %2992, %v417_v47  }
 0x266   : > { %908 = vperm.xlu1 %2992, %v419_v48  }
 0x26a   : > { %918 = vperm.xlu1 %2992, %v421_v49  }
 0x26e   : > { %928 = vperm.xlu1 %2992, %v423_v51  }
 0x2a5   : > { %v745_v52 = vpop.permute.xlu1 %744 }
 0x2a6   : > { %v764_v1 = vmul.f32 %v745_v52, %v3379_v3  ;;  %v765_v2 = vmul.f32 %v745_v52, %v3384_v7 }
 0x2a9   : > { %v750_v53 = vpop.permute.xlu1 %749  ;;  %v818_v61 = vpop.permute.xlu0 %817 }
 0x2aa   : > { %v766_v4 = vmul.f32 %v750_v53, %v3389_v11  ;;  %v767_v5 = vmul.f32 %v750_v53, %v3394_v15  ;;  %v837_v6 = vadd.f32 %v818_v61, %v764_v1  ;;  %v838_v8 = vadd.f32 %v818_v61, %v765_v2 }
 0x2ac   : > { %v854_v13 = vmax.f32 %v838_v8, 0.0  ;;  %v853_v16 = vmax.f32 %v837_v6, 0.0 }
 0x2ad   : > { %v735_v55 = vpop.permute.xlu1 %734 }
 0x2ae   : > { %v760_v7 = vmul.f32 %v735_v55, %v3359_v50  ;;  %v761_v11 = vmul.f32 %v735_v55, %v3364_v54  ;;  %v788_v54 = vpop.permute.xlu0 %787 }
 0x2b1   : > { %v740_v56 = vpop.permute.xlu1 %739 }
 0x2b2   : > { %v762_v25 = vmul.f32 %v740_v56, %v3369_v58  ;;  %v763_v27 = vmul.f32 %v740_v56, %v3374_v62 }
 0x2b5   : > { %v725_v57 = vpop.permute.xlu1 %724 }
 0x2b6   : > { %v756_v33 = vmul.f32 %v725_v57, %v3339_v34  ;;  %v757_v35 = vmul.f32 %v725_v57, %v3344_v38 }
 0x2b9   : > { %v730_v59 = vpop.permute.xlu1 %729 }
 0x2ba   : > { %v758_v45 = vmul.f32 %v730_v59, %v3349_v42  ;;  %v759_v47 = vmul.f32 %v730_v59, %v3354_v46 }
 0x2bd   : > { %v715_v60 = vpop.permute.xlu1 %714 }
 0x2be   : > { %v752_v23 = vmul.f32 %v715_v60, %v3319_v21  ;;  %v753_v24 = vmul.f32 %v715_v60, %v3321_v22 }
 0x2c0   : > { %v825_v36 = vadd.f32 %v788_v54, %v752_v23  ;;  %v826_v21 = vadd.f32 %v788_v54, %v753_v24 }
 0x2c1   : > { %v720_v63 = vpop.permute.xlu1 %719 }
 0x2c2   : > { %v841_v48 = vmax.f32 %v825_v36, 0.0  ;;  %v842_v49 = vmax.f32 %v826_v21, 0.0  ;;  %v754_v57 = vmul.f32 %v720_v63, %v3329_v26  ;;  %v755_v60 = vmul.f32 %v720_v63, %v3334_v30 }
 0x2c5   : > { %v823_v9 = vpop.permute.xlu1 %822 }
 0x2c6   : > { %v3476_v10 = vadd.f32 %v823_v9, %v766_v4  ;;  %v3478_v12 = vadd.f32 %v823_v9, %v767_v5 }
 0x2c8   : > { %v856_v14 = vmax.f32 %v3478_v12, 0.0  ;;  %v855_v17 = vmax.f32 %v3476_v10, 0.0  ;;  %v3008_v10 = vld [vmem:[%s4684_s4 + $0x10] sm:$0xff]   ;;  %v3009_v12 = vld [vmem:[%s4684_s4 + $0x18] sm:$0xff]  }
 0x2c9   : > { %v808_v3 = vpop.permute.xlu1 %807 }
 0x2ca   : > { %v890_v15 = vpack.c.bf16 %v856_v14, %v854_v13  ;;  %v889_v18 = vpack.c.bf16 %v855_v17, %v853_v16  ;;  %v833_v28 = vadd.f32 %v808_v3, %v760_v7  ;;  %v834_v29 = vadd.f32 %v808_v3, %v761_v11 }
 0x2cc   : > { %987 = vmatprep.subr.bf16.mxu1 %v890_v15  ;;  %v849_v37 = vmax.f32 %v833_v28, 0.0  ;;  %v850_v22 = vmax.f32 %v834_v29, 0.0 }
 0x2cd   : > { %988 = vmatpush1.bf16.msra.mxu1 %v889_v18  ;;  %v813_v50 = vpop.permute.xlu1 %812 }
 0x2ce   : > { %v835_v31 = vadd.f32 %v813_v50, %v762_v25  ;;  %v836_v32 = vadd.f32 %v813_v50, %v763_v27  ;;  %v3007_v27 = vld [vmem:[%s4684_s4 + $0x8] sm:$0xff]  }
 0x2d0   : > { %v851_v39 = vmax.f32 %v835_v31, 0.0  ;;  %v852_v58 = vmax.f32 %v836_v32, 0.0 }
 0x2d1   : > { %v798_v40 = vpop.permute.xlu1 %797 }
 0x2d2   : > { %v829_v62 = vadd.f32 %v798_v40, %v756_v33  ;;  %v830_v41 = vadd.f32 %v798_v40, %v757_v35  ;;  %v888_v43 = vpack.c.bf16 %v852_v58, %v850_v22  ;;  %v887_v44 = vpack.c.bf16 %v851_v39, %v849_v37 }
 0x2d4   : > { %v845_v34 = vmax.f32 %v829_v62, 0.0  ;;  %v846_v51 = vmax.f32 %v830_v41, 0.0  ;;  %989 = vmatprep.subr.bf16.mxu1 %v888_v43 }
 0x2d5   : > { %990 = vmatpush1.bf16.msra.mxu1 %v887_v44  ;;  %v803_v38 = vpop.permute.xlu1 %802 }
 0x2d6   : > { %v857_v52 = vmax.f32 %v841_v48, %v845_v34  ;;  %v870_v53 = vmax.f32 %v842_v49, %v846_v51  ;;  %v831_v55 = vadd.f32 %v803_v38, %v758_v45  ;;  %v832_v56 = vadd.f32 %v803_v38, %v759_v47 }
 0x2d8   : > { %v859_v61 = vmax.f32 %v857_v52, %v849_v37  ;;  %v872_v1 = vmax.f32 %v870_v53, %v850_v22  ;;  %v847_v42 = vmax.f32 %v831_v55, 0.0  ;;  %v848_v2 = vmax.f32 %v832_v56, 0.0  ;;  %v3526_v37 = vpop.permute.xlu0 %893 }
 0x2d9   : > { %v793_v46 = vpop.permute.xlu1 %792 }
 0x2da   : > { %v861_v59 = vmax.f32 %v859_v61, %v853_v16  ;;  %v874_v4 = vmax.f32 %v872_v1, %v854_v13  ;;  %v827_v5 = vadd.f32 %v793_v46, %v754_v57  ;;  %v828_v6 = vadd.f32 %v793_v46, %v755_v60  ;;  %v3006_v16 = vld [vmem:[%s4684_s4] sm:$0xff]  }
 0x2db   : > { %v886_v8 = vpack.c.bf16 %v848_v2, %v846_v51  ;;  %v885_v9 = vpack.c.bf16 %v847_v42, %v845_v34 }
 0x2dc   : > { %v843_v3 = vmax.f32 %v827_v5, 0.0  ;;  %v844_v7 = vmax.f32 %v828_v6, 0.0 }
 0x2dd   : > { %991 = vmatprep.subr.bf16.mxu1 %v886_v8  ;;  %v3534_v62 = vpop.permute.xlu1 %898 }
 0x2de   : > { %v858_v11 = vmax.f32 %v843_v3, %v847_v42  ;;  %v871_v15 = vmax.f32 %v844_v7, %v848_v2  ;;  %992 = vmatpush1.bf16.msra.mxu1 %v885_v9  ;;  %v884_v26 = vpack.c.bf16 %v844_v7, %v842_v49  ;;  %v883_v18 = vpack.c.bf16 %v843_v3, %v841_v48  ;;  %v3542_v48 = vpop.permute.xlu0 %903 }
 0x2e0   : > { %v860_v30 = vmax.f32 %v858_v11, %v851_v39  ;;  %v873_v63 = vmax.f32 %v871_v15, %v852_v58  ;;  %993 = vmatprep.subr.bf16.mxu1 %v884_v26 }
 0x2e1   : > { %v3561_v42 = vpop.permute.xlu1 %908 }
 0x2e2   : > { %v862_v13 = vmax.f32 %v860_v30, %v855_v17  ;;  %v875_v23 = vmax.f32 %v873_v63, %v856_v14  ;;  %994 = vmatpush1.bf16.msra.mxu1 %v883_v18  ;;  %v3577_v26 = vpop.permute.xlu0 %913 }
 0x2e4   : > { %v863_v24 = vmax.f32 %v861_v59, %v862_v13  ;;  %v876_v25 = vmax.f32 %v874_v4, %v875_v23 }
 0x2e5   : > { %2848 = vmatmul.mubr.msk.bf16.vlgmr.msra.gmra.mxu1 %vm540_vm0, %v3006_v16 }
 0x2e6   : > { %1021 = vmatprep.mubr.bf16.mxu1 %v4697_v0  ;;  %v864_v14 = vrot.slane %v863_v24, 4  ;;  %v877_v17 = vrot.slane %v876_v25, 4 }
 0x2e8   : > { %v865_v28 = vmax.f32 %v863_v24, %v864_v14  ;;  %v878_v29 = vmax.f32 %v876_v25, %v877_v17  ;;  %v3593_v17 = vpop.permute.xlu1 %918 }
 0x2ea   : > { %v866_v50 = vrot.slane %v865_v28, 2  ;;  %v879_v54 = vrot.slane %v878_v29, 2 }
 0x2ec   : > { %v867_v31 = vmax.f32 %v865_v28, %v866_v50  ;;  %v880_v32 = vmax.f32 %v878_v29, %v879_v54 }
 0x2ed   : > { %2849 = vmatmul.mubr.msk.bf16.gmra.mxu1 %vm540_vm0, %v3007_v27 }
 0x2ee   : > { %1031 = vmatprep.mubr.bf16.mxu1 %v4697_v0  ;;  %v868_v33 = vrot.slane %v867_v31, 1  ;;  %v881_v35 = vrot.slane %v880_v32, 1 }
 0x2f0   : > { %v3522_v36 = vmax.f32 %v867_v31, %v868_v33  ;;  %v3524_v21 = vmax.f32 %v880_v32, %v881_v35 }
 0x2f2   : > { %v931_v22 = vmul.f32 %v3526_v37, %v3522_v36  ;;  %v932_v40 = vmul.f32 %v3526_v37, %v3524_v21  ;;  %v933_v44 = vmul.f32 %v3534_v62, %v3522_v36  ;;  %v934_v47 = vmul.f32 %v3534_v62, %v3524_v21 }
 0x2f3   : > { %v935_v53 = vmul.f32 %v3542_v48, %v3522_v36  ;;  %v936_v1 = vmul.f32 %v3542_v48, %v3524_v21  ;;  %v937_v6 = vmul.f32 %v3561_v42, %v3522_v36  ;;  %v938_v15 = vmul.f32 %v3561_v42, %v3524_v21 }
 0x2f4   : > { %v939_v23 = vmul.f32 %v3577_v26, %v3522_v36  ;;  %v940_v14 = vmul.f32 %v3577_v26, %v3524_v21  ;;  %v941_v32 = vmul.f32 %v3593_v17, %v3522_v36 }
 0x2f5   : > { %2850 = vmatmul.mubr.msk.bf16.gmra.mxu1 %vm540_vm0, %v3008_v10 }
 0x2f6   : > { %1041 = vmatprep.mubr.bf16.mxu1 %v4697_v0 }
 0x2fd   : > { %2851 = vmatmul.mubr.msk.bf16.gmra.mxu1 %vm540_vm0, %v3009_v12 }
 0x2fe   : > { %1756 = vmatprep.mubr.bf16.mxu1 %v4697_v0 }
 0x3a5   : > { %v1013_v39 = vpop.f32.mrf.mxu1 }
 0x3a6   : > { %v3530_v58 = vadd.f32 %v1013_v39, %v931_v22 }
 0x3a7   : > { %v1015_v41 = vpop.f32.mrf.mxu1 }
 0x3a8   : > { %v3536_v43 = vadd.f32 %v1015_v41, %v932_v40  ;;  %v1076_v49 = vmul.f32 %v3530_v58, %v3530_v58  ;;  %v942_v41 = vmul.f32 %v3593_v17, %v3524_v21 }
 0x3a9   : > { %v1017_v45 = vpop.f32.mrf.mxu1 }
 0x3aa   : > { %v1052_v34 = vadd.f32 %v3536_v43, %v3530_v58  ;;  %v1077_v51 = vmul.f32 %v3536_v43, %v3536_v43  ;;  %v3550_v38 = vadd.f32 %v1017_v45, %v933_v44  ;;  %v3609_v44 = vpop.permute.xlu0 %923 }
 0x3ab   : > { %v1019_v52 = vpop.f32.mrf.mxu1 }
 0x3ac   : > { %v1092_v55 = vadd.f32 %v1077_v51, %v1076_v49  ;;  %v1053_v56 = vadd.f32 %v1052_v34, %v3550_v38  ;;  %v1078_v57 = vmul.f32 %v3550_v38, %v3550_v38  ;;  %v3557_v60 = vadd.f32 %v1019_v52, %v934_v47 }
 0x3ad   : > { %v1023_v61 = vpop.f32.mrf.mxu1  ;;  %v943_v52 = vmul.f32 %v3609_v44, %v3522_v36 }
 0x3ae   : > { %v1093_v2 = vadd.f32 %v1092_v55, %v1078_v57  ;;  %v1054_v46 = vadd.f32 %v1053_v56, %v3557_v60  ;;  %v1079_v59 = vmul.f32 %v3557_v60, %v3557_v60  ;;  %v3566_v4 = vadd.f32 %v1023_v61, %v935_v53 }
 0x3af   : > { %v1025_v5 = vpop.f32.mrf.mxu1 }
 0x3b0   : > { %v1094_v8 = vadd.f32 %v1093_v2, %v1079_v59  ;;  %v1055_v9 = vadd.f32 %v1054_v46, %v3566_v4  ;;  %v1080_v3 = vmul.f32 %v3566_v4, %v3566_v4  ;;  %v3573_v7 = vadd.f32 %v1025_v5, %v936_v1  ;;  %v3625_v2 = vpop.permute.xlu1 %928 }
 0x3b1   : > { %v1027_v11 = vpop.f32.mrf.mxu1  ;;  %v944_v1 = vmul.f32 %v3609_v44, %v3524_v21 }
 0x3b2   : > { %v1095_v18 = vadd.f32 %v1094_v8, %v1080_v3  ;;  %v1056_v30 = vadd.f32 %v1055_v9, %v3573_v7  ;;  %v1081_v63 = vmul.f32 %v3573_v7, %v3573_v7  ;;  %v3582_v16 = vadd.f32 %v1027_v11, %v937_v6 }
 0x3b3   : > { %v1029_v13 = vpop.f32.mrf.mxu1  ;;  %v945_v9 = vmul.f32 %v3625_v2, %v3522_v36 }
 0x3b4   : > { %v1096_v24 = vadd.f32 %v1095_v18, %v1081_v63  ;;  %v1057_v25 = vadd.f32 %v1056_v30, %v3582_v16  ;;  %v1082_v27 = vmul.f32 %v3582_v16, %v3582_v16  ;;  %v3589_v10 = vadd.f32 %v1029_v13, %v938_v15 }
 0x3b5   : > { %v1033_v12 = vpop.f32.mrf.mxu1  ;;  %v946_v63 = vmul.f32 %v3625_v2, %v3524_v21 }
 0x3b6   : > { %v1097_v28 = vadd.f32 %v1096_v24, %v1082_v27  ;;  %v1058_v29 = vadd.f32 %v1057_v25, %v3589_v10  ;;  %v1083_v50 = vmul.f32 %v3589_v10, %v3589_v10  ;;  %v3598_v54 = vadd.f32 %v1033_v12, %v939_v23 }
 0x3b7   : > { %v1035_v31 = vpop.f32.mrf.mxu1 }
 0x3b8   : > { %v1098_v33 = vadd.f32 %v1097_v28, %v1083_v50  ;;  %v1059_v35 = vadd.f32 %v1058_v29, %v3598_v54  ;;  %v1084_v22 = vmul.f32 %v3598_v54, %v3598_v54  ;;  %v3605_v39 = vadd.f32 %v1035_v31, %v940_v14 }
 0x3b9   : > { %v1037_v40 = vpop.f32.mrf.mxu1 }
 0x3ba   : > { %v1099_v45 = vadd.f32 %v1098_v33, %v1084_v22  ;;  %v1060_v47 = vadd.f32 %v1059_v35, %v3605_v39  ;;  %v1085_v49 = vmul.f32 %v3605_v39, %v3605_v39  ;;  %v3614_v34 = vadd.f32 %v1037_v40, %v941_v32 }
 0x3bb   : > { %v1039_v51 = vpop.f32.mrf.mxu1 }
 0x3bc   : > { %v1100_v53 = vadd.f32 %v1099_v45, %v1085_v49  ;;  %v1061_v55 = vadd.f32 %v1060_v47, %v3614_v34  ;;  %v1086_v56 = vmul.f32 %v3614_v34, %v3614_v34  ;;  %v3621_v57 = vadd.f32 %v1039_v51, %v942_v41 }
 0x3bd   : > { %v1043_v61 = vpop.f32.mrf.mxu1 }
 0x3be   : > { %v1101_v46 = vadd.f32 %v1100_v53, %v1086_v56  ;;  %v1062_v59 = vadd.f32 %v1061_v55, %v3621_v57  ;;  %v1087_v5 = vmul.f32 %v3621_v57, %v3621_v57  ;;  %v3630_v6 = vadd.f32 %v1043_v61, %v943_v52 }
 0x3bf   : > { %v1045_v8 = vpop.f32.mrf.mxu1 }
 0x3c0   : > { %v1102_v3 = vadd.f32 %v1101_v46, %v1087_v5  ;;  %v1063_v11 = vadd.f32 %v1062_v59, %v3630_v6  ;;  %v1088_v15 = vmul.f32 %v3630_v6, %v3630_v6  ;;  %v3637_v18 = vadd.f32 %v1045_v8, %v944_v1  ;;  %v447_v46 = vld [vmem:[%s4686_s6 + $0x38] sm:$0xff]  ;;  %v446_v59 = vld [vmem:[%s4686_s6 + $0x30] sm:$0xff] }
 0x3c1   : > { %v1047_v30 = vpop.f32.mrf.mxu1 }
 0x3c2   : > { %v1103_v13 = vadd.f32 %v1102_v3, %v1088_v15  ;;  %v1064_v23 = vadd.f32 %v1063_v11, %v3637_v18  ;;  %v1089_v24 = vmul.f32 %v3637_v18, %v3637_v18  ;;  %v3644_v25 = vadd.f32 %v1047_v30, %v945_v9  ;;  %v445_v3 = vld [vmem:[%s4686_s6 + $0x28] sm:$0xff]  ;;  %v444_v11 = vld [vmem:[%s4686_s6 + $0x20] sm:$0xff] }
 0x3c3   : > { %v1049_v36 = vpop.f32.mrf.mxu1 }
 0x3c4   : > { %v1090_v27 = vmul.f32 %v3644_v25, %v3644_v25  ;;  %v3648_v12 = vadd.f32 %v1049_v36, %v946_v63  ;;  %v1065_v14 = vadd.f32 %v1064_v23, %v3644_v25  ;;  %v1104_v28 = vadd.f32 %v1103_v13, %v1089_v24  ;;  %v443_v63 = vld [vmem:[%s4686_s6 + $0x18] sm:$0xff]  ;;  %v442_v13 = vld [vmem:[%s4686_s6 + $0x10] sm:$0xff]  ;;  %v441_v36 = vld [vmem:[%s4686_s6 + $0x8] sm:$0xff] }
 0x3c6   : > { %v1066_v29 = vadd.f32 %v1065_v14, %v3648_v12  ;;  %v1091_v21 = vmul.f32 %v3648_v12, %v3648_v12  ;;  %v1105_v50 = vadd.f32 %v1104_v28, %v1090_v27  ;;  %v440_v27 = vld [vmem:[%s4686_s6] sm:$0xff] }
 0x3c8   : > { %1067 = vadd.xlane.f32.xlu0 %v1066_v29  ;;  %v1106_v31 = vadd.f32 %v1105_v50, %v1091_v21 }
 0x3ca   : > { %1107 = vadd.xlane.f32.xlu1 %v1106_v31  ;;  %v455_v31 = vld [vmem:[%s4687_s7 + $0x38] sm:$0xff] }
 0x451   : > { %v1068_v32 = vpop.xlane.xlu0 %1067 }
 0x452   : > { %v1069_v33 = vrot.slane %v1068_v32, 4 }
 0x453   : > { %v1108_v35 = vpop.xlane.xlu1 %1107 }
 0x454   : > { %v1070_v22 = vadd.f32 %v1069_v33, %v1068_v32  ;;  %v1109_v40 = vrot.slane %v1108_v35, 4  ;;  %v454_v32 = vld [vmem:[%s4687_s7 + $0x30] sm:$0xff] }
 0x456   : > { %v1071_v41 = vrot.slane %v1070_v22, 2  ;;  %v1110_v45 = vadd.f32 %v1109_v40, %v1108_v35 }
 0x458   : > { %v1111_v47 = vrot.slane %v1110_v45, 2  ;;  %v1072_v49 = vadd.f32 %v1071_v41, %v1070_v22  ;;  %v453_v41 = vld [vmem:[%s4687_s7 + $0x28] sm:$0xff] }
 0x45a   : > { %v1073_v51 = vrot.slane %v1072_v49, 1  ;;  %v1112_v52 = vadd.f32 %v1111_v47, %v1110_v45  ;;  %v452_v45 = vld [vmem:[%s4687_s7 + $0x20] sm:$0xff] }
 0x45c   : > { %v1074_v53 = vadd.f32 %v1073_v51, %v1072_v49  ;;  %v1113_v55 = vrot.slane %v1112_v52, 1 }
 0x45e   : > { %2919 = vpush %v1074_v53  ;;  %v1114_v56 = vadd.f32 %v1113_v55, %v1112_v52  ;;  %v451_v53 = vld [vmem:[%s4687_s7 + $0x18] sm:$0xff]  ;;  %v450_v55 = vld [vmem:[%s4687_s7 + $0x10] sm:$0xff] }
 0x460   : > { %2921 = vpush %v1114_v56 }
 0x48f   : > { %s2920_s0 = spop %2919 }
 0x490   : > { %s3654_s19 = smul.f32 6.1035156e-05, %s2920_s0 }
 0x491   : > { %s2922_s23 = spop %2921 }
 0x492   : > { %s1122_s26 = smul.f32 %s3654_s19, %s3654_s19  ;;  %v1194_v14 = vstv %s3654_s19 }
 0x493   : > { %s1121_s15 = smul.f32 6.1035156e-05, %s2922_s23 }
 0x495   : > { %s1123_s30 = ssub.f32 %s1121_s15, %s1122_s26 }
 0x497   : > { %s1124_s12 = smax.f32 %s4695_s29, %s1123_s30 }
 0x498   : > { %s1125_s13 = sadd.f32 1e-05, %s1124_s12 }
 0x49a   : > { %v1126_v61 = vstv %s1125_s13 }
 0x49b   : > { %3024 = vrsqrt.f32 %v1126_v61 }
 0x4a8   : > { %v3025_v1 = vpop.eup %3024 }
 0x4a9   : > { %2923 = vpush %v3025_v1 }
 0x4da   : > { %s2924_s0 = spop %2923 }
 0x4db   : > { %v1129_v5 = vstv %s2924_s0 }
 0x4dc   : > { %v1137_v8 = vmul.f32 %v1129_v5, %v447_v46  ;;  %v1136_v9 = vmul.f32 %v1129_v5, %v446_v59  ;;  %v1135_v15 = vmul.f32 %v1129_v5, %v445_v3  ;;  %v1134_v30 = vmul.f32 %v1129_v5, %v444_v11  ;;  %v449_v59 = vld [vmem:[%s4687_s7 + $0x8] sm:$0xff]  ;;  %v2866_v3 = vld [vmem:[%s3283_s14 + $0x70] sm:$0xff]  ;;  %v2867_v11 = vld [vmem:[%s3283_s14 + $0x78] sm:$0xff] }
 0x4dd   : > { %v1133_v23 = vmul.f32 %v1129_v5, %v443_v63  ;;  %v1132_v24 = vmul.f32 %v1129_v5, %v442_v13  ;;  %v1131_v28 = vmul.f32 %v1129_v5, %v441_v36  ;;  %v1130_v29 = vmul.f32 %v1129_v5, %v440_v27  ;;  %v448_v5 = vld [vmem:[%s4687_s7] sm:$0xff]  ;;  %v2865_v13 = vld [vmem:[%s3283_s14 + $0x68] sm:$0xff]  ;;  %v2863_v36 = vld [vmem:[%s3283_s14 + $0x58] sm:$0xff] }
 0x4de   : > { %1175 = vperm.xlu1 %2992, %v1137_v8   ;;  %1170 = vperm.xlu0 %2993, %v1136_v9   ;;  %v1202_v21 = vmul.f32 %v1194_v14, %v1137_v8  ;;  %v1201_v50 = vmul.f32 %v1194_v14, %v1136_v9  ;;  %v1200_v22 = vmul.f32 %v1194_v14, %v1135_v15 }
 0x4df   : > { %v1199_v40 = vmul.f32 %v1194_v14, %v1134_v30  ;;  %v1198_v51 = vmul.f32 %v1194_v14, %v1133_v23  ;;  %v1197_v52 = vmul.f32 %v1194_v14, %v1132_v24  ;;  %v1196_v1 = vmul.f32 %v1194_v14, %v1131_v28 }
 0x4e0   : > { %v1210_v33 = vsub.f32 %v455_v31, %v1202_v21  ;;  %v1209_v35 = vsub.f32 %v454_v32, %v1201_v50  ;;  %v1208_v47 = vsub.f32 %v453_v41, %v1200_v22  ;;  %v1195_v46 = vmul.f32 %v1194_v14, %v1130_v29  ;;  %v3034_v32 = vld [vmem:[%s4728_s1] sm:$0xff]  }
 0x4e1   : > { %v1207_v49 = vsub.f32 %v452_v45, %v1199_v40  ;;  %v1206_v56 = vsub.f32 %v451_v53, %v1198_v51  ;;  %v1205_v61 = vsub.f32 %v450_v55, %v1197_v52  ;;  %v1204_v8 = vsub.f32 %v449_v59, %v1196_v1 }
 0x4e2   : > { %1165 = vperm.xlu1 %2992, %v1135_v15   ;;  %1160 = vperm.xlu0 %2993, %v1134_v30   ;;  %v1203_v9 = vsub.f32 %v448_v5, %v1195_v46  ;;  %v2864_v15 = vld [vmem:[%s3283_s14 + $0x60] sm:$0xff]  ;;  %v2875_v30 = vcombine.high %v2866_v3, %v2867_v11  ;;  %v2874_v63 = vcombine.low %v2866_v3, %v2867_v11 }
 0x4e3   : > { %v2872_v27 = vcombine.low %v2864_v15, %v2865_v13 }
 0x4e4   : > { %1732 = vmatprep.subr.bf16.mxu1 %v2875_v30 }
 0x4e5   : > { %1733 = vmatpush1.bf16.msra.mxu1 %v2874_v63 }
 0x4e6   : > { %1155 = vperm.xlu1 %2992, %v1133_v23   ;;  %1150 = vperm.xlu0 %2993, %v1132_v24   ;;  %v2873_v23 = vcombine.high %v2864_v15, %v2865_v13  ;;  %v2862_v24 = vld [vmem:[%s3283_s14 + $0x50] sm:$0xff] }
 0x4e7   : > { %v2871_v14 = vcombine.high %v2862_v24, %v2863_v36  ;;  %v2870_v21 = vcombine.low %v2862_v24, %v2863_v36 }
 0x4e8   : > { %1734 = vmatprep.subr.bf16.mxu1 %v2873_v23 }
 0x4e9   : > { %1735 = vmatpush1.bf16.msra.mxu1 %v2872_v27 }
 0x4ea   : > { %1145 = vperm.xlu1 %2992, %v1131_v28   ;;  %1140 = vperm.xlu0 %2993, %v1130_v29   ;;  %v2860_v28 = vld [vmem:[%s3283_s14 + $0x40] sm:$0xff]  ;;  %v2861_v29 = vld [vmem:[%s3283_s14 + $0x48] sm:$0xff] }
 0x4eb   : > { %1736 = vmatprep.subr.bf16.mxu1 %v2871_v14  ;;  %v2869_v50 = vcombine.high %v2860_v28, %v2861_v29  ;;  %v2868_v31 = vcombine.low %v2860_v28, %v2861_v29 }
 0x4ed   : > { %1737 = vmatpush1.bf16.msra.mxu1 %v2870_v21 }
 0x4ee   : > { %1248 = vperm.xlu1 %2992, %v1210_v33   ;;  %1243 = vperm.xlu0 %2993, %v1209_v35   ;;  %v3035_v33 = vld [vmem:[%s4728_s1 + $0x8] sm:$0xff]  }
 0x4ef   : > { %1738 = vmatprep.subr.bf16.mxu1 %v2869_v50 }
 0x4f1   : > { %1739 = vmatpush1.bf16.msra.mxu1 %v2868_v31 }
 0x4f2   : > { %1238 = vperm.xlu1 %2992, %v1208_v47   ;;  %1233 = vperm.xlu0 %2993, %v1207_v49  }
 0x4f4   : > { %2876 = vmatmul.mubr.msk.bf16.vlgmr.msra.gmra.mxu1 %vm540_vm0, %v3034_v32 }
 0x4f5   : > { %1766 = vmatprep.mubr.bf16.mxu1 %v4697_v0 }
 0x4f6   : > { %1228 = vperm.xlu1 %2992, %v1206_v56   ;;  %1223 = vperm.xlu0 %2993, %v1205_v61  }
 0x4fa   : > { %1218 = vperm.xlu1 %2992, %v1204_v8   ;;  %1213 = vperm.xlu0 %2993, %v1203_v9  }
 0x4fc   : > { %2877 = vmatmul.mubr.msk.bf16.gmra.mxu1 %vm540_vm0, %v3035_v33 }
 0x4fd   : > { %1776 = vmatprep.mubr.bf16.mxu1 %v4697_v0 }
 0x504   : > { %2878 = vmatmul.mubr.msk.bf16.gmra.mxu1 %vm540_vm0, %v3306_v19 }
 0x505   : > { %1786 = vmatprep.mubr.bf16.mxu1 %v4697_v0 }
 0x50c   : > { %2879 = vmatmul.mubr.msk.bf16.gmra.mxu1 %vm540_vm0, %v3314_v20 }
 0x50d   : > { %2422 = vmatprep.mubr.bf16.mxu1 %v4697_v0 }
 0x559   : > { %v1176_v35 = vpop.permute.xlu1 %1175  ;;  %v1171_v22 = vpop.permute.xlu0 %1170 }
 0x55a   : > { %v1192_v52 = vmul.f32 %v1176_v35, %v3644_v25  ;;  %v1193_v53 = vmul.f32 %v1176_v35, %v3648_v12  ;;  %v1190_v19 = vmul.f32 %v1171_v22, %v3630_v6  ;;  %v1191_v55 = vmul.f32 %v1171_v22, %v3637_v18 }
 0x55d   : > { %v1166_v40 = vpop.permute.xlu1 %1165  ;;  %v1161_v41 = vpop.permute.xlu0 %1160 }
 0x55e   : > { %v1188_v5 = vmul.f32 %v1166_v40, %v3614_v34  ;;  %v1189_v8 = vmul.f32 %v1166_v40, %v3621_v57  ;;  %v1186_v9 = vmul.f32 %v1161_v41, %v3598_v54  ;;  %v1187_v6 = vmul.f32 %v1161_v41, %v3605_v39 }
 0x561   : > { %v1156_v45 = vpop.permute.xlu1 %1155  ;;  %v1151_v47 = vpop.permute.xlu0 %1150 }
 0x562   : > { %v1184_v24 = vmul.f32 %v1156_v45, %v3582_v16  ;;  %v1185_v34 = vmul.f32 %v1156_v45, %v3589_v10  ;;  %v1182_v54 = vmul.f32 %v1151_v47, %v3566_v4  ;;  %v1183_v29 = vmul.f32 %v1151_v47, %v3573_v7 }
 0x565   : > { %v1146_v49 = vpop.permute.xlu1 %1145  ;;  %v1141_v51 = vpop.permute.xlu0 %1140 }
 0x566   : > { %v1180_v10 = vmul.f32 %v1146_v49, %v3550_v38  ;;  %v1181_v35 = vmul.f32 %v1146_v49, %v3557_v60  ;;  %v1178_v40 = vmul.f32 %v1141_v51, %v3530_v58  ;;  %v1179_v47 = vmul.f32 %v1141_v51, %v3536_v43  ;;  %v3010_v43 = vld [vmem:[%s4688_s8] sm:$0xff]   ;;  %v3011_v51 = vld [vmem:[%s4688_s8 + $0x8] sm:$0xff]  }
 0x569   : > { %v1249_v56 = vpop.permute.xlu1 %1248  ;;  %v1244_v20 = vpop.permute.xlu0 %1243 }
 0x56a   : > { %v1265_v61 = vadd.f32 %v1249_v56, %v1192_v52  ;;  %v1266_v1 = vadd.f32 %v1249_v56, %v1193_v53  ;;  %v1263_v46 = vadd.f32 %v1244_v20, %v1190_v19  ;;  %v1264_v59 = vadd.f32 %v1244_v20, %v1191_v55 }
 0x56c   : > { %v1281_v3 = vmax.f32 %v1265_v61, 0.0  ;;  %v1282_v25 = vmax.f32 %v1266_v1, 0.0  ;;  %v1279_v11 = vmax.f32 %v1263_v46, 0.0  ;;  %v1280_v12 = vmax.f32 %v1264_v59, 0.0 }
 0x56d   : > { %v1239_v15 = vpop.permute.xlu1 %1238  ;;  %v1234_v18 = vpop.permute.xlu0 %1233 }
 0x56e   : > { %v1289_v30 = vpack.c.bf16 %v1281_v3, %v1279_v11  ;;  %v1261_v63 = vadd.f32 %v1239_v15, %v1188_v5  ;;  %v1262_v13 = vadd.f32 %v1239_v15, %v1189_v8  ;;  %v1259_v23 = vadd.f32 %v1234_v18, %v1186_v9  ;;  %v3012_v8 = vld [vmem:[%s4688_s8 + $0x10] sm:$0xff]   ;;  %v3013_v9 = vld [vmem:[%s4688_s8 + $0x18] sm:$0xff]  }
 0x56f   : > { %v1260_v36 = vadd.f32 %v1234_v18, %v1187_v6  ;;  %v1290_v57 = vpack.c.bf16 %v1282_v25, %v1280_v12 }
 0x570   : > { %v1277_v27 = vmax.f32 %v1261_v63, 0.0  ;;  %v1278_v14 = vmax.f32 %v1262_v13, 0.0  ;;  %v1275_v28 = vmax.f32 %v1259_v23, 0.0 }
 0x571   : > { %v1276_v39 = vmax.f32 %v1260_v36, 0.0  ;;  %1331 = vmatprep.subr.bf16.mxu0 %v1290_v57  ;;  %v1229_v21 = vpop.permute.xlu1 %1228  ;;  %v1224_v50 = vpop.permute.xlu0 %1223 }
 0x572   : > { %v1287_v31 = vpack.c.bf16 %v1277_v27, %v1275_v28  ;;  %v1257_v32 = vadd.f32 %v1229_v21, %v1184_v24  ;;  %v1258_v33 = vadd.f32 %v1229_v21, %v1185_v34  ;;  %1332 = vmatpush1.bf16.msra.mxu0 %v1289_v30  ;;  %v1255_v16 = vadd.f32 %v1224_v50, %v1182_v54 }
 0x573   : > { %v1256_v22 = vadd.f32 %v1224_v50, %v1183_v29  ;;  %v1288_v4 = vpack.c.bf16 %v1278_v14, %v1276_v39 }
 0x574   : > { %v1273_v41 = vmax.f32 %v1257_v32, 0.0  ;;  %v1274_v45 = vmax.f32 %v1258_v33, 0.0  ;;  %v1271_v7 = vmax.f32 %v1255_v16, 0.0 }
 0x575   : > { %v1272_v52 = vmax.f32 %v1256_v22, 0.0  ;;  %1333 = vmatprep.subr.bf16.mxu0 %v1288_v4  ;;  %v1219_v53 = vpop.permute.xlu1 %1218  ;;  %v1214_v19 = vpop.permute.xlu0 %1213 }
 0x576   : > { %v1285_v55 = vpack.c.bf16 %v1273_v41, %v1271_v7  ;;  %v1253_v56 = vadd.f32 %v1219_v53, %v1180_v10  ;;  %v1254_v20 = vadd.f32 %v1219_v53, %v1181_v35  ;;  %1334 = vmatpush1.bf16.msra.mxu0 %v1287_v31  ;;  %v1251_v38 = vadd.f32 %v1214_v19, %v1178_v40 }
 0x577   : > { %v1252_v61 = vadd.f32 %v1214_v19, %v1179_v47  ;;  %v1286_v60 = vpack.c.bf16 %v1274_v45, %v1272_v52 }
 0x578   : > { %v1269_v49 = vmax.f32 %v1253_v56, 0.0  ;;  %v1270_v1 = vmax.f32 %v1254_v20, 0.0  ;;  %v1267_v46 = vmax.f32 %v1251_v38, 0.0 }
 0x579   : > { %v1268_v58 = vmax.f32 %v1252_v61, 0.0  ;;  %1335 = vmatprep.subr.bf16.mxu0 %v1286_v60 }
 0x57a   : > { %v1283_v59 = vpack.c.bf16 %v1269_v49, %v1267_v46  ;;  %1336 = vmatpush1.bf16.msra.mxu0 %v1285_v55 }
 0x57b   : > { %v1284_v5 = vpack.c.bf16 %v1270_v1, %v1268_v58 }
 0x57d   : > { %1337 = vmatprep.subr.bf16.mxu0 %v1284_v5 }
 0x57e   : > { %1338 = vmatpush1.bf16.msra.mxu0 %v1283_v59 }
 0x581   : > { %2856 = vmatmul.mubr.msk.bf16.vlgmr.msra.gmra.mxu0 %vm540_vm0, %v3010_v43 }
 0x582   : > { %1365 = vmatprep.mubr.bf16.mxu0 %v4697_v0 }
 0x589   : > { %2857 = vmatmul.mubr.msk.bf16.gmra.mxu0 %vm540_vm0, %v3011_v51 }
 0x58a   : > { %1375 = vmatprep.mubr.bf16.mxu0 %v4697_v0 }
 0x591   : > { %2858 = vmatmul.mubr.msk.bf16.gmra.mxu0 %vm540_vm0, %v3012_v8 }
 0x592   : > { %1385 = vmatprep.mubr.bf16.mxu0 %v4697_v0 }
 0x599   : > { %2859 = vmatmul.mubr.msk.bf16.gmra.mxu0 %vm540_vm0, %v3013_v9 }
 0x59a   : > { %2110 = vmatprep.mubr.bf16.mxu0 %v4697_v0  ;;  %v3039_v0 = vld [vmem:[%s4682_s2 + $0x20] sm:$0xff] }
 0x5b4   : > { %v3768_v3 = vpop.f32.mrf.mxu1 }
 0x5b5   : > { %v1821_v11 = vmul.f32 %v3768_v3, %v3768_v3 }
 0x5b6   : > { %v3770_v25 = vpop.f32.mrf.mxu1 }
 0x5b7   : > { %v1797_v12 = vadd.f32 %v3770_v25, %v3768_v3  ;;  %v1822_v6 = vmul.f32 %v3770_v25, %v3770_v25 }
 0x5b8   : > { %v3778_v15 = vpop.f32.mrf.mxu1 }
 0x5b9   : > { %v1837_v18 = vadd.f32 %v1822_v6, %v1821_v11  ;;  %v1798_v30 = vadd.f32 %v1797_v12, %v3778_v15  ;;  %v1823_v63 = vmul.f32 %v3778_v15, %v3778_v15 }
 0x5ba   : > { %v3783_v13 = vpop.f32.mrf.mxu1 }
 0x5bb   : > { %v1838_v23 = vadd.f32 %v1837_v18, %v1823_v63  ;;  %v1799_v24 = vadd.f32 %v1798_v30, %v3783_v13  ;;  %v1824_v34 = vmul.f32 %v3783_v13, %v3783_v13 }
 0x5bc   : > { %v3788_v36 = vpop.f32.mrf.mxu1 }
 0x5bd   : > { %v1839_v57 = vadd.f32 %v1838_v23, %v1824_v34  ;;  %v1800_v54 = vadd.f32 %v1799_v24, %v3788_v36  ;;  %v1825_v27 = vmul.f32 %v3788_v36, %v3788_v36 }
 0x5be   : > { %v3793_v14 = vpop.f32.mrf.mxu1 }
 0x5bf   : > { %v1840_v28 = vadd.f32 %v1839_v57, %v1825_v27  ;;  %v1801_v29 = vadd.f32 %v1800_v54, %v3793_v14  ;;  %v1826_v39 = vmul.f32 %v3793_v14, %v3793_v14 }
 0x5c0   : > { %v3798_v21 = vpop.f32.mrf.mxu1 }
 0x5c1   : > { %v1841_v50 = vadd.f32 %v1840_v28, %v1826_v39  ;;  %v1802_v31 = vadd.f32 %v1801_v29, %v3798_v21  ;;  %v1827_v32 = vmul.f32 %v3798_v21, %v3798_v21 }
 0x5c2   : > { %v3803_v33 = vpop.f32.mrf.mxu1 }
 0x5c3   : > { %v1842_v10 = vadd.f32 %v1841_v50, %v1827_v32  ;;  %v1803_v35 = vadd.f32 %v1802_v31, %v3803_v33  ;;  %v1828_v22 = vmul.f32 %v3803_v33, %v3803_v33 }
 0x5c4   : > { %v3810_v4 = vpop.f32.mrf.mxu1 }
 0x5c5   : > { %v1843_v52 = vadd.f32 %v1842_v10, %v1828_v22  ;;  %v1804_v53 = vadd.f32 %v1803_v35, %v3810_v4  ;;  %v1829_v19 = vmul.f32 %v3810_v4, %v3810_v4 }
 0x5c6   : > { %v3828_v38 = vpop.f32.mrf.mxu1 }
 0x5c7   : > { %v1844_v58 = vadd.f32 %v1843_v52, %v1829_v19  ;;  %v1805_v59 = vadd.f32 %v1804_v53, %v3828_v38  ;;  %v1830_v5 = vmul.f32 %v3828_v38, %v3828_v38 }
 0x5c8   : > { %v3843_v9 = vpop.f32.mrf.mxu1 }
 0x5c9   : > { %v1845_v63 = vadd.f32 %v1844_v58, %v1830_v5  ;;  %v1806_v23 = vadd.f32 %v1805_v59, %v3843_v9  ;;  %v1831_v24 = vmul.f32 %v3843_v9, %v3843_v9 }
 0x5ca   : > { %v3858_v27 = vpop.f32.mrf.mxu1 }
 0x5cb   : > { %v1846_v32 = vadd.f32 %v1845_v63, %v1831_v24  ;;  %v1807_v10 = vadd.f32 %v1806_v23, %v3858_v27  ;;  %v1832_v35 = vmul.f32 %v3858_v27, %v3858_v27 }
 0x641   : > { %v3805_v16 = vpop.f32.mrf.mxu0 }
 0x642   : > { %4729 = vst [vmem:[#allocation8_spill] sm:$0xff] %v3805_v16  ;;  %v1420_v41 = vmul.f32 %v3805_v16, %v3805_v16 }
 0x643   : > { %v3812_v40 = vpop.f32.mrf.mxu0 }
 0x644   : > { %4730 = vst [vmem:[#allocation9_spill] sm:$0xff] %v3812_v40  ;;  %v1396_v45 = vadd.f32 %v3812_v40, %v3805_v16  ;;  %v1421_v7 = vmul.f32 %v3812_v40, %v3812_v40 }
 0x645   : > { %v3820_v47 = vpop.f32.mrf.mxu0 }
 0x646   : > { %4731 = vst [vmem:[#allocation10_spill] sm:$0xff] %v3820_v47  ;;  %v1436_v55 = vadd.f32 %v1421_v7, %v1420_v41  ;;  %v1397_v56 = vadd.f32 %v1396_v45, %v3820_v47  ;;  %v1422_v20 = vmul.f32 %v3820_v47, %v3820_v47  ;;  %v3873_v7 = vpop.f32.mrf.mxu1 }
 0x647   : > { %v3830_v61 = vpop.f32.mrf.mxu0 }
 0x648   : > { %4732 = vst [vmem:[#allocation11_spill] sm:$0xff] %v3830_v61  ;;  %v1437_v60 = vadd.f32 %v1436_v55, %v1422_v20  ;;  %v1398_v49 = vadd.f32 %v1397_v56, %v3830_v61  ;;  %v1423_v1 = vmul.f32 %v3830_v61, %v3830_v61  ;;  %v1847_v20 = vadd.f32 %v1846_v32, %v1832_v35  ;;  %v3888_v5 = vpop.f32.mrf.mxu1 }
 0x649   : > { %v3835_v46 = vpop.f32.mrf.mxu0 }
 0x64a   : > { %4733 = vst [vmem:[#allocation12_spill] sm:$0xff] %v3835_v46  ;;  %v1438_v43 = vadd.f32 %v1437_v60, %v1423_v1  ;;  %v1399_v51 = vadd.f32 %v1398_v49, %v3835_v46  ;;  %v1424_v8 = vmul.f32 %v3835_v46, %v3835_v46  ;;  %v1808_v60 = vadd.f32 %v1807_v10, %v3873_v7 }
 0x64b   : > { %v3845_v11 = vpop.f32.mrf.mxu0  ;;  %v1833_v49 = vmul.f32 %v3873_v7, %v3873_v7 }
 0x64c   : > { %4734 = vst [vmem:[#allocation13_spill] sm:$0xff] %v3845_v11  ;;  %v1439_v12 = vadd.f32 %v1438_v43, %v1424_v8  ;;  %v1400_v6 = vadd.f32 %v1399_v51, %v3845_v11  ;;  %v1425_v18 = vmul.f32 %v3845_v11, %v3845_v11  ;;  %v1809_v63 = vadd.f32 %v1808_v60, %v3888_v5  ;;  %v3045_v11 = vld [vmem:[%s4683_s3 + $0x20] sm:$0xff] }
 0x64d   : > { %v3850_v30 = vpop.f32.mrf.mxu0 }
 0x64e   : > { %4735 = vst [vmem:[#allocation14_spill] sm:$0xff] %v3850_v30  ;;  %v1440_v34 = vadd.f32 %v1439_v12, %v1425_v18  ;;  %v1401_v57 = vadd.f32 %v1400_v6, %v3850_v30  ;;  %v1426_v54 = vmul.f32 %v3850_v30, %v3850_v30  ;;  %v1848_v18 = vadd.f32 %v1847_v20, %v1833_v49 }
 0x64f   : > { %v3860_v28 = vpop.f32.mrf.mxu0 }
 0x650   : > { %4736 = vst [vmem:[#allocation15_spill] sm:$0xff] %v3860_v28  ;;  %v1441_v29 = vadd.f32 %v1440_v34, %v1426_v54  ;;  %v1402_v39 = vadd.f32 %v1401_v57, %v3860_v28  ;;  %v1427_v50 = vmul.f32 %v3860_v28, %v3860_v28  ;;  %v1834_v57 = vmul.f32 %v3888_v5, %v3888_v5  ;;  %v3903_v54 = vpop.f32.mrf.mxu1 }
 0x651   : > { %v3865_v31 = vpop.f32.mrf.mxu0  ;;  %v1835_v35 = vmul.f32 %v3903_v54, %v3903_v54 }
 0x652   : > { %4737 = vst [vmem:[#allocation16_spill] sm:$0xff] %v3865_v31  ;;  %v1442_v22 = vadd.f32 %v1441_v29, %v1427_v50  ;;  %v1403_v41 = vadd.f32 %v1402_v39, %v3865_v31  ;;  %v1428_v45 = vmul.f32 %v3865_v31, %v3865_v31  ;;  %v3920_v20 = vpop.f32.mrf.mxu1 }
 0x653   : > { %v3875_v52 = vpop.f32.mrf.mxu0 }
 0x654   : > { %4738 = vst [vmem:[#allocation17_spill] sm:$0xff] %v3875_v52  ;;  %v1443_v53 = vadd.f32 %v1442_v22, %v1428_v45  ;;  %v1404_v19 = vadd.f32 %v1403_v41, %v3875_v52  ;;  %v1429_v55 = vmul.f32 %v3875_v52, %v3875_v52  ;;  %v1810_v22 = vadd.f32 %v1809_v63, %v3903_v54  ;;  %v3043_v52 = vld [vmem:[%s4682_s2] sm:$0xff] }
 0x655   : > { %v3880_v56 = vpop.f32.mrf.mxu0 }
 0x656   : > { %4739 = vst [vmem:[#allocation18_spill] sm:$0xff] %v3880_v56  ;;  %v1444_v1 = vadd.f32 %v1443_v53, %v1429_v55  ;;  %v1405_v58 = vadd.f32 %v1404_v19, %v3880_v56  ;;  %v1430_v59 = vmul.f32 %v3880_v56, %v3880_v56  ;;  %v1849_v19 = vadd.f32 %v1848_v18, %v1834_v57 }
 0x657   : > { %v3890_v43 = vpop.f32.mrf.mxu0 }
 0x658   : > { %4740 = vst [vmem:[#allocation19_spill] sm:$0xff] %v3890_v43  ;;  %v1445_v51 = vadd.f32 %v1444_v1, %v1430_v59  ;;  %v1406_v8 = vadd.f32 %v1405_v58, %v3890_v43  ;;  %v1431_v12 = vmul.f32 %v3890_v43, %v3890_v43  ;;  %v1811_v59 = vadd.f32 %v1810_v22, %v3920_v20 }
 0x659   : > { %v3895_v6 = vpop.f32.mrf.mxu0 }
 0x65a   : > { %4741 = vst [vmem:[#allocation20_spill] sm:$0xff] %v3895_v6  ;;  %v1446_v23 = vadd.f32 %v1445_v51, %v1431_v12  ;;  %v1407_v24 = vadd.f32 %v1406_v8, %v3895_v6  ;;  %v1432_v34 = vmul.f32 %v3895_v6, %v3895_v6  ;;  %v1836_v51 = vmul.f32 %v3920_v20, %v3920_v20 }
 0x65b   : > { %v3905_v29 = vpop.f32.mrf.mxu0  ;;  %v1850_v8 = vadd.f32 %v1849_v19, %v1835_v35 }
 0x65c   : > { %4742 = vst [vmem:[#allocation21_spill] sm:$0xff] %v3905_v29  ;;  %v1447_v39 = vadd.f32 %v1446_v23, %v1432_v34  ;;  %v1408_v50 = vadd.f32 %v1407_v24, %v3905_v29  ;;  %v1433_v32 = vmul.f32 %v3905_v29, %v3905_v29 }
 0x65d   : > { %v3910_v10 = vpop.f32.mrf.mxu0  ;;  %v1851_v12 = vadd.f32 %v1850_v8, %v1836_v51 }
 0x65e   : > { %4743 = vst [vmem:[#allocation22_spill] sm:$0xff] %v3910_v10  ;;  %v1434_v41 = vmul.f32 %v3910_v10, %v3910_v10  ;;  %v1409_v45 = vadd.f32 %v1408_v50, %v3910_v10  ;;  %v1448_v53 = vadd.f32 %v1447_v39, %v1433_v32  ;;  %v3042_v10 = vld [vmem:[%s4682_s2 + $0x8] sm:$0xff] }
 0x65f   : > { %v3918_v55 = vpop.f32.mrf.mxu0 }
 0x660   : > { %4744 = vst [vmem:[#allocation23_spill] sm:$0xff] %v3918_v55  ;;  %v1410_v60 = vadd.f32 %v1409_v45, %v3918_v55  ;;  %v1435_v49 = vmul.f32 %v3918_v55, %v3918_v55  ;;  %v1449_v1 = vadd.f32 %v1448_v53, %v1434_v41 }
 0x662   : > { %1411 = vadd.xlane.f32.xlu0 %v1410_v60  ;;  %v1450_v58 = vadd.f32 %v1449_v1, %v1435_v49 }
 0x664   : > { %1451 = vadd.xlane.f32.xlu1 %v1450_v58 }
 0x666   : > { %1812 = vadd.xlane.f32.xlu0 %v1811_v59 }
 0x66a   : > { %1852 = vadd.xlane.f32.xlu0 %v1851_v12 }
 0x6eb   : > { %v1412_v18 = vpop.xlane.xlu0 %1411 }
 0x6ec   : > { %v1413_v63 = vrot.slane %v1412_v18, 4 }
 0x6ed   : > { %v1452_v23 = vpop.xlane.xlu1 %1451 }
 0x6ee   : > { %v1414_v24 = vadd.f32 %v1413_v63, %v1412_v18  ;;  %v1453_v34 = vrot.slane %v1452_v23, 4 }
 0x6ef   : > { %v1813_v35 = vpop.xlane.xlu0 %1812 }
 0x6f0   : > { %v1415_v57 = vrot.slane %v1414_v24, 2  ;;  %v1454_v39 = vadd.f32 %v1453_v34, %v1452_v23  ;;  %v1814_v49 = vrot.slane %v1813_v35, 4 }
 0x6f2   : > { %v1455_v50 = vrot.slane %v1454_v39, 2  ;;  %v1416_v32 = vadd.f32 %v1415_v57, %v1414_v24  ;;  %v1815_v58 = vadd.f32 %v1814_v49, %v1813_v35  ;;  %v462_v35 = vld [vmem:[%s4689_s9 + $0x30] sm:$0xff] }
 0x6f3   : > { %v1853_v19 = vpop.xlane.xlu0 %1852 }
 0x6f4   : > { %v1417_v41 = vrot.slane %v1416_v32, 1  ;;  %v1456_v45 = vadd.f32 %v1455_v50, %v1454_v39  ;;  %v1854_v1 = vrot.slane %v1853_v19, 4  ;;  %v1816_v8 = vrot.slane %v1815_v58, 2  ;;  %v457_v50 = vld [vmem:[%s4689_s9 + $0x8] sm:$0xff] }
 0x6f6   : > { %v1418_v22 = vadd.f32 %v1417_v41, %v1416_v32  ;;  %v1457_v53 = vrot.slane %v1456_v45, 1  ;;  %v1855_v59 = vadd.f32 %v1854_v1, %v1853_v19  ;;  %v1817_v18 = vadd.f32 %v1816_v8, %v1815_v58  ;;  %v456_v32 = vld [vmem:[%s4689_s9] sm:$0xff]  ;;  %v459_v41 = vld [vmem:[%s4689_s9 + $0x18] sm:$0xff] }
 0x6f8   : > { %2925 = vpush %v1418_v22  ;;  %v1458_v60 = vadd.f32 %v1457_v53, %v1456_v45  ;;  %v1856_v12 = vrot.slane %v1855_v59, 2  ;;  %v1818_v23 = vrot.slane %v1817_v18, 1  ;;  %v458_v45 = vld [vmem:[%s4689_s9 + $0x10] sm:$0xff]  ;;  %v461_v22 = vld [vmem:[%s4689_s9 + $0x28] sm:$0xff]  ;;  %v460_v53 = vld [vmem:[%s4689_s9 + $0x20] sm:$0xff] }
 0x6fa   : > { %2927 = vpush %v1458_v60  ;;  %v1857_v63 = vadd.f32 %v1856_v12, %v1855_v59  ;;  %v1819_v57 = vadd.f32 %v1818_v23, %v1817_v18  ;;  %v463_v60 = vld [vmem:[%s4689_s9 + $0x38] sm:$0xff] }
 0x6fc   : > { %v1858_v24 = vrot.slane %v1857_v63, 1 }
 0x6fe   : > { %v1859_v39 = vadd.f32 %v1858_v24, %v1857_v63 }
 0x729   : > { %s2926_s13 = spop %2925 }
 0x72a   : > { %s3928_s19 = smul.f32 6.1035156e-05, %s2926_s13 }
 0x72b   : > { %s2928_s16 = spop %2927 }
 0x72c   : > { %s1466_s22 = smul.f32 %s3928_s19, %s3928_s19  ;;  %v1554_v19 = vstv %s3928_s19 }
 0x72d   : > { %s1465_s24 = smul.f32 6.1035156e-05, %s2928_s16 }
 0x72f   : > { %s1467_s25 = ssub.f32 %s1465_s24, %s1466_s22 }
 0x731   : > { %s1468_s0 = smax.f32 %s4695_s29, %s1467_s25 }
 0x732   : > { %s1469_s23 = sadd.f32 1e-05, %s1468_s0  ;;  %s4745_s0 = smov 0.0  }
 0x734   : > { %v1470_v51 = vstv %s1469_s23 }
 0x735   : > { %3026 = vrsqrt.f32 %v1470_v51 }
 0x742   : > { %v3027_v34 = vpop.eup %3026 }
 0x743   : > { %2929 = vpush %v3027_v34 }
 0x744   : > { %2931 = vpush %v1819_v57 }
 0x745   : > { %2933 = vpush %v1859_v39 }
 0x774   : > { %s2930_s23 = spop %2929 }
 0x775   : > { %v1473_v49 = vstv %s2930_s23  ;;  %s2932_s16 = spop %2931 }
 0x776   : > { %s3958_s22 = smul.f32 6.1035156e-05, %s2932_s16  ;;  %s2934_s24 = spop %2933  ;;  %v3960_v1 = vmul.f32 %v1473_v49, %v457_v50  ;;  %v3962_v58 = vmul.f32 %v1473_v49, %v456_v32  ;;  %v3964_v59 = vmul.f32 %v1473_v49, %v459_v41  ;;  %v3966_v51 = vmul.f32 %v1473_v49, %v458_v45 }
 0x777   : > { %s1866_s29 = smul.f32 6.1035156e-05, %s2934_s24  ;;  %v3968_v8 = vmul.f32 %v1473_v49, %v461_v22  ;;  %v3970_v12 = vmul.f32 %v1473_v49, %v460_v53  ;;  %v3972_v18 = vmul.f32 %v1473_v49, %v463_v60  ;;  %v3974_v63 = vmul.f32 %v1473_v49, %v462_v35  ;;  %v3036_v60 = vld [vmem:[%s4682_s2 + $0x38] sm:$0xff]  ;;  %v3037_v49 = vld [vmem:[%s4682_s2 + $0x30] sm:$0xff] }
 0x778   : > { %s1867_s19 = smul.f32 %s3958_s22, %s3958_s22  ;;  %v3979_v23 = vmul.f32 %v1554_v19, %v3960_v1  ;;  %v3982_v24 = vmul.f32 %v1554_v19, %v3964_v59  ;;  %v3985_v34 = vmul.f32 %v1554_v19, %v3962_v58  ;;  %v3988_v57 = vmul.f32 %v1554_v19, %v3966_v51 }
 0x779   : > { %v3991_v39 = vmul.f32 %v1554_v19, %v3968_v8  ;;  %v3994_v50 = vmul.f32 %v1554_v19, %v3970_v12  ;;  %v3997_v32 = vmul.f32 %v1554_v19, %v3972_v18  ;;  %v4000_v41 = vmul.f32 %v1554_v19, %v3974_v63 }
 0x77a   : > { %s1868_s25 = ssub.f32 %s1866_s29, %s1867_s19 }
 0x77c   : > { %s1869_s23 = smax.f32 %s4745_s0, %s1868_s25 }
 0x77d   : > { %s1870_s26 = sadd.f32 1e-05, %s1869_s23 }
 0x77f   : > { %v1871_v45 = vstv %s1870_s26 }
 0x780   : > { %3028 = vrsqrt.f32 %v1871_v45  ;;  %v3038_v45 = vld [vmem:[%s4682_s2 + $0x28] sm:$0xff] }
 0x78d   : > { %v3029_v22 = vpop.eup %3028 }
 0x78e   : > { %2935 = vpush %v3029_v22 }
 0x7bf   : > { %s2936_s15 = spop %2935 }
 0x7c0   : > { %v1874_v53 = vstv %s2936_s15 }
 0x7c1   : > { %v1882_v35 = vmul.f32 %v3036_v60, %v1874_v53  ;;  %v1881_v19 = vmul.f32 %v3037_v49, %v1874_v53  ;;  %v1880_v22 = vmul.f32 %v3038_v45, %v1874_v53  ;;  %v1879_v29 = vmul.f32 %v3039_v0, %v1874_v53  ;;  %v3040_v60 = vld [vmem:[%s4682_s2 + $0x18] sm:$0xff]  ;;  %v3041_v49 = vld [vmem:[%s4682_s2 + $0x10] sm:$0xff] }
 0x7c2   : > { %v1878_v6 = vmul.f32 %v3040_v60, %v1874_v53  ;;  %v1877_v55 = vmul.f32 %v3041_v49, %v1874_v53  ;;  %v1939_v45 = vstv %s3958_s22  ;;  %v1876_v0 = vmul.f32 %v3042_v10, %v1874_v53  ;;  %v3044_v49 = vld [vmem:[%s4683_s3 + $0x30] sm:$0xff] }
 0x7c3   : > { %1920 = vperm.xlu0 %2993, %v1882_v35   ;;  %1915 = vperm.xlu1 %2992, %v1881_v19   ;;  %v1875_v31 = vmul.f32 %v3043_v52, %v1874_v53  ;;  %v1946_v43 = vmul.f32 %v1939_v45, %v1881_v19  ;;  %v1944_v60 = vmul.f32 %v1939_v45, %v1879_v29  ;;  %v3046_v52 = vld [vmem:[%s4683_s3 + $0x38] sm:$0xff]  ;;  %v3047_v53 = vld [vmem:[%s4683_s3 + $0x10] sm:$0xff] }
 0x7c4   : > { %v1947_v10 = vmul.f32 %v1939_v45, %v1882_v35  ;;  %v1942_v28 = vmul.f32 %v1939_v45, %v1877_v55  ;;  %v1943_v35 = vmul.f32 %v1939_v45, %v1878_v6 }
 0x7c5   : > { %v1954_v56 = vsub.f32 %v3044_v49, %v1946_v43  ;;  %v1952_v46 = vsub.f32 %v3045_v11, %v1944_v60  ;;  %v1945_v43 = vmul.f32 %v1939_v45, %v1880_v22  ;;  %v1940_v49 = vmul.f32 %v1939_v45, %v1875_v31  ;;  %v3048_v11 = vld [vmem:[%s4683_s3 + $0x28] sm:$0xff] }
 0x7c6   : > { %v1950_v19 = vsub.f32 %v3047_v53, %v1942_v28  ;;  %v3050_v28 = vld [vmem:[%s4683_s3 + $0x18] sm:$0xff]  ;;  %v3051_v60 = vld [vmem:[%s4683_s3 + $0x8] sm:$0xff] }
 0x7c7   : > { %1910 = vperm.xlu1 %2992, %v1880_v22   ;;  %1905 = vperm.xlu0 %2993, %v1879_v29   ;;  %v1955_v29 = vsub.f32 %v3046_v52, %v1947_v10  ;;  %v1941_v22 = vmul.f32 %v1939_v45, %v1876_v0 }
 0x7c9   : > { %v1949_v10 = vsub.f32 %v3051_v60, %v1941_v22 }
 0x7cb   : > { %1900 = vperm.xlu1 %2992, %v1878_v6   ;;  %1895 = vperm.xlu0 %2993, %v1877_v55  }
 0x7cf   : > { %1890 = vperm.xlu1 %2992, %v1876_v0   ;;  %1885 = vperm.xlu0 %2993, %v1875_v31   ;;  %v1951_v31 = vsub.f32 %v3050_v28, %v1943_v35 }
 0x7d3   : > { %1988 = vperm.xlu1 %2992, %v1954_v56   ;;  %1978 = vperm.xlu0 %2993, %v1952_v46   ;;  %v1953_v56 = vsub.f32 %v3048_v11, %v1945_v43  ;;  %v3049_v46 = vld [vmem:[%s4683_s3] sm:$0xff] }
 0x7d4   : > { %v1948_v55 = vsub.f32 %v3049_v46, %v1940_v49 }
 0x7d7   : > { %1993 = vperm.xlu1 %2992, %v1955_v29   ;;  %1968 = vperm.xlu0 %2993, %v1950_v19  }
 0x7db   : > { %1983 = vperm.xlu1 %2992, %v1953_v56   ;;  %1958 = vperm.xlu0 %2993, %v1948_v55  }
 0x7df   : > { %1973 = vperm.xlu1 %2992, %v1951_v31  }
 0x7e3   : > { %1963 = vperm.xlu1 %2992, %v1949_v10  }
 0x83e   : > { %v1921_v52 = vpop.permute.xlu0 %1920  ;;  %v1916_v29 = vpop.permute.xlu1 %1915 }
 0x83f   : > { %v1935_v55 = vmul.f32 %v1916_v29, %v3873_v7  ;;  %v1936_v45 = vmul.f32 %v1916_v29, %v3888_v5  ;;  %v1937_v0 = vmul.f32 %v1921_v52, %v3903_v54  ;;  %v1938_v35 = vmul.f32 %v1921_v52, %v3920_v20 }
 0x842   : > { %v1911_v53 = vpop.permute.xlu1 %1910  ;;  %v1906_v19 = vpop.permute.xlu0 %1905 }
 0x843   : > { %v1933_v31 = vmul.f32 %v1911_v53, %v3843_v9  ;;  %v1934_v22 = vmul.f32 %v1911_v53, %v3858_v27  ;;  %v1931_v60 = vmul.f32 %v1906_v19, %v3810_v4  ;;  %v1932_v16 = vmul.f32 %v1906_v19, %v3828_v38 }
 0x846   : > { %v1901_v6 = vpop.permute.xlu1 %1900  ;;  %v1896_v43 = vpop.permute.xlu0 %1895 }
 0x847   : > { %v1927_v7 = vmul.f32 %v1896_v43, %v3788_v36  ;;  %v1929_v54 = vmul.f32 %v1901_v6, %v3798_v21  ;;  %v1928_v20 = vmul.f32 %v1896_v43, %v3793_v14 }
 0x84a   : > { %v1891_v49 = vpop.permute.xlu1 %1890  ;;  %v1886_v11 = vpop.permute.xlu0 %1885 }
 0x84b   : > { %v1923_v9 = vmul.f32 %v1886_v11, %v3768_v3  ;;  %v1924_v38 = vmul.f32 %v1886_v11, %v3770_v25  ;;  %v1930_v3 = vmul.f32 %v1901_v6, %v3803_v33 }
 0x84e   : > { %v1989_v56 = vpop.permute.xlu1 %1988  ;;  %v1979_v46 = vpop.permute.xlu0 %1978 }
 0x84f   : > { %v2008_v28 = vadd.f32 %v1989_v56, %v1935_v55  ;;  %v2009_v10 = vadd.f32 %v1989_v56, %v1936_v45  ;;  %v2004_v27 = vadd.f32 %v1979_v46, %v1931_v60  ;;  %v2005_v19 = vadd.f32 %v1979_v46, %v1932_v16 }
 0x851   : > { %v2024_v52 = vmax.f32 %v2008_v28, 0.0  ;;  %v2025_v36 = vmax.f32 %v2009_v10, 0.0  ;;  %v2020_v43 = vmax.f32 %v2004_v27, 0.0  ;;  %v2021_v47 = vmax.f32 %v2005_v19, 0.0 }
 0x852   : > { %v1994_v30 = vpop.permute.xlu1 %1993  ;;  %v1969_v40 = vpop.permute.xlu0 %1968  ;;  %v1925_v10 = vmul.f32 %v1891_v49, %v3778_v15 }
 0x853   : > { %v4061_v61 = vadd.f32 %v1994_v30, %v1937_v0  ;;  %v4063_v5 = vadd.f32 %v1994_v30, %v1938_v35  ;;  %v2000_v53 = vadd.f32 %v1969_v40, %v1927_v7  ;;  %v2001_v56 = vadd.f32 %v1969_v40, %v1928_v20 }
 0x854   : > { %v1926_v20 = vmul.f32 %v1891_v49, %v3783_v13 }
 0x855   : > { %v2026_v4 = vmax.f32 %v4061_v61, 0.0  ;;  %v2027_v29 = vmax.f32 %v4063_v5, 0.0  ;;  %v2016_v61 = vmax.f32 %v2000_v53, 0.0  ;;  %v2017_v25 = vmax.f32 %v2001_v56, 0.0 }
 0x856   : > { %v1984_v30 = vpop.permute.xlu1 %1983  ;;  %v1959_v55 = vpop.permute.xlu0 %1958 }
 0x857   : > { %v2060_v45 = vpack.c.bf16 %v2026_v4, %v2024_v52  ;;  %v2006_v21 = vadd.f32 %v1984_v30, %v1933_v31  ;;  %v2007_v0 = vadd.f32 %v1984_v30, %v1934_v22  ;;  %v1996_v14 = vadd.f32 %v1959_v55, %v1923_v9 }
 0x858   : > { %v1997_v35 = vadd.f32 %v1959_v55, %v1924_v38  ;;  %v2061_v28 = vpack.c.bf16 %v2027_v29, %v2025_v36 }
 0x859   : > { %v2022_v60 = vmax.f32 %v2006_v21, 0.0  ;;  %v2023_v5 = vmax.f32 %v2007_v0, 0.0  ;;  %v2012_v7 = vmax.f32 %v1996_v14, 0.0 }
 0x85a   : > { %v2013_v11 = vmax.f32 %v1997_v35, 0.0  ;;  %2086 = vmatprep.subr.bf16.mxu0 %v2061_v28  ;;  %v1974_v16 = vpop.permute.xlu1 %1973 }
 0x85b   : > { %v2058_v40 = vpack.c.bf16 %v2022_v60, %v2020_v43  ;;  %v2028_v46 = vmax.f32 %v2012_v7, %v2016_v61  ;;  %2087 = vmatpush1.bf16.msra.mxu0 %v2060_v45  ;;  %v2002_v31 = vadd.f32 %v1974_v16, %v1929_v54  ;;  %v2003_v22 = vadd.f32 %v1974_v16, %v1930_v3 }
 0x85c   : > { %v2041_v33 = vmax.f32 %v2013_v11, %v2017_v25  ;;  %v2059_v6 = vpack.c.bf16 %v2023_v5, %v2021_v47 }
 0x85d   : > { %v2030_v9 = vmax.f32 %v2028_v46, %v2020_v43  ;;  %v2018_v27 = vmax.f32 %v2002_v31, 0.0  ;;  %v2019_v53 = vmax.f32 %v2003_v22, 0.0 }
 0x85e   : > { %v2043_v38 = vmax.f32 %v2041_v33, %v2021_v47  ;;  %2088 = vmatprep.subr.bf16.mxu0 %v2059_v6  ;;  %v1964_v19 = vpop.permute.xlu1 %1963 }
 0x85f   : > { %v2032_v56 = vmax.f32 %v2030_v9, %v2024_v52  ;;  %v2056_v30 = vpack.c.bf16 %v2018_v27, %v2016_v61  ;;  %v1998_v55 = vadd.f32 %v1964_v19, %v1925_v10  ;;  %v1999_v21 = vadd.f32 %v1964_v19, %v1926_v20  ;;  %2089 = vmatpush1.bf16.msra.mxu0 %v2058_v40 }
 0x860   : > { %v2045_v45 = vmax.f32 %v2043_v38, %v2025_v36  ;;  %v2057_v54 = vpack.c.bf16 %v2019_v53, %v2017_v25  ;;  %v3052_v36 = vld [vmem:[%s4684_s4] sm:$0xff]   ;;  %v4746_v25 = vmov 0  }
 0x861   : > { %v2014_v0 = vmax.f32 %v1998_v55, 0.0  ;;  %v2015_v14 = vmax.f32 %v1999_v21, 0.0 }
 0x862   : > { %2090 = vmatprep.subr.bf16.mxu0 %v2057_v54 }
 0x863   : > { %v2029_v15 = vmax.f32 %v2014_v0, %v2018_v27  ;;  %v2042_v3 = vmax.f32 %v2015_v14, %v2019_v53  ;;  %v2054_v35 = vpack.c.bf16 %v2014_v0, %v2012_v7  ;;  %2091 = vmatpush1.bf16.msra.mxu0 %v2056_v30  ;;  %v2055_v13 = vpack.c.bf16 %v2015_v14, %v2013_v11  ;;  %v3053_v7 = vld [vmem:[%s4684_s4 + $0x8] sm:$0xff]  }
 0x865   : > { %v2031_v49 = vmax.f32 %v2029_v15, %v2022_v60  ;;  %v2044_v43 = vmax.f32 %v2042_v3, %v2023_v5  ;;  %2092 = vmatprep.subr.bf16.mxu0 %v2055_v13 }
 0x867   : > { %v2033_v47 = vmax.f32 %v2031_v49, %v2026_v4  ;;  %v2046_v28 = vmax.f32 %v2044_v43, %v2027_v29  ;;  %2093 = vmatpush1.bf16.msra.mxu0 %v2054_v35  ;;  %v3054_v4 = vld [vmem:[%s4684_s4 + $0x10] sm:$0xff]   ;;  %v3055_v29 = vld [vmem:[%s4684_s4 + $0x18] sm:$0xff]  }
 0x869   : > { %v2034_v52 = vmax.f32 %v2032_v56, %v2033_v47  ;;  %v2047_v61 = vmax.f32 %v2045_v45, %v2046_v28 }
 0x86a   : > { %2880 = vmatmul.mubr.msk.bf16.vlgmr.msra.gmra.mxu0 %vm540_vm0, %v3052_v36 }
 0x86b   : > { %2120 = vmatprep.mubr.bf16.mxu0 %v4746_v25  ;;  %v2035_v60 = vrot.slane %v2034_v52, 4  ;;  %v2048_v5 = vrot.slane %v2047_v61, 4 }
 0x86d   : > { %v2036_v11 = vmax.f32 %v2034_v52, %v2035_v60  ;;  %v2049_v16 = vmax.f32 %v2047_v61, %v2048_v5 }
 0x86f   : > { %v2037_v40 = vrot.slane %v2036_v11, 2  ;;  %v2050_v46 = vrot.slane %v2049_v16, 2 }
 0x871   : > { %v2038_v31 = vmax.f32 %v2036_v11, %v2037_v40  ;;  %v2051_v22 = vmax.f32 %v2049_v16, %v2050_v46 }
 0x872   : > { %2881 = vmatmul.mubr.msk.bf16.gmra.mxu0 %vm540_vm0, %v3053_v7 }
 0x873   : > { %2130 = vmatprep.mubr.bf16.mxu0 %v4746_v25  ;;  %v2039_v10 = vrot.slane %v2038_v31, 1  ;;  %v2052_v33 = vrot.slane %v2051_v22, 1 }
 0x875   : > { %v4093_v6 = vmax.f32 %v2038_v31, %v2039_v10  ;;  %v4095_v20 = vmax.f32 %v2051_v22, %v2052_v33 }
 0x877   : > { %v2062_v9 = vmul.f32 %v4093_v6, %v3526_v37  ;;  %v2063_v38 = vmul.f32 %v4095_v20, %v3526_v37  ;;  %v2064_v30 = vmul.f32 %v4093_v6, %v3534_v62  ;;  %v2065_v21 = vmul.f32 %v4095_v20, %v3534_v62 }
 0x878   : > { %v2066_v15 = vmul.f32 %v4093_v6, %v3542_v48  ;;  %v2067_v43 = vmul.f32 %v4095_v20, %v3542_v48  ;;  %v2068_v7 = vmul.f32 %v4093_v6, %v3561_v42  ;;  %v2069_v11 = vmul.f32 %v4095_v20, %v3561_v42 }
 0x879   : > { %v2070_v10 = vmul.f32 %v4093_v6, %v3577_v26 }
 0x87a   : > { %2882 = vmatmul.mubr.msk.bf16.gmra.mxu0 %vm540_vm0, %v3054_v4 }
 0x87b   : > { %2140 = vmatprep.mubr.bf16.mxu0 %v4746_v25 }
 0x882   : > { %2883 = vmatmul.mubr.msk.bf16.gmra.mxu0 %vm540_vm0, %v3055_v29 }
 0x92a   : > { %v2112_v27 = vpop.f32.mrf.mxu0 }
 0x92b   : > { %v4099_v53 = vadd.f32 %v2112_v27, %v2062_v9 }
 0x92c   : > { %v2114_v19 = vpop.f32.mrf.mxu0 }
 0x92d   : > { %v4103_v56 = vadd.f32 %v2114_v19, %v2063_v38  ;;  %v2175_v45 = vmul.f32 %v4099_v53, %v4099_v53  ;;  %v2071_v19 = vmul.f32 %v4095_v20, %v3577_v26 }
 0x92e   : > { %v2116_v55 = vpop.f32.mrf.mxu0 }
 0x92f   : > { %v2151_v54 = vadd.f32 %v4103_v56, %v4099_v53  ;;  %v2176_v0 = vmul.f32 %v4103_v56, %v4103_v56  ;;  %v4115_v37 = vadd.f32 %v2116_v55, %v2064_v30 }
 0x930   : > { %v2118_v14 = vpop.f32.mrf.mxu0 }
 0x931   : > { %v2191_v3 = vadd.f32 %v2176_v0, %v2175_v45  ;;  %v2152_v35 = vadd.f32 %v2151_v54, %v4115_v37  ;;  %v2177_v62 = vmul.f32 %v4115_v37, %v4115_v37  ;;  %v4122_v13 = vadd.f32 %v2118_v14, %v2065_v21 }
 0x932   : > { %v2122_v49 = vpop.f32.mrf.mxu0  ;;  %v2072_v0 = vmul.f32 %v4093_v6, %v3593_v17 }
 0x933   : > { %v2192_v47 = vadd.f32 %v2191_v3, %v2177_v62  ;;  %v2153_v28 = vadd.f32 %v2152_v35, %v4122_v13  ;;  %v2178_v52 = vmul.f32 %v4122_v13, %v4122_v13  ;;  %v4129_v61 = vadd.f32 %v2122_v49, %v2066_v15 }
 0x934   : > { %v2124_v36 = vpop.f32.mrf.mxu0  ;;  %v2073_v62 = vmul.f32 %v4095_v20, %v3593_v17 }
 0x935   : > { %v2193_v4 = vadd.f32 %v2192_v47, %v2178_v52  ;;  %v2154_v29 = vadd.f32 %v2153_v28, %v4129_v61  ;;  %v2179_v60 = vmul.f32 %v4129_v61, %v4129_v61  ;;  %v4136_v5 = vadd.f32 %v2124_v36, %v2067_v43 }
 0x936   : > { %v2126_v48 = vpop.f32.mrf.mxu0  ;;  %v2074_v36 = vmul.f32 %v4093_v6, %v3609_v44 }
 0x937   : > { %v2194_v16 = vadd.f32 %v2193_v4, %v2179_v60  ;;  %v2155_v40 = vadd.f32 %v2154_v29, %v4136_v5  ;;  %v2180_v46 = vmul.f32 %v4136_v5, %v4136_v5  ;;  %v4143_v31 = vadd.f32 %v2126_v48, %v2068_v7 }
 0x938   : > { %v2128_v22 = vpop.f32.mrf.mxu0  ;;  %v2075_v48 = vmul.f32 %v4095_v20, %v3609_v44 }
 0x939   : > { %v2195_v33 = vadd.f32 %v2194_v16, %v2180_v46  ;;  %v2156_v9 = vadd.f32 %v2155_v40, %v4143_v31  ;;  %v2181_v27 = vmul.f32 %v4143_v31, %v4143_v31  ;;  %v4150_v38 = vadd.f32 %v2128_v22, %v2069_v11 }
 0x93a   : > { %v2132_v42 = vpop.f32.mrf.mxu0 }
 0x93b   : > { %v2196_v30 = vadd.f32 %v2195_v33, %v2181_v27  ;;  %v2157_v55 = vadd.f32 %v2156_v9, %v4150_v38  ;;  %v2182_v21 = vmul.f32 %v4150_v38, %v4150_v38  ;;  %v4157_v45 = vadd.f32 %v2132_v42, %v2070_v10 }
 0x93c   : > { %v2134_v54 = vpop.f32.mrf.mxu0  ;;  %v2076_v10 = vmul.f32 %v4093_v6, %v3625_v2 }
 0x93d   : > { %v2197_v14 = vadd.f32 %v2196_v30, %v2182_v21  ;;  %v2158_v15 = vadd.f32 %v2157_v55, %v4157_v45  ;;  %v2183_v3 = vmul.f32 %v4157_v45, %v4157_v45  ;;  %v4164_v35 = vadd.f32 %v2134_v54, %v2071_v19 }
 0x93e   : > { %v2136_v26 = vpop.f32.mrf.mxu0  ;;  %v2077_v19 = vmul.f32 %v4095_v20, %v3625_v2 }
 0x93f   : > { %v2198_v49 = vadd.f32 %v2197_v14, %v2183_v3  ;;  %v2159_v43 = vadd.f32 %v2158_v15, %v4164_v35  ;;  %v2184_v47 = vmul.f32 %v4164_v35, %v4164_v35  ;;  %v4171_v28 = vadd.f32 %v2136_v26, %v2072_v0 }
 0x940   : > { %v2138_v52 = vpop.f32.mrf.mxu0 }
 0x941   : > { %v2199_v7 = vadd.f32 %v2198_v49, %v2184_v47  ;;  %v2160_v4 = vadd.f32 %v2159_v43, %v4171_v28  ;;  %v2185_v29 = vmul.f32 %v4171_v28, %v4171_v28  ;;  %v4178_v60 = vadd.f32 %v2138_v52, %v2073_v62 }
 0x942   : > { %v2142_v17 = vpop.f32.mrf.mxu0 }
 0x943   : > { %v2200_v11 = vadd.f32 %v2199_v7, %v2185_v29  ;;  %v2161_v16 = vadd.f32 %v2160_v4, %v4178_v60  ;;  %v2186_v40 = vmul.f32 %v4178_v60, %v4178_v60  ;;  %v4185_v46 = vadd.f32 %v2142_v17, %v2074_v36 }
 0x944   : > { %v2144_v22 = vpop.f32.mrf.mxu0 }
 0x945   : > { %v2201_v33 = vadd.f32 %v2200_v11, %v2186_v40  ;;  %v2162_v9 = vadd.f32 %v2161_v16, %v4185_v46  ;;  %v2187_v27 = vmul.f32 %v4185_v46, %v4185_v46  ;;  %v4192_v42 = vadd.f32 %v2144_v22, %v2075_v48 }
 0x946   : > { %v2146_v44 = vpop.f32.mrf.mxu0 }
 0x947   : > { %v2202_v30 = vadd.f32 %v2201_v33, %v2187_v27  ;;  %v2163_v55 = vadd.f32 %v2162_v9, %v4192_v42  ;;  %v2188_v21 = vmul.f32 %v4192_v42, %v4192_v42  ;;  %v4199_v54 = vadd.f32 %v2146_v44, %v2076_v10  ;;  %v3056_v27 = vld [vmem:[%s4686_s6 + $0x38] sm:$0xff] }
 0x948   : > { %v2148_v6 = vpop.f32.mrf.mxu0 }
 0x949   : > { %v2189_v0 = vmul.f32 %v4199_v54, %v4199_v54  ;;  %v4203_v14 = vadd.f32 %v2148_v6, %v2077_v19  ;;  %v2164_v15 = vadd.f32 %v2163_v55, %v4199_v54  ;;  %v2203_v3 = vadd.f32 %v2202_v30, %v2188_v21  ;;  %v3057_v19 = vld [vmem:[%s4686_s6 + $0x30] sm:$0xff]  ;;  %v3058_v55 = vld [vmem:[%s4686_s6 + $0x28] sm:$0xff]  ;;  %v3059_v6 = vld [vmem:[%s4686_s6 + $0x20] sm:$0xff] }
 0x94b   : > { %v2165_v26 = vadd.f32 %v2164_v15, %v4203_v14  ;;  %v2190_v2 = vmul.f32 %v4203_v14, %v4203_v14  ;;  %v2204_v20 = vadd.f32 %v2203_v3, %v2189_v0  ;;  %v3060_v15 = vld [vmem:[%s4686_s6 + $0x18] sm:$0xff] }
 0x94d   : > { %2166 = vadd.xlane.f32.xlu0 %v2165_v26  ;;  %v2205_v62 = vadd.f32 %v2204_v20, %v2190_v2  ;;  %v3061_v26 = vld [vmem:[%s4686_s6 + $0x10] sm:$0xff] }
 0x94f   : > { %2206 = vadd.xlane.f32.xlu1 %v2205_v62  ;;  %v3062_v62 = vld [vmem:[%s4686_s6 + $0x8] sm:$0xff] }
 0x9d6   : > { %v2167_v49 = vpop.xlane.xlu0 %2166 }
 0x9d7   : > { %v2168_v43 = vrot.slane %v2167_v49, 4 }
 0x9d8   : > { %v2207_v47 = vpop.xlane.xlu1 %2206 }
 0x9d9   : > { %v2169_v52 = vadd.f32 %v2168_v43, %v2167_v49  ;;  %v2208_v36 = vrot.slane %v2207_v47, 4  ;;  %v3063_v43 = vld [vmem:[%s4686_s6] sm:$0xff] }
 0x9db   : > { %v2170_v7 = vrot.slane %v2169_v52, 2  ;;  %v2209_v4 = vadd.f32 %v2208_v36, %v2207_v47 }
 0x9dd   : > { %v2210_v29 = vrot.slane %v2209_v4, 2  ;;  %v2171_v17 = vadd.f32 %v2170_v7, %v2169_v52  ;;  %v3064_v7 = vld [vmem:[%s4687_s7 + $0x38] sm:$0xff] }
 0x9df   : > { %v2172_v48 = vrot.slane %v2171_v17, 1  ;;  %v2211_v11 = vadd.f32 %v2210_v29, %v2209_v4  ;;  %v3065_v29 = vld [vmem:[%s4687_s7 + $0x30] sm:$0xff] }
 0x9e1   : > { %v2173_v16 = vadd.f32 %v2172_v48, %v2171_v17  ;;  %v2212_v40 = vrot.slane %v2211_v11, 1 }
 0x9e3   : > { %2937 = vpush %v2173_v16  ;;  %v2213_v22 = vadd.f32 %v2212_v40, %v2211_v11  ;;  %v3066_v16 = vld [vmem:[%s4687_s7 + $0x28] sm:$0xff] }
 0x9e5   : > { %2939 = vpush %v2213_v22  ;;  %v3067_v22 = vld [vmem:[%s4687_s7 + $0x20] sm:$0xff] }
 0xa14   : > { %s2938_s29 = spop %2937 }
 0xa15   : > { %s4209_s19 = smul.f32 6.1035156e-05, %s2938_s29 }
 0xa16   : > { %s2940_s22 = spop %2939 }
 0xa17   : > { %s2221_s25 = smul.f32 %s4209_s19, %s4209_s19  ;;  %v2293_v20 = vstv %s4209_s19 }
 0xa18   : > { %s2220_s23 = smul.f32 6.1035156e-05, %s2940_s22 }
 0xa1a   : > { %s2222_s26 = ssub.f32 %s2220_s23, %s2221_s25 }
 0xa1c   : > { %s2223_s15 = smax.f32 %s4745_s0, %s2222_s26 }
 0xa1d   : > { %s2224_s30 = sadd.f32 1e-05, %s2223_s15  ;;  %s4719_s15 = sand.u32 1, %s3152_s18  }
 0xa1f   : > { %v2225_v10 = vstv %s2224_s30  ;;  %s2824_s30 = sshll.u32 %s4719_s15, 8 }
 0xa20   : > { %3030 = vrsqrt.f32 %v2225_v10 }
 0xa2d   : > { %v3031_v33 = vpop.eup %3030 }
 0xa2e   : > { %2941 = vpush %v3031_v33 }
 0xa5f   : > { %s2942_s12 = spop %2941 }
 0xa60   : > { %v2228_v9 = vstv %s2942_s12  ;;  %s4485_s12 = scalar_lea.vmem [#allocation2], %s2824_s30 }
 0xa61   : > { %v2236_v44 = vmul.f32 %v3056_v27, %v2228_v9  ;;  %v2235_v30 = vmul.f32 %v3057_v19, %v2228_v9  ;;  %v2234_v21 = vmul.f32 %v3058_v55, %v2228_v9  ;;  %v2233_v0 = vmul.f32 %v3059_v6, %v2228_v9  ;;  %v3068_v27 = vld [vmem:[%s4687_s7 + $0x18] sm:$0xff]  ;;  %v3069_v19 = vld [vmem:[%s4687_s7 + $0x10] sm:$0xff]  ;;  %v3070_v6 = vld [vmem:[%s4687_s7 + $0x8] sm:$0xff] }
 0xa62   : > { %v2232_v3 = vmul.f32 %v3060_v15, %v2228_v9  ;;  %v2231_v2 = vmul.f32 %v3061_v26, %v2228_v9  ;;  %v2230_v49 = vmul.f32 %v3062_v62, %v2228_v9  ;;  %v2229_v47 = vmul.f32 %v3063_v43, %v2228_v9  ;;  %v3071_v15 = vld [vmem:[%s4687_s7] sm:$0xff] }
 0xa63   : > { %2274 = vperm.xlu1 %2992, %v2236_v44   ;;  %2269 = vperm.xlu0 %2993, %v2235_v30   ;;  %v2301_v52 = vmul.f32 %v2293_v20, %v2236_v44  ;;  %v2300_v36 = vmul.f32 %v2293_v20, %v2235_v30  ;;  %v2299_v48 = vmul.f32 %v2293_v20, %v2234_v21 }
 0xa64   : > { %v2298_v11 = vmul.f32 %v2293_v20, %v2233_v0  ;;  %v2297_v33 = vmul.f32 %v2293_v20, %v2232_v3  ;;  %v2296_v9 = vmul.f32 %v2293_v20, %v2231_v2  ;;  %v2295_v55 = vmul.f32 %v2293_v20, %v2230_v49 }
 0xa65   : > { %v2309_v4 = vsub.f32 %v3064_v7, %v2301_v52  ;;  %v2308_v17 = vsub.f32 %v3065_v29, %v2300_v36  ;;  %v2307_v40 = vsub.f32 %v3066_v16, %v2299_v48 }
 0xa66   : > { %v2306_v10 = vsub.f32 %v3067_v22, %v2298_v11  ;;  %v2305_v44 = vsub.f32 %v3068_v27, %v2297_v33  ;;  %v2304_v30 = vsub.f32 %v3069_v19, %v2296_v9 }
 0xa67   : > { %2264 = vperm.xlu1 %2992, %v2234_v21   ;;  %2259 = vperm.xlu0 %2993, %v2233_v0   ;;  %v2294_v21 = vmul.f32 %v2293_v20, %v2229_v47  ;;  %v2303_v0 = vsub.f32 %v3070_v6, %v2295_v55 }
 0xa6b   : > { %2254 = vperm.xlu1 %2992, %v2232_v3   ;;  %2249 = vperm.xlu0 %2993, %v2231_v2   ;;  %v2302_v3 = vsub.f32 %v3071_v15, %v2294_v21 }
 0xa6f   : > { %2244 = vperm.xlu1 %2992, %v2230_v49   ;;  %2239 = vperm.xlu0 %2993, %v2229_v47  }
 0xa73   : > { %2347 = vperm.xlu1 %2992, %v2309_v4   ;;  %2342 = vperm.xlu0 %2993, %v2308_v17  }
 0xa77   : > { %2337 = vperm.xlu1 %2992, %v2307_v40   ;;  %2332 = vperm.xlu0 %2993, %v2306_v10  }
 0xa7b   : > { %2327 = vperm.xlu1 %2992, %v2305_v44   ;;  %2322 = vperm.xlu0 %2993, %v2304_v30  }
 0xa7f   : > { %2317 = vperm.xlu1 %2992, %v2303_v0   ;;  %2312 = vperm.xlu0 %2993, %v2302_v3  }
 0xade   : > { %v2275_v26 = vpop.permute.xlu1 %2274  ;;  %v2270_v2 = vpop.permute.xlu0 %2269 }
 0xadf   : > { %v2291_v36 = vmul.f32 %v2275_v26, %v4199_v54  ;;  %v2292_v7 = vmul.f32 %v2275_v26, %v4203_v14  ;;  %v2289_v4 = vmul.f32 %v2270_v2, %v4185_v46  ;;  %v2290_v29 = vmul.f32 %v2270_v2, %v4192_v42 }
 0xae2   : > { %v2265_v62 = vpop.permute.xlu1 %2264  ;;  %v2260_v43 = vpop.permute.xlu0 %2259 }
 0xae3   : > { %v2287_v10 = vmul.f32 %v2265_v62, %v4171_v28  ;;  %v2288_v33 = vmul.f32 %v2265_v62, %v4178_v60  ;;  %v2285_v9 = vmul.f32 %v2260_v43, %v4157_v45  ;;  %v2286_v46 = vmul.f32 %v2260_v43, %v4164_v35 }
 0xae6   : > { %v2255_v49 = vpop.permute.xlu1 %2254  ;;  %v2250_v20 = vpop.permute.xlu0 %2249 }
 0xae7   : > { %v2283_v0 = vmul.f32 %v2255_v49, %v4143_v31  ;;  %v2284_v28 = vmul.f32 %v2255_v49, %v4150_v38  ;;  %v2281_v45 = vmul.f32 %v2250_v20, %v4129_v61  ;;  %v2282_v62 = vmul.f32 %v2250_v20, %v4136_v5 }
 0xaea   : > { %v2245_v47 = vpop.permute.xlu1 %2244  ;;  %v2240_v52 = vpop.permute.xlu0 %2239 }
 0xaeb   : > { %v2279_v38 = vmul.f32 %v2245_v47, %v4115_v37  ;;  %v2280_v49 = vmul.f32 %v2245_v47, %v4122_v13  ;;  %v2278_v20 = vmul.f32 %v2240_v52, %v4103_v56  ;;  %v3072_v56 = vld [vmem:[%s4688_s8] sm:$0xff]  }
 0xaee   : > { %v2348_v17 = vpop.permute.xlu1 %2347  ;;  %v2343_v48 = vpop.permute.xlu0 %2342 }
 0xaef   : > { %v2364_v11 = vadd.f32 %v2348_v17, %v2291_v36  ;;  %v2365_v16 = vadd.f32 %v2348_v17, %v2292_v7  ;;  %v2362_v40 = vadd.f32 %v2343_v48, %v2289_v4  ;;  %v2363_v22 = vadd.f32 %v2343_v48, %v2290_v29 }
 0xaf0   : > { %v2277_v48 = vmul.f32 %v2240_v52, %v4099_v53  ;;  %v3073_v52 = vld [vmem:[%s4688_s8 + $0x8] sm:$0xff]  }
 0xaf1   : > { %v2380_v27 = vmax.f32 %v2364_v11, 0.0  ;;  %v2381_v54 = vmax.f32 %v2365_v16, 0.0  ;;  %v2378_v44 = vmax.f32 %v2362_v40, 0.0  ;;  %v2379_v14 = vmax.f32 %v2363_v22, 0.0 }
 0xaf2   : > { %v2338_v19 = vpop.permute.xlu1 %2337  ;;  %v2333_v42 = vpop.permute.xlu0 %2332 }
 0xaf3   : > { %v2388_v30 = vpack.c.bf16 %v2380_v27, %v2378_v44  ;;  %v2360_v55 = vadd.f32 %v2338_v19, %v2287_v10  ;;  %v2361_v21 = vadd.f32 %v2338_v19, %v2288_v33  ;;  %v2358_v6 = vadd.f32 %v2333_v42, %v2285_v9 }
 0xaf4   : > { %v2359_v15 = vadd.f32 %v2333_v42, %v2286_v46  ;;  %v2389_v60 = vpack.c.bf16 %v2381_v54, %v2379_v14  ;;  %v3074_v42 = vld [vmem:[%s4688_s8 + $0x10] sm:$0xff]  }
 0xaf5   : > { %v2376_v3 = vmax.f32 %v2360_v55, 0.0  ;;  %v2377_v26 = vmax.f32 %v2361_v21, 0.0  ;;  %v2374_v2 = vmax.f32 %v2358_v6, 0.0 }
 0xaf6   : > { %v2375_v35 = vmax.f32 %v2359_v15, 0.0  ;;  %2398 = vmatprep.subr.bf16.mxu1 %v2389_v60  ;;  %v2328_v43 = vpop.permute.xlu1 %2327  ;;  %v2323_v36 = vpop.permute.xlu0 %2322 }
 0xaf7   : > { %v2386_v7 = vpack.c.bf16 %v2376_v3, %v2374_v2  ;;  %v2356_v4 = vadd.f32 %v2328_v43, %v2283_v0  ;;  %v2357_v29 = vadd.f32 %v2328_v43, %v2284_v28  ;;  %2399 = vmatpush1.bf16.msra.mxu1 %v2388_v30  ;;  %v2354_v31 = vadd.f32 %v2323_v36, %v2281_v45  ;;  %v3075_v30 = vld [vmem:[%s4688_s8 + $0x18] sm:$0xff]  }
 0xaf8   : > { %v2355_v17 = vadd.f32 %v2323_v36, %v2282_v62  ;;  %v2387_v61 = vpack.c.bf16 %v2377_v26, %v2375_v35 }
 0xaf9   : > { %v2372_v11 = vmax.f32 %v2356_v4, 0.0  ;;  %v2373_v16 = vmax.f32 %v2357_v29, 0.0  ;;  %v2370_v5 = vmax.f32 %v2354_v31, 0.0 }
 0xafa   : > { %v2371_v40 = vmax.f32 %v2355_v17, 0.0  ;;  %2400 = vmatprep.subr.bf16.mxu1 %v2387_v61  ;;  %v2318_v22 = vpop.permute.xlu1 %2317  ;;  %v2313_v10 = vpop.permute.xlu0 %2312 }
 0xafb   : > { %v2384_v33 = vpack.c.bf16 %v2372_v11, %v2370_v5  ;;  %v2352_v9 = vadd.f32 %v2318_v22, %v2279_v38  ;;  %v2353_v27 = vadd.f32 %v2318_v22, %v2280_v49  ;;  %2401 = vmatpush1.bf16.msra.mxu1 %v2386_v7  ;;  %v2350_v37 = vadd.f32 %v2313_v10, %v2277_v48 }
 0xafc   : > { %v2351_v54 = vadd.f32 %v2313_v10, %v2278_v20  ;;  %v2385_v13 = vpack.c.bf16 %v2373_v16, %v2371_v40 }
 0xafd   : > { %v2368_v47 = vmax.f32 %v2352_v9, 0.0  ;;  %v2369_v44 = vmax.f32 %v2353_v27, 0.0  ;;  %v2366_v14 = vmax.f32 %v2350_v37, 0.0 }
 0xafe   : > { %v2367_v53 = vmax.f32 %v2351_v54, 0.0  ;;  %2402 = vmatprep.subr.bf16.mxu1 %v2385_v13 }
 0xaff   : > { %v2382_v46 = vpack.c.bf16 %v2368_v47, %v2366_v14  ;;  %2403 = vmatpush1.bf16.msra.mxu1 %v2384_v33 }
 0xb00   : > { %v2383_v19 = vpack.c.bf16 %v2369_v44, %v2367_v53 }
 0xb02   : > { %2404 = vmatprep.subr.bf16.mxu1 %v2383_v19 }
 0xb03   : > { %2405 = vmatpush1.bf16.msra.mxu1 %v2382_v46 }
 0xb06   : > { %2884 = vmatmul.mubr.msk.bf16.vlgmr.msra.gmra.mxu1 %vm540_vm0, %v3072_v56 }
 0xb07   : > { %2432 = vmatprep.mubr.bf16.mxu1 %v4746_v25 }
 0xb0e   : > { %2885 = vmatmul.mubr.msk.bf16.gmra.mxu1 %vm540_vm0, %v3073_v52 }
 0xb0f   : > { %2442 = vmatprep.mubr.bf16.mxu1 %v4746_v25 }
 0xb16   : > { %2886 = vmatmul.mubr.msk.bf16.gmra.mxu1 %vm540_vm0, %v3074_v42 }
 0xb17   : > { %2452 = vmatprep.mubr.bf16.mxu1 %v4746_v25 }
 0xb1e   : > { %2887 = vmatmul.mubr.msk.bf16.gmra.mxu1 %vm540_vm0, %v3075_v30 }
 0xbc6   : > { %v4298_v55 = vpop.f32.mrf.mxu1 }
 0xbc7   : > { %v2487_v6 = vmul.f32 %v4298_v55, %v4298_v55 }
 0xbc8   : > { %v4300_v21 = vpop.f32.mrf.mxu1 }
 0xbc9   : > { %v2463_v0 = vadd.f32 %v4300_v21, %v4298_v55  ;;  %v2488_v28 = vmul.f32 %v4300_v21, %v4300_v21 }
 0xbca   : > { %v4308_v25 = vpop.f32.mrf.mxu1 }
 0xbcb   : > { %v2503_v15 = vadd.f32 %v2488_v28, %v2487_v6  ;;  %v2464_v60 = vadd.f32 %v2463_v0, %v4308_v25  ;;  %v2489_v45 = vmul.f32 %v4308_v25, %v4308_v25 }
 0xbcc   : > { %v4313_v3 = vpop.f32.mrf.mxu1 }
 0xbcd   : > { %v2504_v26 = vadd.f32 %v2503_v15, %v2489_v45  ;;  %v2465_v2 = vadd.f32 %v2464_v60, %v4313_v3  ;;  %v2490_v62 = vmul.f32 %v4313_v3, %v4313_v3 }
 0xbce   : > { %v4318_v35 = vpop.f32.mrf.mxu1 }
 0xbcf   : > { %v2505_v43 = vadd.f32 %v2504_v26, %v2490_v62  ;;  %v2466_v36 = vadd.f32 %v2465_v2, %v4318_v35  ;;  %v2491_v7 = vmul.f32 %v4318_v35, %v4318_v35 }
 0xbd0   : > { %v4323_v4 = vpop.f32.mrf.mxu1 }
 0xbd1   : > { %v2506_v29 = vadd.f32 %v2505_v43, %v2491_v7  ;;  %v2467_v31 = vadd.f32 %v2466_v36, %v4323_v4  ;;  %v2492_v38 = vmul.f32 %v4323_v4, %v4323_v4 }
 0xbd2   : > { %v4328_v49 = vpop.f32.mrf.mxu1 }
 0xbd3   : > { %v2507_v17 = vadd.f32 %v2506_v29, %v2492_v38  ;;  %v2468_v61 = vadd.f32 %v2467_v31, %v4328_v49  ;;  %v2493_v48 = vmul.f32 %v4328_v49, %v4328_v49  ;;  %v4387_v38 = vld [vmem:[%s4690_s10 + $0x8] sm:$0xff] }
 0xbd4   : > { %v4333_v11 = vpop.f32.mrf.mxu1 }
 0xbd5   : > { %v2508_v16 = vadd.f32 %v2507_v17, %v2493_v48  ;;  %v2469_v5 = vadd.f32 %v2468_v61, %v4333_v11  ;;  %v2494_v20 = vmul.f32 %v4333_v11, %v4333_v11 }
 0xbd6   : > { %v4338_v40 = vpop.f32.mrf.mxu1 }
 0xbd7   : > { %v2509_v22 = vadd.f32 %v2508_v16, %v2494_v20  ;;  %v2470_v10 = vadd.f32 %v2469_v5, %v4338_v40  ;;  %v2495_v33 = vmul.f32 %v4338_v40, %v4338_v40 }
 0xbd8   : > { %v4343_v9 = vpop.f32.mrf.mxu1 }
 0xbd9   : > { %v2510_v27 = vadd.f32 %v2509_v22, %v2495_v33  ;;  %v2471_v37 = vadd.f32 %v2470_v10, %v4343_v9  ;;  %v2496_v54 = vmul.f32 %v4343_v9, %v4343_v9 }
 0xbda   : > { %v4348_v13 = vpop.f32.mrf.mxu1 }
 0xbdb   : > { %v2511_v47 = vadd.f32 %v2510_v27, %v2496_v54  ;;  %v2472_v44 = vadd.f32 %v2471_v37, %v4348_v13  ;;  %v2497_v14 = vmul.f32 %v4348_v13, %v4348_v13 }
 0xbdc   : > { %v4353_v53 = vpop.f32.mrf.mxu1 }
 0xbdd   : > { %v2512_v46 = vadd.f32 %v2511_v47, %v2497_v14  ;;  %v2473_v19 = vadd.f32 %v2472_v44, %v4353_v53  ;;  %v2498_v56 = vmul.f32 %v4353_v53, %v4353_v53 }
 0xbde   : > { %v4358_v52 = vpop.f32.mrf.mxu1 }
 0xbdf   : > { %4747 = vst [vmem:[#allocation24_spill] sm:$0xff] %v4358_v52  ;;  %v2513_v42 = vadd.f32 %v2512_v46, %v2498_v56  ;;  %v2474_v30 = vadd.f32 %v2473_v19, %v4358_v52  ;;  %v2499_v6 = vmul.f32 %v4358_v52, %v4358_v52 }
 0xbe0   : > { %v4363_v0 = vpop.f32.mrf.mxu1 }
 0xbe1   : > { %4748 = vst [vmem:[#allocation25_spill] sm:$0xff] %v4363_v0  ;;  %v2514_v28 = vadd.f32 %v2513_v42, %v2499_v6  ;;  %v2475_v15 = vadd.f32 %v2474_v30, %v4363_v0  ;;  %v2500_v60 = vmul.f32 %v4363_v0, %v4363_v0  ;;  %v3076_v6 = vld [vmem:[%s3283_s14 + $0x8] sm:$0xff] }
 0xbe2   : > { %v4368_v45 = vpop.f32.mrf.mxu1 }
 0xbe3   : > { %4749 = vst [vmem:[#allocation26_spill] sm:$0xff] %v4368_v45  ;;  %v2501_v26 = vmul.f32 %v4368_v45, %v4368_v45  ;;  %v2476_v2 = vadd.f32 %v2475_v15, %v4368_v45  ;;  %v2515_v62 = vadd.f32 %v2514_v28, %v2500_v60  ;;  %v1484_v28 = vunpack.c.l.bf16 %v3076_v6 }
 0xbe4   : > { %v4373_v43 = vpop.f32.mrf.mxu1  ;;  %v1485_v15 = vunpack.c.h.bf16 %v3076_v6  ;;  %v4475_v6 = vld [vmem:[%s3283_s14 + $0x30] sm:$0xff] }
 0xbe5   : > { %4750 = vst [vmem:[#allocation27_spill] sm:$0xff] %v4373_v43  ;;  %v2502_v36 = vmul.f32 %v4373_v43, %v4373_v43  ;;  %v2477_v7 = vadd.f32 %v2476_v2, %v4373_v43  ;;  %v2516_v29 = vadd.f32 %v2515_v62, %v2501_v26  ;;  %v3077_v26 = vld [vmem:[%s3283_s14] sm:$0xff] }
 0xbe6   : > { %v1482_v2 = vunpack.c.l.bf16 %v3077_v26  ;;  %v1483_v62 = vunpack.c.h.bf16 %v3077_v26  ;;  %v4759_v26 = vld [vmem:[#allocation18_spill] sm:$0xff] }
 0xbe7   : > { %2478 = vadd.xlane.f32.xlu0 %v2477_v7  ;;  %v2517_v31 = vadd.f32 %v2516_v29, %v2502_v36  ;;  %v3078_v36 = vld [vmem:[%s3283_s14 + $0x18] sm:$0xff] }
 0xbe8   : > { %v1488_v7 = vunpack.c.l.bf16 %v3078_v36  ;;  %v1489_v29 = vunpack.c.h.bf16 %v3078_v36  ;;  %v4760_v36 = vld [vmem:[#allocation19_spill] sm:$0xff] }
 0xbe9   : > { %2518 = vadd.xlane.f32.xlu1 %v2517_v31  ;;  %v4751_v31 = vld [vmem:[#allocation10_spill] sm:$0xff] }
 0xbfa   : > { %1505 = vperm.xlu1 %2992, %v3960_v1   ;;  %v1564_v1 = vsub.f32 %v4387_v38, %v3979_v23 }
 0xbfd   : > { %1500 = vperm.xlu0 %2993, %v3962_v58   ;;  %v4395_v58 = vld [vmem:[%s4690_s10] sm:$0xff] }
 0xbfe   : > { %1515 = vperm.xlu1 %2992, %v3964_v59   ;;  %v4401_v59 = vld [vmem:[%s4690_s10 + $0x18] sm:$0xff] }
 0xc01   : > { %1510 = vperm.xlu0 %2993, %v3966_v51   ;;  %v1563_v51 = vsub.f32 %v4395_v58, %v3985_v34  ;;  %v4429_v34 = vld [vmem:[%s4690_s10 + $0x38] sm:$0xff] }
 0xc02   : > { %1525 = vperm.xlu1 %2992, %v3968_v8   ;;  %v1566_v8 = vsub.f32 %v4401_v59, %v3982_v24  ;;  %v4424_v24 = vld [vmem:[%s4690_s10 + $0x20] sm:$0xff] }
 0xc03   : > { %v1567_v17 = vsub.f32 %v4424_v24, %v3994_v50 }
 0xc05   : > { %1520 = vperm.xlu0 %2993, %v3970_v12   ;;  %v4410_v12 = vld [vmem:[%s4690_s10 + $0x10] sm:$0xff] }
 0xc06   : > { %1535 = vperm.xlu1 %2992, %v3972_v18   ;;  %v4415_v18 = vld [vmem:[%s4690_s10 + $0x28] sm:$0xff] }
 0xc07   : > { %v1568_v23 = vsub.f32 %v4415_v18, %v3991_v39  ;;  %v4438_v39 = vld [vmem:[%s4690_s10 + $0x30] sm:$0xff] }
 0xc08   : > { %v1569_v61 = vsub.f32 %v4438_v39, %v4000_v41 }
 0xc09   : > { %1530 = vperm.xlu0 %2993, %v3974_v63   ;;  %v1565_v63 = vsub.f32 %v4410_v12, %v3988_v57  ;;  %v1570_v57 = vsub.f32 %v4429_v34, %v3997_v32 }
 0xc0a   : > { %1578 = vperm.xlu1 %2992, %v1564_v1  }
 0xc0d   : > { %1573 = vperm.xlu0 %2993, %v1563_v51   ;;  %v4752_v51 = vld [vmem:[#allocation11_spill] sm:$0xff] }
 0xc0e   : > { %1588 = vperm.xlu1 %2992, %v1566_v8  }
 0xc11   : > { %1583 = vperm.xlu0 %2993, %v1565_v63   ;;  %v3079_v63 = vld [vmem:[%s3283_s14 + $0x10] sm:$0xff] }
 0xc12   : > { %1598 = vperm.xlu1 %2992, %v1568_v23   ;;  %v1486_v23 = vunpack.c.l.bf16 %v3079_v63 }
 0xc15   : > { %1593 = vperm.xlu0 %2993, %v1567_v17   ;;  %v1487_v17 = vunpack.c.h.bf16 %v3079_v63 }
 0xc16   : > { %1608 = vperm.xlu1 %2992, %v1570_v57  }
 0xc19   : > { %1603 = vperm.xlu0 %2993, %v1569_v61   ;;  %v4456_v61 = vld [vmem:[%s3283_s14 + $0x28] sm:$0xff] }
 0xc70   : > { %v2479_v48 = vpop.xlane.xlu0 %2478 }
 0xc71   : > { %v2480_v16 = vrot.slane %v2479_v48, 4 }
 0xc72   : > { %v2519_v5 = vpop.xlane.xlu1 %2518 }
 0xc73   : > { %v2481_v20 = vadd.f32 %v2480_v16, %v2479_v48  ;;  %v2520_v22 = vrot.slane %v2519_v5, 4  ;;  %v1492_v48 = vunpack.c.l.bf16 %v4456_v61  ;;  %v1493_v16 = vunpack.c.h.bf16 %v4456_v61  ;;  %v4755_v61 = vld [vmem:[#allocation14_spill] sm:$0xff] }
 0xc75   : > { %v2482_v50 = vrot.slane %v2481_v20, 2  ;;  %v2521_v10 = vadd.f32 %v2520_v22, %v2519_v5  ;;  %v4461_v5 = vld [vmem:[%s3283_s14 + $0x20] sm:$0xff]  ;;  %v4758_v22 = vld [vmem:[#allocation13_spill] sm:$0xff] }
 0xc76   : > { %v1506_v33 = vpop.permute.xlu1 %1505 }
 0xc77   : > { %v2522_v32 = vrot.slane %v2521_v10, 2  ;;  %v2483_v27 = vadd.f32 %v2482_v50, %v2481_v20  ;;  %v1540_v1 = vmul.f32 %v1506_v33, %v4751_v31  ;;  %v1541_v8 = vmul.f32 %v1506_v33, %v4752_v51  ;;  %v4753_v50 = vld [vmem:[#allocation8_spill] sm:$0xff]  ;;  %v4754_v33 = vld [vmem:[#allocation9_spill] sm:$0xff] }
 0xc78   : > { %v1501_v37 = vpop.permute.xlu0 %1500 }
 0xc79   : > { %v2484_v54 = vrot.slane %v2483_v27, 1  ;;  %v2523_v47 = vadd.f32 %v2522_v32, %v2521_v10  ;;  %v1538_v10 = vmul.f32 %v1501_v37, %v4753_v50  ;;  %v1539_v32 = vmul.f32 %v1501_v37, %v4754_v33  ;;  %v4757_v50 = vld [vmem:[#allocation12_spill] sm:$0xff] }
 0xc7a   : > { %v1516_v44 = vpop.permute.xlu1 %1515 }
 0xc7b   : > { %v2485_v14 = vadd.f32 %v2484_v54, %v2483_v27  ;;  %v2524_v41 = vrot.slane %v2523_v47, 1 }
 0xc7c   : > { %v1511_v46 = vpop.permute.xlu0 %1510 }
 0xc7d   : > { %2943 = vpush %v2485_v14  ;;  %v2525_v19 = vadd.f32 %v2524_v41, %v2523_v47  ;;  %v4470_v14 = vld [vmem:[%s3283_s14 + $0x38] sm:$0xff]  ;;  %v1542_v33 = vmul.f32 %v1511_v46, %v4757_v50  ;;  %v1543_v41 = vmul.f32 %v1511_v46, %v4758_v22 }
 0xc7e   : > { %v1526_v56 = vpop.permute.xlu1 %1525 }
 0xc7f   : > { %2945 = vpush %v2525_v19  ;;  %v1548_v45 = vmul.f32 %v1526_v56, %v4759_v26 }
 0xc80   : > { %v4442_v42 = vpop.permute.xlu0 %1520 }
 0xc82   : > { %v4444_v30 = vpop.permute.xlu1 %1535 }
 0xc84   : > { %v4447_v60 = vpop.permute.xlu0 %1530 }
 0xc86   : > { %v1579_v57 = vpop.permute.xlu1 %1578 }
 0xc87   : > { %v1613_v27 = vadd.f32 %v1579_v57, %v1540_v1  ;;  %v1614_v54 = vadd.f32 %v1579_v57, %v1541_v8  ;;  %v1544_v1 = vmul.f32 %v1516_v44, %v4755_v61  ;;  %v4756_v8 = vld [vmem:[#allocation15_spill] sm:$0xff] }
 0xc88   : > { %v1574_v47 = vpop.permute.xlu0 %1573  ;;  %v1545_v57 = vmul.f32 %v1516_v44, %v4756_v8 }
 0xc89   : > { %v1629_v31 = vadd.f32 %v1613_v27, %v1484_v28  ;;  %v1630_v51 = vadd.f32 %v1614_v54, %v1485_v15  ;;  %v1611_v37 = vadd.f32 %v1574_v47, %v1538_v10  ;;  %v1612_v63 = vadd.f32 %v1574_v47, %v1539_v32  ;;  %v4762_v54 = vld [vmem:[#allocation17_spill] sm:$0xff] }
 0xc8a   : > { %v1589_v20 = vpop.permute.xlu1 %1588  ;;  %v1549_v28 = vmul.f32 %v1526_v56, %v4760_v36  ;;  %v1547_v56 = vmul.f32 %v4442_v42, %v4762_v54 }
 0xc8b   : > { %v1645_v19 = vmax.f32 %v1629_v31, 0.0  ;;  %v1646_v0 = vmax.f32 %v1630_v51, 0.0  ;;  %v1627_v52 = vadd.f32 %v1611_v37, %v1482_v2  ;;  %v1628_v43 = vadd.f32 %v1612_v63, %v1483_v62  ;;  %v4761_v62 = vld [vmem:[#allocation16_spill] sm:$0xff]  ;;  %v4764_v31 = vld [vmem:[#allocation23_spill] sm:$0xff] }
 0xc8c   : > { %v1617_v15 = vadd.f32 %v1589_v20, %v1544_v1  ;;  %v1618_v10 = vadd.f32 %v1589_v20, %v1545_v57  ;;  %v1584_v32 = vpop.permute.xlu0 %1583  ;;  %v1546_v27 = vmul.f32 %v4442_v42, %v4761_v62  ;;  %v1553_v51 = vmul.f32 %v4444_v30, %v4764_v31  ;;  %v3084_v31 = vld [vmem:[%s4689_s9 + $0x8] sm:$0xff] }
 0xc8d   : > { %1661 = vst [vmem:[%s4485_s12 + $0x10] sm:$0xff] %v1645_v19  ;;  %1662 = vst [vmem:[%s4485_s12 + $0x18] sm:$0xff] %v1646_v0  ;;  %v1643_v44 = vmax.f32 %v1627_v52, 0.0  ;;  %v1644_v46 = vmax.f32 %v1628_v43, 0.0  ;;  %v1615_v22 = vadd.f32 %v1584_v32, %v1542_v33  ;;  %v1616_v2 = vadd.f32 %v1584_v32, %v1543_v41  ;;  %v4763_v43 = vld [vmem:[#allocation22_spill] sm:$0xff] }
 0xc8e   : > { %v1633_v20 = vadd.f32 %v1617_v15, %v1488_v7  ;;  %v1634_v47 = vadd.f32 %v1618_v10, %v1489_v29  ;;  %v1599_v26 = vpop.permute.xlu1 %1598  ;;  %v1552_v41 = vmul.f32 %v4444_v30, %v4763_v43  ;;  %v4768_v32 = vunpack.c.h.bf16 %v4461_v5 }
 0xc8f   : > { %1659 = vst [vmem:[%s4485_s12] sm:$0xff] %v1643_v44  ;;  %1660 = vst [vmem:[%s4485_s12 + $0x8] sm:$0xff] %v1644_v46  ;;  %v1631_v36 = vadd.f32 %v1615_v22, %v1486_v23  ;;  %v1632_v19 = vadd.f32 %v1616_v2, %v1487_v17  ;;  %v1621_v0 = vadd.f32 %v1599_v26, %v1548_v45  ;;  %v4765_v23 = vld [vmem:[#allocation20_spill] sm:$0xff]  ;;  %v4766_v45 = vld [vmem:[#allocation21_spill] sm:$0xff]  ;;  %v4769_v46 = vunpack.c.l.bf16 %v4470_v14 }
 0xc90   : > { %v1622_v52 = vadd.f32 %v1599_v26, %v1549_v28  ;;  %v1649_v42 = vmax.f32 %v1633_v20, 0.0  ;;  %v1650_v7 = vmax.f32 %v1634_v47, 0.0  ;;  %v1594_v29 = vpop.permute.xlu0 %1593  ;;  %v1550_v17 = vmul.f32 %v4447_v60, %v4765_v23 }
 0xc91   : > { %v1647_v37 = vmax.f32 %v1631_v36, 0.0  ;;  %v1648_v63 = vmax.f32 %v1632_v19, 0.0  ;;  %v1637_v61 = vadd.f32 %v1621_v0, %v1492_v48  ;;  %v1551_v8 = vmul.f32 %v4447_v60, %v4766_v45 }
 0xc92   : > { %v1638_v1 = vadd.f32 %v1622_v52, %v1493_v16  ;;  %1665 = vst [vmem:[%s4485_s12 + $0x30] sm:$0xff] %v1649_v42  ;;  %1666 = vst [vmem:[%s4485_s12 + $0x38] sm:$0xff] %v1650_v7  ;;  %v1619_v57 = vadd.f32 %v1594_v29, %v1546_v27  ;;  %v1620_v30 = vadd.f32 %v1594_v29, %v1547_v56  ;;  %v1609_v50 = vpop.permute.xlu1 %1608  ;;  %v4767_v16 = vunpack.c.l.bf16 %v4461_v5  ;;  %v3085_v42 = vld [vmem:[%s4689_s9] sm:$0xff]  ;;  %v3086_v29 = vld [vmem:[%s4689_s9 + $0x18] sm:$0xff] }
 0xc93   : > { %1663 = vst [vmem:[%s4485_s12 + $0x20] sm:$0xff] %v1647_v37  ;;  %1664 = vst [vmem:[%s4485_s12 + $0x28] sm:$0xff] %v1648_v63  ;;  %v1653_v33 = vmax.f32 %v1637_v61, 0.0  ;;  %v1625_v15 = vadd.f32 %v1609_v50, %v1552_v41  ;;  %v1626_v48 = vadd.f32 %v1609_v50, %v1553_v51  ;;  %v4770_v2 = vunpack.c.h.bf16 %v4470_v14  ;;  %v3087_v63 = vld [vmem:[%s4689_s9 + $0x10] sm:$0xff] }
 0xc94   : > { %v1654_v28 = vmax.f32 %v1638_v1, 0.0  ;;  %v1635_v10 = vadd.f32 %v1619_v57, %v4767_v16  ;;  %v1636_v60 = vadd.f32 %v1620_v30, %v4768_v32  ;;  %v1604_v44 = vpop.permute.xlu0 %1603  ;;  %v4771_v26 = vunpack.c.l.bf16 %v4475_v6  ;;  %v3088_v1 = vld [vmem:[%s4689_s9 + $0x28] sm:$0xff]  ;;  %v3090_v30 = vld [vmem:[%s4689_s9 + $0x38] sm:$0xff] }
 0xc95   : > { %1669 = vst [vmem:[%s4485_s12 + $0x50] sm:$0xff] %v1653_v33  ;;  %v1641_v22 = vadd.f32 %v1625_v15, %v4769_v46  ;;  %v1642_v62 = vadd.f32 %v1626_v48, %v4770_v2  ;;  %v1623_v27 = vadd.f32 %v1604_v44, %v1550_v17  ;;  %v1624_v54 = vadd.f32 %v1604_v44, %v1551_v8  ;;  %v3089_v17 = vld [vmem:[%s4689_s9 + $0x20] sm:$0xff]  ;;  %v3091_v33 = vld [vmem:[%s4689_s9 + $0x30] sm:$0xff] }
 0xc96   : > { %1670 = vst [vmem:[%s4485_s12 + $0x58] sm:$0xff] %v1654_v28  ;;  %v1651_v56 = vmax.f32 %v1635_v10, 0.0  ;;  %v1652_v20 = vmax.f32 %v1636_v60, 0.0  ;;  %v4772_v19 = vunpack.c.h.bf16 %v4475_v6 }
 0xc97   : > { %v1657_v5 = vmax.f32 %v1641_v22, 0.0  ;;  %v1658_v47 = vmax.f32 %v1642_v62, 0.0  ;;  %v1639_v36 = vadd.f32 %v1623_v27, %v4771_v26  ;;  %v3092_v26 = vld [vmem:[%s3283_s14 + $0x48] sm:$0xff] }
 0xc98   : > { %v1640_v0 = vadd.f32 %v1624_v54, %v4772_v19  ;;  %1667 = vst [vmem:[%s4485_s12 + $0x40] sm:$0xff] %v1651_v56  ;;  %1668 = vst [vmem:[%s4485_s12 + $0x48] sm:$0xff] %v1652_v20  ;;  %v2552_v19 = vunpack.c.h.bf16 %v3092_v26 }
 0xc99   : > { %1673 = vst [vmem:[%s4485_s12 + $0x70] sm:$0xff] %v1657_v5  ;;  %1674 = vst [vmem:[%s4485_s12 + $0x78] sm:$0xff] %v1658_v47  ;;  %v1655_v14 = vmax.f32 %v1639_v36, 0.0  ;;  %v2551_v36 = vunpack.c.l.bf16 %v3092_v26 }
 0xc9a   : > { %v1656_v52 = vmax.f32 %v1640_v0, 0.0 }
 0xc9b   : > { %1671 = vst [vmem:[%s4485_s12 + $0x60] sm:$0xff] %v1655_v14  ;;  %v3094_v14 = vld [vmem:[%s3283_s14 + $0x58] sm:$0xff] }
 0xc9c   : > { %1672 = vst [vmem:[%s4485_s12 + $0x68] sm:$0xff] %v1656_v52  ;;  %v2555_v52 = vunpack.c.l.bf16 %v3094_v14 }
 0xcae   : > { %s2944_s13 = spop %2943 }
 0xcaf   : > { %s4527_s16 = smul.f32 6.1035156e-05, %s2944_s13 }
 0xcb0   : > { %s2946_s24 = spop %2945 }
 0xcb1   : > { %s2533_s29 = smul.f32 %s4527_s16, %s4527_s16  ;;  %v2621_v8 = vstv %s4527_s16  ;;  %s2758_s16 = sshll.u32 %s4485_s12, 4  ;;  %s4632_s16 = int_to_ptr.vmem [resolvable:$true] %s2758_s16 }
 0xcb2   : > { %s2532_s22 = smul.f32 6.1035156e-05, %s2946_s24  ;;  %s3100_s15 = scalar_lea.vmem %s4632_s16, 4096 }
 0xcb3   : > { %p3101_p11 = scmp.ne.s32.totalorder %s4632_s16, %s3100_s15 }
 0xcb4   : > { %s2534_s25 = ssub.f32 %s2532_s22, %s2533_s29  ;;  %s4777_s29 = sand.u32 1, %s3152_s18  }
 0xcb5   : > { %s4640_s22 = scalar_lea.sflag [#allocation3], %s4777_s29  ;;  %p3102_p12 = pnand %p3101_p11, %p3265_p5 }
 0xcb6   : > { %s2535_s23 = smax.f32 %s4745_s0, %s2534_s25  ;;  %s3164_s25 = smov [#allocation2]  }
 0xcb7   : > { %s2536_s19 = sadd.f32 1e-05, %s2535_s23  ;;  %p3103_p13 = pneg %p3102_p12 }
 0xcb8   : > { %s3104_s1 = sshll.u32 %s3164_s25, 4  ;;  %s3105_s1 = int_to_ptr.vmem [resolvable:$false] %s3104_s1 }
 0xcb9   : > { %v2537_v6 = vstv %s2536_s19  ;;  %s3106_s23 = scalar_lea.vmem %s3105_s1, 8192  ;;  %p3107_p0 = scmp.lt.s32.totalorder %s4632_s16, %s3105_s1 }
 0xcba   : > { %3032 = vrsqrt.f32 %v2537_v6  ;;  %v2556_v6 = vunpack.c.h.bf16 %v3094_v14  ;;  %p3108_p1 = scmp.lt.s32.totalorder %s3106_s23, %s3100_s15 }
 0xcbc   : > { %p3109_p2 = por %p3108_p1, %p3107_p0 }
 0xcbe   : > { %p3110_p3 = pnand %p3109_p2, %p3103_p13 }
 0xcc7   : > { %v3033_v43 = vpop.eup %3032 }
 0xcc8   : > { %2947 = vpush %v3033_v43  ;;  %v3095_v43 = vld [vmem:[%s3283_s14 + $0x50] sm:$0xff] }
 0xcf9   : > { %s2948_s26 = spop %2947 }
 0xcfa   : > { %v2540_v41 = vstv %s2948_s26 }
 0xcfb   : > { %v2542_v51 = vmul.f32 %v3084_v31, %v2540_v41  ;;  %v2541_v7 = vmul.f32 %v3085_v42, %v2540_v41  ;;  %v2544_v37 = vmul.f32 %v3086_v29, %v2540_v41  ;;  %v2543_v61 = vmul.f32 %v3087_v63, %v2540_v41 }
 0xcfc   : > { %v2546_v23 = vmul.f32 %v3088_v1, %v2540_v41  ;;  %v2545_v45 = vmul.f32 %v3089_v17, %v2540_v41  ;;  %v2548_v50 = vmul.f32 %v3090_v30, %v2540_v41  ;;  %v2547_v28 = vmul.f32 %v3091_v33, %v2540_v41  ;;  %v3097_v17 = vld [vmem:[%s3283_s14 + $0x60] sm:$0xff]  ;;  %v4580_v33 = vld [vmem:[%s3283_s14 + $0x78] sm:$0xff] }
 0xcfd   : > { %2572 = vperm.xlu1 %2992, %v2542_v51   ;;  %2567 = vperm.xlu0 %2993, %v2541_v7   ;;  %v2622_v57 = vmul.f32 %v2621_v8, %v2541_v7  ;;  %v2623_v15 = vmul.f32 %v2621_v8, %v2542_v51  ;;  %v2624_v48 = vmul.f32 %v2621_v8, %v2543_v61  ;;  %v2553_v41 = vunpack.c.l.bf16 %v3095_v43 }
 0xcfe   : > { %v2625_v32 = vmul.f32 %v2621_v8, %v2544_v37  ;;  %v2626_v60 = vmul.f32 %v2621_v8, %v2545_v45  ;;  %v2627_v22 = vmul.f32 %v2621_v8, %v2546_v23  ;;  %v2628_v2 = vmul.f32 %v2621_v8, %v2547_v28 }
 0xcff   : > { %v2631_v16 = vsub.f32 %v4387_v38, %v2623_v15  ;;  %v2630_v10 = vsub.f32 %v4395_v58, %v2622_v57  ;;  %v2632_v46 = vsub.f32 %v4410_v12, %v2624_v48  ;;  %v2629_v38 = vmul.f32 %v2621_v8, %v2548_v50 }
 0xd00   : > { %v2633_v44 = vsub.f32 %v4401_v59, %v2625_v32  ;;  %v2635_v62 = vsub.f32 %v4415_v18, %v2627_v22  ;;  %v2634_v27 = vsub.f32 %v4424_v24, %v2626_v60  ;;  %v2636_v54 = vsub.f32 %v4438_v39, %v2628_v2 }
 0xd01   : > { %2582 = vperm.xlu1 %2992, %v2544_v37   ;;  %2577 = vperm.xlu0 %2993, %v2543_v61   ;;  %v2637_v58 = vsub.f32 %v4429_v34, %v2629_v38  ;;  %v3093_v34 = vld [vmem:[%s3283_s14 + $0x40] sm:$0xff]  ;;  %v2554_v31 = vunpack.c.h.bf16 %v3095_v43  ;;  %v3096_v61 = vld [vmem:[%s3283_s14 + $0x68] sm:$0xff]  ;;  %v2558_v8 = vunpack.c.h.bf16 %v3097_v17 }
 0xd02   : > { %v2549_v39 = vunpack.c.l.bf16 %v3093_v34  ;;  %v2550_v0 = vunpack.c.h.bf16 %v3093_v34  ;;  %v2559_v1 = vunpack.c.l.bf16 %v3096_v61 }
 0xd05   : > { %2592 = vperm.xlu1 %2992, %v2546_v23   ;;  %2587 = vperm.xlu0 %2993, %v2545_v45   ;;  %v2560_v23 = vunpack.c.h.bf16 %v3096_v61  ;;  %v2557_v45 = vunpack.c.l.bf16 %v3097_v17  ;;  %v4776_v61 = vld [vmem:[#allocation25_spill] sm:$0xff] }
 0xd09   : > { %2602 = vperm.xlu1 %2992, %v2548_v50   ;;  %2597 = vperm.xlu0 %2993, %v2547_v28  }
 0xd0d   : > { %2645 = vperm.xlu1 %2992, %v2631_v16   ;;  %2640 = vperm.xlu0 %2993, %v2630_v10  }
 0xd11   : > { %2655 = vperm.xlu1 %2992, %v2633_v44   ;;  %2650 = vperm.xlu0 %2993, %v2632_v46  }
 0xd15   : > { %2665 = vperm.xlu1 %2992, %v2635_v62   ;;  %2660 = vperm.xlu0 %2993, %v2634_v27  }
 0xd19   : > { %2675 = vperm.xlu1 %2992, %v2637_v58   ;;  %2670 = vperm.xlu0 %2993, %v2636_v54  }
 0xd78   : > { %v2573_v59 = vpop.permute.xlu1 %2572  ;;  %v2568_v12 = vpop.permute.xlu0 %2567 }
 0xd79   : > { %v2607_v51 = vmul.f32 %v2573_v59, %v4308_v25  ;;  %v2608_v42 = vmul.f32 %v2573_v59, %v4313_v3  ;;  %v2605_v7 = vmul.f32 %v2568_v12, %v4298_v55  ;;  %v2606_v29 = vmul.f32 %v2568_v12, %v4300_v21  ;;  %v4585_v21 = vld [vmem:[%s3283_s14 + $0x70] sm:$0xff]  ;;  %s2912_s14 = sshll.u32 %s3248_s21, 12 }
 0xd7a   : > { %v2563_v3 = vunpack.c.l.bf16 %v4580_v33  ;;  %v2564_v55 = vunpack.c.h.bf16 %v4580_v33  ;;  %v2561_v28 = vunpack.c.l.bf16 %v4585_v21  ;;  %v2562_v15 = vunpack.c.h.bf16 %v4585_v21  ;;  %s4630_s24 = scalar_lea.hbm %s4691_s11, %s2912_s14 }
 0xd7c   : > { %v2583_v56 = vpop.permute.xlu1 %2582  ;;  %v2578_v20 = vpop.permute.xlu0 %2577 }
 0xd7d   : > { %v2611_v60 = vmul.f32 %v2583_v56, %v4328_v49  ;;  %v2612_v44 = vmul.f32 %v2583_v56, %v4333_v11  ;;  %v2609_v46 = vmul.f32 %v2578_v20, %v4318_v35  ;;  %v2610_v22 = vmul.f32 %v2578_v20, %v4323_v4 }
 0xd80   : > { %v2593_v18 = vpop.permute.xlu1 %2592  ;;  %v2588_v5 = vpop.permute.xlu0 %2587 }
 0xd81   : > { %v2615_v11 = vmul.f32 %v2593_v18, %v4348_v13  ;;  %v2616_v35 = vmul.f32 %v2593_v18, %v4353_v53  ;;  %v2613_v56 = vmul.f32 %v2588_v5, %v4338_v40  ;;  %v2614_v4 = vmul.f32 %v2588_v5, %v4343_v9 }
 0xd84   : > { %v4565_v24 = vpop.permute.xlu1 %2602  ;;  %v4567_v47 = vpop.permute.xlu0 %2597 }
 0xd85   : > { %v2618_v17 = vmul.f32 %v4567_v47, %v4776_v61 }
 0xd88   : > { %v2646_v37 = vpop.permute.xlu1 %2645  ;;  %v2641_v63 = vpop.permute.xlu0 %2640 }
 0xd89   : > { %v2680_v57 = vadd.f32 %v2646_v37, %v2607_v51  ;;  %v2681_v30 = vadd.f32 %v2646_v37, %v2608_v42  ;;  %v2678_v50 = vadd.f32 %v2641_v63, %v2605_v7  ;;  %v2679_v25 = vadd.f32 %v2641_v63, %v2606_v29  ;;  %v4774_v7 = vld [vmem:[#allocation27_spill] sm:$0xff]  ;;  %v4775_v37 = vld [vmem:[#allocation24_spill] sm:$0xff] }
 0xd8a   : > { %v2620_v29 = vmul.f32 %v4565_v24, %v4774_v7  ;;  %v2617_v63 = vmul.f32 %v4567_v47, %v4775_v37 }
 0xd8b   : > { %v2696_v48 = vadd.f32 %v2680_v57, %v2551_v36  ;;  %v2697_v16 = vadd.f32 %v2681_v30, %v2552_v19  ;;  %v2694_v10 = vadd.f32 %v2678_v50, %v2549_v39  ;;  %v2695_v32 = vadd.f32 %v2679_v25, %v2550_v0 }
 0xd8c   : > { %v2656_v2 = vpop.permute.xlu1 %2655  ;;  %v2651_v62 = vpop.permute.xlu0 %2650 }
 0xd8d   : > { %v2712_v27 = vmax.f32 %v2696_v48, 0.0  ;;  %v2713_v38 = vmax.f32 %v2697_v16, 0.0  ;;  %v2710_v58 = vmax.f32 %v2694_v10, 0.0  ;;  %v2711_v54 = vmax.f32 %v2695_v32, 0.0 }
 0xd8e   : > { %v2684_v59 = vadd.f32 %v2656_v2, %v2611_v60  ;;  %v2685_v12 = vadd.f32 %v2656_v2, %v2612_v44  ;;  %v2682_v26 = vadd.f32 %v2651_v62, %v2609_v46  ;;  %v2683_v49 = vadd.f32 %v2651_v62, %v2610_v22 }
 0xd8f   : > { %2890 = vst [vmem:[%s4485_s12 + $0x90] sm:$0xff] %v2712_v27  ;;  %2891 = vst [vmem:[%s4485_s12 + $0x98] sm:$0xff] %v2713_v38 }
 0xd90   : > { %2888 = vst [vmem:[%s4485_s12 + $0x80] sm:$0xff] %v2710_v58  ;;  %2889 = vst [vmem:[%s4485_s12 + $0x88] sm:$0xff] %v2711_v54  ;;  %v2700_v20 = vadd.f32 %v2684_v59, %v2555_v52  ;;  %v2701_v36 = vadd.f32 %v2685_v12, %v2556_v6  ;;  %v2698_v19 = vadd.f32 %v2682_v26, %v2553_v41  ;;  %v2666_v39 = vpop.permute.xlu1 %2665  ;;  %v2661_v0 = vpop.permute.xlu0 %2660  ;;  %v4773_v41 = vld [vmem:[#allocation26_spill] sm:$0xff] }
 0xd91   : > { %v2699_v34 = vadd.f32 %v2683_v49, %v2554_v31  ;;  %v2688_v14 = vadd.f32 %v2666_v39, %v2615_v11  ;;  %v2689_v43 = vadd.f32 %v2666_v39, %v2616_v35  ;;  %v2686_v13 = vadd.f32 %v2661_v0, %v2613_v56 }
 0xd92   : > { %v2687_v53 = vadd.f32 %v2661_v0, %v2614_v4  ;;  %v2716_v40 = vmax.f32 %v2700_v20, 0.0  ;;  %v2717_v9 = vmax.f32 %v2701_v36, 0.0  ;;  %v2714_v18 = vmax.f32 %v2698_v19, 0.0 }
 0xd93   : > { %v2715_v5 = vmax.f32 %v2699_v34, 0.0  ;;  %v2704_v51 = vadd.f32 %v2688_v14, %v2559_v1  ;;  %v2705_v42 = vadd.f32 %v2689_v43, %v2560_v23  ;;  %v2702_v52 = vadd.f32 %v2686_v13, %v2557_v45 }
 0xd94   : > { %v2703_v6 = vadd.f32 %v2687_v53, %v2558_v8  ;;  %v2619_v31 = vmul.f32 %v4565_v24, %v4773_v41  ;;  %2894 = vst [vmem:[%s4485_s12 + $0xb0] sm:$0xff] %v2716_v40  ;;  %2895 = vst [vmem:[%s4485_s12 + $0xb8] sm:$0xff] %v2717_v9  ;;  %v2676_v1 = vpop.permute.xlu1 %2675  ;;  %v2671_v23 = vpop.permute.xlu0 %2670 }
 0xd95   : > { %2892 = vst [vmem:[%s4485_s12 + $0xa0] sm:$0xff] %v2714_v18  ;;  %2893 = vst [vmem:[%s4485_s12 + $0xa8] sm:$0xff] %v2715_v5  ;;  %v2720_v45 = vmax.f32 %v2704_v51, 0.0  ;;  %v2721_v24 = vmax.f32 %v2705_v42, 0.0  ;;  %v2718_v8 = vmax.f32 %v2702_v52, 0.0  ;;  %v2693_v50 = vadd.f32 %v2676_v1, %v2620_v29 }
 0xd96   : > { %v2719_v57 = vmax.f32 %v2703_v6, 0.0  ;;  %v2692_v30 = vadd.f32 %v2676_v1, %v2619_v31  ;;  %v2690_v25 = vadd.f32 %v2671_v23, %v2617_v63  ;;  %v2691_v48 = vadd.f32 %v2671_v23, %v2618_v17 }
 0xd97   : > { %2898 = vst [vmem:[%s4485_s12 + $0xd0] sm:$0xff] %v2720_v45  ;;  %2899 = vst [vmem:[%s4485_s12 + $0xd8] sm:$0xff] %v2721_v24  ;;  %v2709_v16 = vadd.f32 %v2693_v50, %v2564_v55 }
 0xd98   : > { %2896 = vst [vmem:[%s4485_s12 + $0xc0] sm:$0xff] %v2718_v8  ;;  %2897 = vst [vmem:[%s4485_s12 + $0xc8] sm:$0xff] %v2719_v57  ;;  %v2708_v47 = vadd.f32 %v2692_v30, %v2563_v3  ;;  %v2706_v10 = vadd.f32 %v2690_v25, %v2561_v28  ;;  %v2707_v32 = vadd.f32 %v2691_v48, %v2562_v15 }
 0xd99   : > { %v2725_v60 = vmax.f32 %v2709_v16, 0.0 }
 0xd9a   : > { %v2724_v3 = vmax.f32 %v2708_v47, 0.0  ;;  %v2722_v33 = vmax.f32 %v2706_v10, 0.0  ;;  %v2723_v55 = vmax.f32 %v2707_v32, 0.0 }
 0xd9b   : > { %2903 = vst [vmem:[%s4485_s12 + $0xf8] sm:$0xff] %v2725_v60 }
 0xd9c   : > { %2902 = vst [vmem:[%s4485_s12 + $0xf0] sm:$0xff] %v2724_v3  ;;  %2900 = vst [vmem:[%s4485_s12 + $0xe0] sm:$0xff] %v2722_v33 }
 0xd9d   : > { %2901 = vst [vmem:[%s4485_s12 + $0xe8] sm:$0xff] %v2723_v55 }
 0xd9e   : > { %3113 = shalt.err (!%p3110_p3)
}
 0xd9f   : > { %s3114_s12 = scalar_lea.hbm %s4630_s24, 4096  ;;  %s3118_s30 = scalar_lea.hbm %s4691_s11, 16384 }
 0xda0   : > { %p3115_p4 = scmp.ne.s32.totalorder %s4630_s24, %s3114_s12  ;;  %p3119_p9 = scmp.lt.s32.totalorder %s4630_s24, %s4691_s11 }
 0xda1   : > { %p3120_p10 = scmp.lt.s32.totalorder %s3118_s30, %s3114_s12 }
 0xda2   : > { %p3116_p7 = pnand %p3115_p4, %p3265_p5 }
 0xda3   : > { %p3121_p11 = por %p3120_p10, %p3119_p9 }
 0xda4   : > { %p3117_p8 = pneg %p3116_p7 }
 0xda6   : > { %p3122_p12 = pnand %p3121_p11, %p3117_p8 }
 0xda8   : > { %3125 = shalt.err (!%p3122_p12)
}
 0xda9   : > { %s3165_s21 = smov 256   ;;  %s3166_s0 = smov 16  }
 0xdaa   : > { %2949 = dma.vmem_to_hbm [thread:$0]  (%p3265_p5), %s4632_s16, 4096, %s4630_s24, %s4640_s22, %s3165_s21, %s3165_s21, %s3166_s0  }
 0xdab PF: > { %p2955_p13 = scmp.ge.s32.totalorder %s3160_s20, 2  ;;  %s2773_s29 = sand.u32 1, %s3148_s17  }
 0xdac   : > { %s2774_s15 = scalar_lea.sflag [#allocation3], %s2773_s29 }
 0xdad   : > { %p2952_p0 = pnand %p2955_p13, %p3269_p6 }
 0xdaf   : > { %p2953_p1 = pneg %p2952_p0 }
 0xdb1   : > { %3143 = dma.done.wait (%p2953_p1), %s2774_s15, 4096  }
 0xdb2   : > { %3145 = vsyncadd (%p2953_p1), %s2774_s15, 4294963200  ;;  %s4778_s20 = sld [smem:[#allocation6_spill]]  ;;  %s4781_s17 = smov %s3152_s18 }
 0xdb3   : > { %s4779_s25 = sld [smem:[#allocation5_spill]] }
 0xdb4   : > { %s4780_s19 = sld [smem:[#allocation7_spill]] }
 0xdb8   : > { %p21_p2 = scmp.ge.s32.totalorder %s4778_s20, 6  }
 0xdb9   : > { %s4782_s18 = smov %s4779_s25 }
 0xdba   :  { %23 = sbr.rel (!%p21_p2) target bundleno = 6 (0x6), region = 101 }
 0xdbf   :  { %2779 = vsyncpa [#allocation3], 1 }
 0xdc0   :  { %2781 = vsyncpa [#allocation3 + $0x1], 1 }

</bundles_post_ra>
